<compile_context>
chip_gen: v7x
topology: tpu7x:2x2x1
jax: 0.10.0
libtpu: 0.0.40
codegen_flags: <defaults>
</compile_context>

<pallas_src>
import functools

import jax
import jax.numpy as jnp
from jax import lax
from jax.experimental import pallas as pl
from jax.experimental.pallas import tpu as pltpu


_LANE = 128      # TPU lane width
_SUBLANE = 8     # TPU sublane width (f32)


def _round_up(x, m):
    return ((x + m - 1) // m) * m


def _pick_batch_block(batch, cap=128):
    """Sublane-aligned batch block; whole batch if small, capped otherwise."""
    return min(_round_up(batch, _SUBLANE), cap)


def _pick_time_block(seq_len, b_blk, hp, cap=32, gate_budget_bytes=2 << 20):
    """Largest divisor of seq_len that keeps the gate scratch under budget."""
    rows_budget = max(b_blk, gate_budget_bytes // (4 * hp * 4))
    cap = max(1, min(cap, rows_budget // b_blk, seq_len))
    for cand in range(cap, 0, -1):
        if seq_len % cand == 0:
            return cand
    return 1


# ----------------------------------------------------------------------------
# LSTM block kernel.
# Grid: (batch_blocks ["parallel"], time_blocks ["arbitrary"]).
# Each grid step consumes a (T_BLK * B_BLK, IN) slab of packed inputs, runs the
# hoisted input projection once, then the serial recurrence over T_BLK steps.
# ----------------------------------------------------------------------------
def _lstm_block_body(x_ref, h0_ref, c0_ref, wih_ref, whh_ref, b_ref,
                     out_ref, hT_ref, cT_ref, gates_s,
                     *, hp, t_blk, b_blk):
    tb = pl.program_id(1)

    @pl.when(tb == 0)
    def _():
        hT_ref[...] = h0_ref[...]
        cT_ref[...] = c0_ref[...]

    # Time-parallel input projection, hoisted out of the recurrence:
    # one (T_BLK*B_BLK, IN) x (IN, 4*Hp) GEMM per grid step.
    gates_s[...] = (
        jnp.dot(x_ref[...], wih_ref[...], preferred_element_type=jnp.float32)
        + b_ref[...])

    def step(i, carry):
        h, c = carry
        row = pl.multiple_of(i * b_blk, b_blk)
        g = (gates_s[pl.ds(row, b_blk), :]
             + jnp.dot(h, whh_ref[...], preferred_element_type=jnp.float32))
        # Gate layout is (i, f, o, g): one sigmoid over a contiguous 3*Hp slab.
        ifo = jax.nn.sigmoid(g[:, :3 * hp])
        gg = jnp.tanh(g[:, 3 * hp:])
        c = ifo[:, hp:2 * hp] * c + ifo[:, :hp] * gg
        h = ifo[:, 2 * hp:] * jnp.tanh(c)
        out_ref[pl.ds(row, b_blk), :] = h
        return (h, c)

    h_fin, c_fin = lax.fori_loop(0, t_blk, step,
                                 (hT_ref[...], cT_ref[...]), unroll=True)
    hT_ref[...] = h_fin
    cT_ref[...] = c_fin


def _lstm_block_kernel(x_ref, h0_ref, c0_ref, wih_ref, whh_ref, b_ref,
                       out_ref, hT_ref, cT_ref, gates_s,
                       *, hp, t_blk, b_blk):
    _lstm_block_body(x_ref, h0_ref, c0_ref, wih_ref, whh_ref, b_ref,
                     out_ref, hT_ref, cT_ref, gates_s,
                     hp=hp, t_blk=t_blk, b_blk=b_blk)


def _lstm_block_head_kernel(x_ref, h0_ref, c0_ref, wih_ref, whh_ref, b_ref,
                            wg_ref, bg_ref,
                            out_ref, hT_ref, cT_ref, gmm_ref, gates_s,
                            *, hp, t_blk, b_blk):
    _lstm_block_body(x_ref, h0_ref, c0_ref, wih_ref, whh_ref, b_ref,
                     out_ref, hT_ref, cT_ref, gates_s,
                     hp=hp, t_blk=t_blk, b_blk=b_blk)
    # Fused GMM linear head on the hidden block already resident in VMEM.
    gmm_ref[...] = (
        jnp.dot(out_ref[...], wg_ref[...], preferred_element_type=jnp.float32)
        + bg_ref[...])


def _lstm_layer(x_packed, h0, c0, w_ih, w_hh, b,
                head_w=None, head_b=None, *, t_blk, b_blk):
    """One LSTM layer (optionally fused with the GMM head).

    x_packed: (NB, T*B_BLK, IN) packed activations (batch-block major, time
    major / batch minor inside each block).
    Returns (out_packed, h_T, c_T[, gmm_packed]).
    """
    nb, rows, in_dim = x_packed.shape
    hp = h0.shape[-1]
    four_h = 4 * hp
    blk_rows = t_blk * b_blk
    nt = rows // blk_rows

    in_specs = [
        pl.BlockSpec((None, blk_rows, in_dim), lambda bb, tb: (bb, tb, 0)),
        pl.BlockSpec((b_blk, hp), lambda bb, tb: (bb, 0)),
        pl.BlockSpec((b_blk, hp), lambda bb, tb: (bb, 0)),
        pl.BlockSpec((in_dim, four_h), lambda bb, tb: (0, 0)),
        pl.BlockSpec((hp, four_h), lambda bb, tb: (0, 0)),
        pl.BlockSpec((1, four_h), lambda bb, tb: (0, 0)),
    ]
    out_specs = [
        pl.BlockSpec((None, blk_rows, hp), lambda bb, tb: (bb, tb, 0)),
        pl.BlockSpec((b_blk, hp), lambda bb, tb: (bb, 0)),
        pl.BlockSpec((b_blk, hp), lambda bb, tb: (bb, 0)),
    ]
    out_shape = [
        jax.ShapeDtypeStruct((nb, rows, hp), jnp.float32),
        jax.ShapeDtypeStruct((nb * b_blk, hp), jnp.float32),
        jax.ShapeDtypeStruct((nb * b_blk, hp), jnp.float32),
    ]
    args = [x_packed, h0, c0, w_ih, w_hh, b]

    if head_w is not None:
        outp = head_w.shape[-1]
        in_specs += [
            pl.BlockSpec((hp, outp), lambda bb, tb: (0, 0)),
            pl.BlockSpec((1, outp), lambda bb, tb: (0, 0)),
        ]
        out_specs.append(
            pl.BlockSpec((None, blk_rows, outp), lambda bb, tb: (bb, tb, 0)))
        out_shape.append(jax.ShapeDtypeStruct((nb, rows, outp), jnp.float32))
        args += [head_w, head_b]
        kernel = functools.partial(_lstm_block_head_kernel, hp=hp,
                                   t_blk=t_blk, b_blk=b_blk)
    else:
        kernel = functools.partial(_lstm_block_kernel, hp=hp,
                                   t_blk=t_blk, b_blk=b_blk)

    grid_spec = pltpu.PrefetchScalarGridSpec(
        num_scalar_prefetch=0,
        grid=(nb, nt),
        in_specs=in_specs,
        out_specs=out_specs,
        # Per-block gate pre-activations (hoisted projection result).
        scratch_shapes=[pltpu.VMEM((blk_rows, four_h), jnp.float32)],
    )
    return pl.pallas_call(
        kernel,
        grid_spec=grid_spec,
        out_shape=out_shape,
        compiler_params=pltpu.CompilerParams(
            dimension_semantics=("parallel", "arbitrary")),
    )(*args)


# ----------------------------------------------------------------------------
# Jitted end-to-end forward: packing, per-layer pallas_calls, tiny epilogue.
# ----------------------------------------------------------------------------
@functools.partial(jax.jit, static_argnames=("cfg",))
def _mdnrnn_forward(params, actions, states, hidden, *, cfg):
    (state_dim, action_dim, num_hiddens, num_layers,
     num_gaussians, hp, outp, out_dim) = cfg
    T, B = actions.shape[0], actions.shape[1]
    H, L, G, S = num_hiddens, num_layers, num_gaussians, state_dim

    b_blk = _pick_batch_block(B)
    bp = _round_up(B, b_blk)
    nb = bp // b_blk
    t_blk = _pick_time_block(T, b_blk, hp)

    ins = jnp.concatenate([actions, states], axis=-1).astype(jnp.float32)
    if bp != B:
        ins = jnp.pad(ins, ((0, 0), (0, bp - B), (0, 0)))

    if hidden is None:
        h0 = jnp.zeros((L, bp, hp), jnp.float32)
        c0 = jnp.zeros((L, bp, hp), jnp.float32)
    else:
        h0_in, c0_in = hidden
        h0 = jnp.pad(h0_in.astype(jnp.float32),
                     ((0, 0), (0, bp - B), (0, hp - H)))
        c0 = jnp.pad(c0_in.astype(jnp.float32),
                     ((0, 0), (0, bp - B), (0, hp - H)))

    # Pack (T, Bp, F) -> (NB, T*B_BLK, F).  Layers hand activations to each
    # other directly in this layout (no transposes between pallas_calls).
    def pack(a):
        feat = a.shape[-1]
        return (a.reshape(T, nb, b_blk, feat)
                 .transpose(1, 0, 2, 3)
                 .reshape(nb, T * b_blk, feat))

    def unpack(a):
        feat = a.shape[-1]
        return (a.reshape(nb, T, b_blk, feat)
                 .transpose(1, 0, 2, 3)
                 .reshape(T, bp, feat))

    x = pack(ins)
    h_lasts, c_lasts = [], []
    gmm_packed = None
    for layer in range(L):
        w_ih, w_hh, b = params["lstm"][layer]
        if layer == L - 1:
            x, h_t, c_t, gmm_packed = _lstm_layer(
                x, h0[layer], c0[layer], w_ih, w_hh, b,
                params["gmm_w"], params["gmm_b"], t_blk=t_blk, b_blk=b_blk)
        else:
            x, h_t, c_t = _lstm_layer(
                x, h0[layer], c0[layer], w_ih, w_hh, b,
                t_blk=t_blk, b_blk=b_blk)
        h_lasts.append(h_t[:B, :H])
        c_lasts.append(c_t[:B, :H])

    all_steps_hidden = unpack(x)[:, :B, :H]              # (T, B, H)
    last_hidden_and_cell = (jnp.stack(h_lasts, axis=0),
                            jnp.stack(c_lasts, axis=0))   # (L, B, H) each

    # Tiny epilogue left to XLA: slice the real columns of the lane-padded
    # head output and apply exp / log_softmax.
    gm = unpack(gmm_packed)[:, :B, :out_dim]              # (T, B, out_dim)
    stride = G * S
    mus = gm[..., :stride].reshape(T, B, G, S)
    sigmas = jnp.exp(gm[..., stride:2 * stride]).reshape(T, B, G, S)
    logpi = jax.nn.log_softmax(
        gm[..., 2 * stride:2 * stride + G], axis=-1).reshape(T, B, G)
    reward = gm[..., -2]
    not_terminal = gm[..., -1]
    return (mus, sigmas, logpi, reward, not_terminal, all_steps_hidden,
            last_hidden_and_cell)


# ----------------------------------------------------------------------------
# MDNRNN module (forward only), parameters initialized deterministically.
# ----------------------------------------------------------------------------
class MDNRNNPallas:
    def __init__(self, state_dim, action_dim, num_hiddens, num_hidden_layers,
                 num_gaussians, key):
        self.state_dim = state_dim
        self.action_dim = action_dim
        self.num_hiddens = num_hiddens
        self.num_hidden_layers = num_hidden_layers
        self.num_gaussians = num_gaussians
        self.out_dim = (2 * state_dim + 1) * num_gaussians + 2

        H = num_hiddens
        self.hp = _round_up(H, _LANE)               # lane-padded hidden size
        self.outp = _round_up(self.out_dim, _LANE)  # lane-padded head width

        bound = 1.0 / jnp.sqrt(jnp.float32(H))

        def uni(k, shape):
            return jax.random.uniform(k, shape, jnp.float32, -bound, bound)

        # Reference-layout parameters (PyTorch gate order i, f, g, o).
        self.lstm_params = []
        in_dim = state_dim + action_dim
        for _ in range(num_hidden_layers):
            key, k1, k2, k3, k4 = jax.random.split(key, 5)
            w_ih_t = uni(k1, (in_dim, 4 * H))        # transposed W_ih
            w_hh_t = uni(k2, (H, 4 * H))             # transposed W_hh
            b = uni(k3, (1, 4 * H)) + uni(k4, (1, 4 * H))   # b_ih + b_hh
            self.lstm_params.append((w_ih_t, w_hh_t, b))
            in_dim = H

        key, k1, k2 = jax.random.split(key, 3)
        self.gmm_w_t = uni(k1, (H, self.out_dim))
        self.gmm_b = uni(k2, (1, self.out_dim))

        # Kernel-layout parameters: gate order (i, f, o, g), each gate lane
        # padded to hp columns, rows padded to hp where the input is a padded
        # hidden vector.  Zero padding keeps padded hidden lanes exactly zero
        # through the recurrence (i=f=o=0.5, g=0 => c=h=0), so no masking is
        # needed inside the kernels.
        hp, H_ = self.hp, H

        def pad_gate_cols(w):
            gi, gf, gg, go = jnp.split(w, 4, axis=-1)
            return jnp.concatenate(
                [jnp.pad(p, ((0, 0), (0, hp - H_))) for p in (gi, gf, go, gg)],
                axis=-1)

        k_lstm = []
        for layer, (w_ih_t, w_hh_t, b) in enumerate(self.lstm_params):
            w_ih_k = pad_gate_cols(w_ih_t)
            if layer > 0:
                w_ih_k = jnp.pad(w_ih_k, ((0, hp - H_), (0, 0)))
            w_hh_k = jnp.pad(pad_gate_cols(w_hh_t), ((0, hp - H_), (0, 0)))
            b_k = pad_gate_cols(b)
            k_lstm.append((w_ih_k, w_hh_k, b_k))

        k_gmm_w = jnp.pad(
            self.gmm_w_t, ((0, hp - H_), (0, self.outp - self.out_dim)))
        k_gmm_b = jnp.pad(
            self.gmm_b, ((0, 0), (0, self.outp - self.out_dim)))

        self.params = {"lstm": k_lstm, "gmm_w": k_gmm_w, "gmm_b": k_gmm_b}
        self._cfg = (state_dim, action_dim, num_hiddens, num_hidden_layers,
                     num_gaussians, self.hp, self.outp, self.out_dim)

    def forward(self, actions, states, hidden=None):
        return _mdnrnn_forward(self.params, actions, states, hidden,
                               cfg=self._cfg)


# ----------------------------------------------------------------------------
# Pure-JAX reference (mirrors the PyTorch semantics) for a sanity check.
# ----------------------------------------------------------------------------
def _reference_forward(model, actions, states):
    T, B = actions.shape[0], actions.shape[1]
    H, L, G, S = (model.num_hiddens, model.num_hidden_layers,
                  model.num_gaussians, model.state_dim)
    ins = jnp.concatenate([actions, states], axis=-1)

    x = ins
    h_lasts, c_lasts = [], []
    for layer in range(L):
        w_ih_t, w_hh_t, b = model.lstm_params[layer]

        def step(carry, xt, w_ih_t=w_ih_t, w_hh_t=w_hh_t, b=b):
            h, c = carry
            gates = xt @ w_ih_t + h @ w_hh_t + b[0]
            i = jax.nn.sigmoid(gates[:, 0 * H:1 * H])
            f = jax.nn.sigmoid(gates[:, 1 * H:2 * H])
            g = jnp.tanh(gates[:, 2 * H:3 * H])
            o = jax.nn.sigmoid(gates[:, 3 * H:4 * H])
            c = f * c + i * g
            h = o * jnp.tanh(c)
            return (h, c), h

        (h_T, c_T), hs = jax.lax.scan(
            step, (jnp.zeros((B, H)), jnp.zeros((B, H))), x)
        x = hs
        h_lasts.append(h_T)
        c_lasts.append(c_T)

    gmm = x.reshape(T * B, H) @ model.gmm_w_t + model.gmm_b[0]
    stride = G * S
    mus = gmm[:, :stride].reshape(T, B, G, S)
    sigmas = jnp.exp(gmm[:, stride:2 * stride]).reshape(T, B, G, S)
    logpi = jax.nn.log_softmax(
        gmm[:, 2 * stride:2 * stride + G], axis=-1).reshape(T, B, G)
    reward = gmm[:, -2].reshape(T, B)
    not_terminal = gmm[:, -1].reshape(T, B)
    return (mus, sigmas, logpi, reward, not_terminal, x,
            (jnp.stack(h_lasts), jnp.stack(c_lasts)))


if __name__ == "__main__":
    SEQ_LEN, BATCH = 8, 2
    STATE_DIM, ACTION_DIM = 8, 4
    NUM_HIDDENS, NUM_LAYERS, NUM_GAUSSIANS = 32, 2, 3

    key = jax.random.PRNGKey(0)
    key, ka, ks, kp = jax.random.split(key, 4)
    actions = jax.random.normal(ka, (SEQ_LEN, BATCH, ACTION_DIM), jnp.float32)
    states = jax.random.normal(ks, (SEQ_LEN, BATCH, STATE_DIM), jnp.float32)

    model = MDNRNNPallas(STATE_DIM, ACTION_DIM, NUM_HIDDENS, NUM_LAYERS,
                         NUM_GAUSSIANS, kp)

    outs = model.forward(actions, states)
    outs = jax.block_until_ready(outs)

    # Sanity check against a pure-JAX reference of the same math.
    refs = _reference_forward(model, actions, states)
    flat_o, _ = jax.tree_util.tree_flatten(outs)
    flat_r, _ = jax.tree_util.tree_flatten(refs)
    for o, r in zip(flat_o, flat_r):
        assert o.shape == r.shape, (o.shape, r.shape)
        assert jnp.allclose(o, r, atol=1e-4, rtol=1e-4), "mismatch vs reference"

    print("KERNEL_OK")
</pallas_src>

<mosaic_0001>
module attributes {stable_mosaic.version = 11 : i64} {
  func.func @_lstm_block_kernel(%arg0: i32, %arg1: i32, %arg2: memref<1x64x12xf32, #tpu.memory_space<vmem>>, %arg3: memref<8x128xf32, #tpu.memory_space<vmem>>, %arg4: memref<8x128xf32, #tpu.memory_space<vmem>>, %arg5: memref<12x512xf32, #tpu.memory_space<vmem>>, %arg6: memref<128x512xf32, #tpu.memory_space<vmem>>, %arg7: memref<1x512xf32, #tpu.memory_space<vmem>>, %arg8: memref<1x64x128xf32, #tpu.memory_space<vmem>>, %arg9: memref<8x128xf32, #tpu.memory_space<vmem>>, %arg10: memref<8x128xf32, #tpu.memory_space<vmem>>, %arg11: memref<64x512xf32, #tpu.memory_space<vmem>>) attributes {dimension_semantics = [#tpu.dimension_semantics<parallel>, #tpu.dimension_semantics<arbitrary>], iteration_bounds = array<i64: 1, 1>, scalar_prefetch = 0 : i64, scratch_operands = 1 : i64, tpu.core_type = #tpu.core_type<tc>, window_params = [{transform_indices = @transform_0, window_bounds = array<i64: 1, 64, 12>}, {transform_indices = @transform_1, window_bounds = array<i64: 8, 128>}, {transform_indices = @transform_2, window_bounds = array<i64: 8, 128>}, {pipeline_mode = #tpu.pipeline_mode<synchronous>, transform_indices = @transform_3, window_bounds = array<i64: 12, 512>}, {pipeline_mode = #tpu.pipeline_mode<synchronous>, transform_indices = @transform_4, window_bounds = array<i64: 128, 512>}, {pipeline_mode = #tpu.pipeline_mode<synchronous>, transform_indices = @transform_5, window_bounds = array<i64: 1, 512>}, {transform_indices = @transform_6, window_bounds = array<i64: 1, 64, 128>}, {transform_indices = @transform_7, window_bounds = array<i64: 8, 128>}, {transform_indices = @transform_8, window_bounds = array<i64: 8, 128>}]} {
    %c0_i32 = arith.constant 0 : i32
    %0 = arith.cmpi eq, %arg1, %c0_i32 : i32
    %1 = arith.extui %0 : i1 to i32
    %c0_i32_0 = arith.constant 0 : i32
    %2 = arith.cmpi ne, %1, %c0_i32_0 : i32
    scf.if %2 {
      %c0_82 = arith.constant 0 : index
      %c0_83 = arith.constant 0 : index
      %231 = vector.load %arg3[%c0_82, %c0_83] : memref<8x128xf32, #tpu.memory_space<vmem>>, vector<8x128xf32>
      %c0_84 = arith.constant 0 : index
      %c0_85 = arith.constant 0 : index
      %232 = vector.load %arg9[%c0_84, %c0_85] : memref<8x128xf32, #tpu.memory_space<vmem>>, vector<8x128xf32>
      tpu.vector_store %arg9[%c0_84, %c0_85], %231 {strides = array<i32>} : memref<8x128xf32, #tpu.memory_space<vmem>>, vector<8x128xf32>,
      %c0_86 = arith.constant 0 : index
      %c0_87 = arith.constant 0 : index
      %233 = vector.load %arg4[%c0_86, %c0_87] : memref<8x128xf32, #tpu.memory_space<vmem>>, vector<8x128xf32>
      %c0_88 = arith.constant 0 : index
      %c0_89 = arith.constant 0 : index
      %234 = vector.load %arg10[%c0_88, %c0_89] : memref<8x128xf32, #tpu.memory_space<vmem>>, vector<8x128xf32>
      tpu.vector_store %arg10[%c0_88, %c0_89], %233 {strides = array<i32>} : memref<8x128xf32, #tpu.memory_space<vmem>>, vector<8x128xf32>,
    } else {
    }
    %c0 = arith.constant 0 : index
    %c0_1 = arith.constant 0 : index
    %c0_2 = arith.constant 0 : index
    %3 = vector.load %arg2[%c0, %c0_1, %c0_2] : memref<1x64x12xf32, #tpu.memory_space<vmem>>, vector<1x64x12xf32>
    %4 = vector.shape_cast %3 : vector<1x64x12xf32> to vector<64x12xf32>
    %c0_3 = arith.constant 0 : index
    %c0_4 = arith.constant 0 : index
    %5 = vector.load %arg5[%c0_3, %c0_4] : memref<12x512xf32, #tpu.memory_space<vmem>>, vector<12x512xf32>
    %cst = arith.constant dense<0.000000e+00> : vector<64x512xf32>
    %6 = tpu.matmul %4, %5, %cst {dimension_numbers = #tpu.dot_dimension_numbers<[1], [0], [0], [1], [0, 0, 1, 1], [], []>} : vector<64x12xf32>, vector<12x512xf32>, vector<64x512xf32> -> vector<64x512xf32>
    %c0_5 = arith.constant 0 : index
    %c0_6 = arith.constant 0 : index
    %7 = vector.load %arg7[%c0_5, %c0_6] : memref<1x512xf32, #tpu.memory_space<vmem>>, vector<1x512xf32>
    %8 = vector.broadcast %7 : vector<1x512xf32> to vector<64x512xf32>
    %9 = arith.addf %6, %8 : vector<64x512xf32>
    %c0_7 = arith.constant 0 : index
    %c0_8 = arith.constant 0 : index
    %10 = vector.load %arg11[%c0_7, %c0_8] : memref<64x512xf32, #tpu.memory_space<vmem>>, vector<64x512xf32>
    tpu.vector_store %arg11[%c0_7, %c0_8], %9 {strides = array<i32>} : memref<64x512xf32, #tpu.memory_space<vmem>>, vector<64x512xf32>,
    %c0_9 = arith.constant 0 : index
    %c0_10 = arith.constant 0 : index
    %11 = vector.load %arg9[%c0_9, %c0_10] : memref<8x128xf32, #tpu.memory_space<vmem>>, vector<8x128xf32>
    %c0_11 = arith.constant 0 : index
    %c0_12 = arith.constant 0 : index
    %12 = vector.load %arg10[%c0_11, %c0_12] : memref<8x128xf32, #tpu.memory_space<vmem>>, vector<8x128xf32>
    %c0_i32_13 = arith.constant 0 : i32
    %c8_i32 = arith.constant 8 : i32
    %13 = arith.muli %c0_i32_13, %c8_i32 : i32
    %14 = tpu.assume_multiple %13, 8 : i32
    %15 = arith.index_cast %14 : i32 to index
    %c0_14 = arith.constant 0 : index
    %16 = vector.load %arg11[%15, %c0_14] : memref<64x512xf32, #tpu.memory_space<vmem>>, vector<8x512xf32>
    %c0_15 = arith.constant 0 : index
    %c0_16 = arith.constant 0 : index
    %17 = vector.load %arg6[%c0_15, %c0_16] : memref<128x512xf32, #tpu.memory_space<vmem>>, vector<128x512xf32>
    %cst_17 = arith.constant dense<0.000000e+00> : vector<8x512xf32>
    %18 = tpu.matmul %11, %17, %cst_17 {dimension_numbers = #tpu.dot_dimension_numbers<[1], [0], [0], [1], [0, 0, 1, 1], [], []>} : vector<8x128xf32>, vector<128x512xf32>, vector<8x512xf32> -> vector<8x512xf32>
    %19 = arith.addf %16, %18 : vector<8x512xf32>
    %20 = vector.extract_strided_slice %19 {offsets = [0, 0], sizes = [8, 384], strides = [1, 1]} : vector<8x512xf32> to vector<8x384xf32>
    %21 = arith.negf %20 : vector<8x384xf32>
    %22 = math.exp %21 : vector<8x384xf32>
    %cst_18 = arith.constant 1.000000e+00 : f32
    %23 = vector.broadcast %cst_18 : f32 to vector<8x384xf32>
    %24 = arith.addf %23, %22 : vector<8x384xf32>
    %25 = arith.divf %23, %24 : vector<8x384xf32>
    %26 = vector.extract_strided_slice %19 {offsets = [0, 384], sizes = [8, 128], strides = [1, 1]} : vector<8x512xf32> to vector<8x128xf32>
    %27 = math.tanh %26 : vector<8x128xf32>
    %28 = vector.extract_strided_slice %25 {offsets = [0, 128], sizes = [8, 128], strides = [1, 1]} : vector<8x384xf32> to vector<8x128xf32>
    %29 = arith.mulf %28, %12 : vector<8x128xf32>
    %30 = vector.extract_strided_slice %25 {offsets = [0, 0], sizes = [8, 128], strides = [1, 1]} : vector<8x384xf32> to vector<8x128xf32>
    %31 = arith.mulf %30, %27 : vector<8x128xf32>
    %32 = arith.addf %29, %31 : vector<8x128xf32>
    %33 = vector.extract_strided_slice %25 {offsets = [0, 256], sizes = [8, 128], strides = [1, 1]} : vector<8x384xf32> to vector<8x128xf32>
    %34 = math.tanh %32 : vector<8x128xf32>
    %35 = arith.mulf %33, %34 : vector<8x128xf32>
    %c0_19 = arith.constant 0 : index
    %36 = arith.index_cast %14 : i32 to index
    %c0_20 = arith.constant 0 : index
    %37 = vector.load %arg8[%c0_19, %36, %c0_20] : memref<1x64x128xf32, #tpu.memory_space<vmem>>, vector<1x8x128xf32>
    %38 = vector.shape_cast %37 : vector<1x8x128xf32> to vector<8x128xf32>
    %39 = vector.shape_cast %35 : vector<8x128xf32> to vector<1x8x128xf32>
    tpu.vector_store %arg8[%c0_19, %36, %c0_20], %39 {strides = array<i32>} : memref<1x64x128xf32, #tpu.memory_space<vmem>>, vector<1x8x128xf32>,
    %c1_i32 = arith.constant 1 : i32
    %c8_i32_21 = arith.constant 8 : i32
    %40 = arith.muli %c1_i32, %c8_i32_21 : i32
    %41 = tpu.assume_multiple %40, 8 : i32
    %42 = arith.index_cast %41 : i32 to index
    %c0_22 = arith.constant 0 : index
    %43 = vector.load %arg11[%42, %c0_22] : memref<64x512xf32, #tpu.memory_space<vmem>>, vector<8x512xf32>
    %c0_23 = arith.constant 0 : index
    %c0_24 = arith.constant 0 : index
    %44 = vector.load %arg6[%c0_23, %c0_24] : memref<128x512xf32, #tpu.memory_space<vmem>>, vector<128x512xf32>
    %cst_25 = arith.constant dense<0.000000e+00> : vector<8x512xf32>
    %45 = tpu.matmul %35, %44, %cst_25 {dimension_numbers = #tpu.dot_dimension_numbers<[1], [0], [0], [1], [0, 0, 1, 1], [], []>} : vector<8x128xf32>, vector<128x512xf32>, vector<8x512xf32> -> vector<8x512xf32>
    %46 = arith.addf %43, %45 : vector<8x512xf32>
    %47 = vector.extract_strided_slice %46 {offsets = [0, 0], sizes = [8, 384], strides = [1, 1]} : vector<8x512xf32> to vector<8x384xf32>
    %48 = arith.negf %47 : vector<8x384xf32>
    %49 = math.exp %48 : vector<8x384xf32>
    %cst_26 = arith.constant 1.000000e+00 : f32
    %50 = vector.broadcast %cst_26 : f32 to vector<8x384xf32>
    %51 = arith.addf %50, %49 : vector<8x384xf32>
    %52 = arith.divf %50, %51 : vector<8x384xf32>
    %53 = vector.extract_strided_slice %46 {offsets = [0, 384], sizes = [8, 128], strides = [1, 1]} : vector<8x512xf32> to vector<8x128xf32>
    %54 = math.tanh %53 : vector<8x128xf32>
    %55 = vector.extract_strided_slice %52 {offsets = [0, 128], sizes = [8, 128], strides = [1, 1]} : vector<8x384xf32> to vector<8x128xf32>
    %56 = arith.mulf %55, %32 : vector<8x128xf32>
    %57 = vector.extract_strided_slice %52 {offsets = [0, 0], sizes = [8, 128], strides = [1, 1]} : vector<8x384xf32> to vector<8x128xf32>
    %58 = arith.mulf %57, %54 : vector<8x128xf32>
    %59 = arith.addf %56, %58 : vector<8x128xf32>
    %60 = vector.extract_strided_slice %52 {offsets = [0, 256], sizes = [8, 128], strides = [1, 1]} : vector<8x384xf32> to vector<8x128xf32>
    %61 = math.tanh %59 : vector<8x128xf32>
    %62 = arith.mulf %60, %61 : vector<8x128xf32>
    %c0_27 = arith.constant 0 : index
    %63 = arith.index_cast %41 : i32 to index
    %c0_28 = arith.constant 0 : index
    %64 = vector.load %arg8[%c0_27, %63, %c0_28] : memref<1x64x128xf32, #tpu.memory_space<vmem>>, vector<1x8x128xf32>
    %65 = vector.shape_cast %64 : vector<1x8x128xf32> to vector<8x128xf32>
    %66 = vector.shape_cast %62 : vector<8x128xf32> to vector<1x8x128xf32>
    tpu.vector_store %arg8[%c0_27, %63, %c0_28], %66 {strides = array<i32>} : memref<1x64x128xf32, #tpu.memory_space<vmem>>, vector<1x8x128xf32>,
    %c2_i32 = arith.constant 2 : i32
    %c8_i32_29 = arith.constant 8 : i32
    %67 = arith.muli %c2_i32, %c8_i32_29 : i32
    %68 = tpu.assume_multiple %67, 8 : i32
    %69 = arith.index_cast %68 : i32 to index
    %c0_30 = arith.constant 0 : index
    %70 = vector.load %arg11[%69, %c0_30] : memref<64x512xf32, #tpu.memory_space<vmem>>, vector<8x512xf32>
    %c0_31 = arith.constant 0 : index
    %c0_32 = arith.constant 0 : index
    %71 = vector.load %arg6[%c0_31, %c0_32] : memref<128x512xf32, #tpu.memory_space<vmem>>, vector<128x512xf32>
    %cst_33 = arith.constant dense<0.000000e+00> : vector<8x512xf32>
    %72 = tpu.matmul %62, %71, %cst_33 {dimension_numbers = #tpu.dot_dimension_numbers<[1], [0], [0], [1], [0, 0, 1, 1], [], []>} : vector<8x128xf32>, vector<128x512xf32>, vector<8x512xf32> -> vector<8x512xf32>
    %73 = arith.addf %70, %72 : vector<8x512xf32>
    %74 = vector.extract_strided_slice %73 {offsets = [0, 0], sizes = [8, 384], strides = [1, 1]} : vector<8x512xf32> to vector<8x384xf32>
    %75 = arith.negf %74 : vector<8x384xf32>
    %76 = math.exp %75 : vector<8x384xf32>
    %cst_34 = arith.constant 1.000000e+00 : f32
    %77 = vector.broadcast %cst_34 : f32 to vector<8x384xf32>
    %78 = arith.addf %77, %76 : vector<8x384xf32>
    %79 = arith.divf %77, %78 : vector<8x384xf32>
    %80 = vector.extract_strided_slice %73 {offsets = [0, 384], sizes = [8, 128], strides = [1, 1]} : vector<8x512xf32> to vector<8x128xf32>
    %81 = math.tanh %80 : vector<8x128xf32>
    %82 = vector.extract_strided_slice %79 {offsets = [0, 128], sizes = [8, 128], strides = [1, 1]} : vector<8x384xf32> to vector<8x128xf32>
    %83 = arith.mulf %82, %59 : vector<8x128xf32>
    %84 = vector.extract_strided_slice %79 {offsets = [0, 0], sizes = [8, 128], strides = [1, 1]} : vector<8x384xf32> to vector<8x128xf32>
    %85 = arith.mulf %84, %81 : vector<8x128xf32>
    %86 = arith.addf %83, %85 : vector<8x128xf32>
    %87 = vector.extract_strided_slice %79 {offsets = [0, 256], sizes = [8, 128], strides = [1, 1]} : vector<8x384xf32> to vector<8x128xf32>
    %88 = math.tanh %86 : vector<8x128xf32>
    %89 = arith.mulf %87, %88 : vector<8x128xf32>
    %c0_35 = arith.constant 0 : index
    %90 = arith.index_cast %68 : i32 to index
    %c0_36 = arith.constant 0 : index
    %91 = vector.load %arg8[%c0_35, %90, %c0_36] : memref<1x64x128xf32, #tpu.memory_space<vmem>>, vector<1x8x128xf32>
    %92 = vector.shape_cast %91 : vector<1x8x128xf32> to vector<8x128xf32>
    %93 = vector.shape_cast %89 : vector<8x128xf32> to vector<1x8x128xf32>
    tpu.vector_store %arg8[%c0_35, %90, %c0_36], %93 {strides = array<i32>} : memref<1x64x128xf32, #tpu.memory_space<vmem>>, vector<1x8x128xf32>,
    %c3_i32 = arith.constant 3 : i32
    %c8_i32_37 = arith.constant 8 : i32
    %94 = arith.muli %c3_i32, %c8_i32_37 : i32
    %95 = tpu.assume_multiple %94, 8 : i32
    %96 = arith.index_cast %95 : i32 to index
    %c0_38 = arith.constant 0 : index
    %97 = vector.load %arg11[%96, %c0_38] : memref<64x512xf32, #tpu.memory_space<vmem>>, vector<8x512xf32>
    %c0_39 = arith.constant 0 : index
    %c0_40 = arith.constant 0 : index
    %98 = vector.load %arg6[%c0_39, %c0_40] : memref<128x512xf32, #tpu.memory_space<vmem>>, vector<128x512xf32>
    %cst_41 = arith.constant dense<0.000000e+00> : vector<8x512xf32>
    %99 = tpu.matmul %89, %98, %cst_41 {dimension_numbers = #tpu.dot_dimension_numbers<[1], [0], [0], [1], [0, 0, 1, 1], [], []>} : vector<8x128xf32>, vector<128x512xf32>, vector<8x512xf32> -> vector<8x512xf32>
    %100 = arith.addf %97, %99 : vector<8x512xf32>
    %101 = vector.extract_strided_slice %100 {offsets = [0, 0], sizes = [8, 384], strides = [1, 1]} : vector<8x512xf32> to vector<8x384xf32>
    %102 = arith.negf %101 : vector<8x384xf32>
    %103 = math.exp %102 : vector<8x384xf32>
    %cst_42 = arith.constant 1.000000e+00 : f32
    %104 = vector.broadcast %cst_42 : f32 to vector<8x384xf32>
    %105 = arith.addf %104, %103 : vector<8x384xf32>
    %106 = arith.divf %104, %105 : vector<8x384xf32>
    %107 = vector.extract_strided_slice %100 {offsets = [0, 384], sizes = [8, 128], strides = [1, 1]} : vector<8x512xf32> to vector<8x128xf32>
    %108 = math.tanh %107 : vector<8x128xf32>
    %109 = vector.extract_strided_slice %106 {offsets = [0, 128], sizes = [8, 128], strides = [1, 1]} : vector<8x384xf32> to vector<8x128xf32>
    %110 = arith.mulf %109, %86 : vector<8x128xf32>
    %111 = vector.extract_strided_slice %106 {offsets = [0, 0], sizes = [8, 128], strides = [1, 1]} : vector<8x384xf32> to vector<8x128xf32>
    %112 = arith.mulf %111, %108 : vector<8x128xf32>
    %113 = arith.addf %110, %112 : vector<8x128xf32>
    %114 = vector.extract_strided_slice %106 {offsets = [0, 256], sizes = [8, 128], strides = [1, 1]} : vector<8x384xf32> to vector<8x128xf32>
    %115 = math.tanh %113 : vector<8x128xf32>
    %116 = arith.mulf %114, %115 : vector<8x128xf32>
    %c0_43 = arith.constant 0 : index
    %117 = arith.index_cast %95 : i32 to index
    %c0_44 = arith.constant 0 : index
    %118 = vector.load %arg8[%c0_43, %117, %c0_44] : memref<1x64x128xf32, #tpu.memory_space<vmem>>, vector<1x8x128xf32>
    %119 = vector.shape_cast %118 : vector<1x8x128xf32> to vector<8x128xf32>
    %120 = vector.shape_cast %116 : vector<8x128xf32> to vector<1x8x128xf32>
    tpu.vector_store %arg8[%c0_43, %117, %c0_44], %120 {strides = array<i32>} : memref<1x64x128xf32, #tpu.memory_space<vmem>>, vector<1x8x128xf32>,
    %c4_i32 = arith.constant 4 : i32
    %c8_i32_45 = arith.constant 8 : i32
    %121 = arith.muli %c4_i32, %c8_i32_45 : i32
    %122 = tpu.assume_multiple %121, 8 : i32
    %123 = arith.index_cast %122 : i32 to index
    %c0_46 = arith.constant 0 : index
    %124 = vector.load %arg11[%123, %c0_46] : memref<64x512xf32, #tpu.memory_space<vmem>>, vector<8x512xf32>
    %c0_47 = arith.constant 0 : index
    %c0_48 = arith.constant 0 : index
    %125 = vector.load %arg6[%c0_47, %c0_48] : memref<128x512xf32, #tpu.memory_space<vmem>>, vector<128x512xf32>
    %cst_49 = arith.constant dense<0.000000e+00> : vector<8x512xf32>
    %126 = tpu.matmul %116, %125, %cst_49 {dimension_numbers = #tpu.dot_dimension_numbers<[1], [0], [0], [1], [0, 0, 1, 1], [], []>} : vector<8x128xf32>, vector<128x512xf32>, vector<8x512xf32> -> vector<8x512xf32>
    %127 = arith.addf %124, %126 : vector<8x512xf32>
    %128 = vector.extract_strided_slice %127 {offsets = [0, 0], sizes = [8, 384], strides = [1, 1]} : vector<8x512xf32> to vector<8x384xf32>
    %129 = arith.negf %128 : vector<8x384xf32>
    %130 = math.exp %129 : vector<8x384xf32>
    %cst_50 = arith.constant 1.000000e+00 : f32
    %131 = vector.broadcast %cst_50 : f32 to vector<8x384xf32>
    %132 = arith.addf %131, %130 : vector<8x384xf32>
    %133 = arith.divf %131, %132 : vector<8x384xf32>
    %134 = vector.extract_strided_slice %127 {offsets = [0, 384], sizes = [8, 128], strides = [1, 1]} : vector<8x512xf32> to vector<8x128xf32>
    %135 = math.tanh %134 : vector<8x128xf32>
    %136 = vector.extract_strided_slice %133 {offsets = [0, 128], sizes = [8, 128], strides = [1, 1]} : vector<8x384xf32> to vector<8x128xf32>
    %137 = arith.mulf %136, %113 : vector<8x128xf32>
    %138 = vector.extract_strided_slice %133 {offsets = [0, 0], sizes = [8, 128], strides = [1, 1]} : vector<8x384xf32> to vector<8x128xf32>
    %139 = arith.mulf %138, %135 : vector<8x128xf32>
    %140 = arith.addf %137, %139 : vector<8x128xf32>
    %141 = vector.extract_strided_slice %133 {offsets = [0, 256], sizes = [8, 128], strides = [1, 1]} : vector<8x384xf32> to vector<8x128xf32>
    %142 = math.tanh %140 : vector<8x128xf32>
    %143 = arith.mulf %141, %142 : vector<8x128xf32>
    %c0_51 = arith.constant 0 : index
    %144 = arith.index_cast %122 : i32 to index
    %c0_52 = arith.constant 0 : index
    %145 = vector.load %arg8[%c0_51, %144, %c0_52] : memref<1x64x128xf32, #tpu.memory_space<vmem>>, vector<1x8x128xf32>
    %146 = vector.shape_cast %145 : vector<1x8x128xf32> to vector<8x128xf32>
    %147 = vector.shape_cast %143 : vector<8x128xf32> to vector<1x8x128xf32>
    tpu.vector_store %arg8[%c0_51, %144, %c0_52], %147 {strides = array<i32>} : memref<1x64x128xf32, #tpu.memory_space<vmem>>, vector<1x8x128xf32>,
    %c5_i32 = arith.constant 5 : i32
    %c8_i32_53 = arith.constant 8 : i32
    %148 = arith.muli %c5_i32, %c8_i32_53 : i32
    %149 = tpu.assume_multiple %148, 8 : i32
    %150 = arith.index_cast %149 : i32 to index
    %c0_54 = arith.constant 0 : index
    %151 = vector.load %arg11[%150, %c0_54] : memref<64x512xf32, #tpu.memory_space<vmem>>, vector<8x512xf32>
    %c0_55 = arith.constant 0 : index
    %c0_56 = arith.constant 0 : index
    %152 = vector.load %arg6[%c0_55, %c0_56] : memref<128x512xf32, #tpu.memory_space<vmem>>, vector<128x512xf32>
    %cst_57 = arith.constant dense<0.000000e+00> : vector<8x512xf32>
    %153 = tpu.matmul %143, %152, %cst_57 {dimension_numbers = #tpu.dot_dimension_numbers<[1], [0], [0], [1], [0, 0, 1, 1], [], []>} : vector<8x128xf32>, vector<128x512xf32>, vector<8x512xf32> -> vector<8x512xf32>
    %154 = arith.addf %151, %153 : vector<8x512xf32>
    %155 = vector.extract_strided_slice %154 {offsets = [0, 0], sizes = [8, 384], strides = [1, 1]} : vector<8x512xf32> to vector<8x384xf32>
    %156 = arith.negf %155 : vector<8x384xf32>
    %157 = math.exp %156 : vector<8x384xf32>
    %cst_58 = arith.constant 1.000000e+00 : f32
    %158 = vector.broadcast %cst_58 : f32 to vector<8x384xf32>
    %159 = arith.addf %158, %157 : vector<8x384xf32>
    %160 = arith.divf %158, %159 : vector<8x384xf32>
    %161 = vector.extract_strided_slice %154 {offsets = [0, 384], sizes = [8, 128], strides = [1, 1]} : vector<8x512xf32> to vector<8x128xf32>
    %162 = math.tanh %161 : vector<8x128xf32>
    %163 = vector.extract_strided_slice %160 {offsets = [0, 128], sizes = [8, 128], strides = [1, 1]} : vector<8x384xf32> to vector<8x128xf32>
    %164 = arith.mulf %163, %140 : vector<8x128xf32>
    %165 = vector.extract_strided_slice %160 {offsets = [0, 0], sizes = [8, 128], strides = [1, 1]} : vector<8x384xf32> to vector<8x128xf32>
    %166 = arith.mulf %165, %162 : vector<8x128xf32>
    %167 = arith.addf %164, %166 : vector<8x128xf32>
    %168 = vector.extract_strided_slice %160 {offsets = [0, 256], sizes = [8, 128], strides = [1, 1]} : vector<8x384xf32> to vector<8x128xf32>
    %169 = math.tanh %167 : vector<8x128xf32>
    %170 = arith.mulf %168, %169 : vector<8x128xf32>
    %c0_59 = arith.constant 0 : index
    %171 = arith.index_cast %149 : i32 to index
    %c0_60 = arith.constant 0 : index
    %172 = vector.load %arg8[%c0_59, %171, %c0_60] : memref<1x64x128xf32, #tpu.memory_space<vmem>>, vector<1x8x128xf32>
    %173 = vector.shape_cast %172 : vector<1x8x128xf32> to vector<8x128xf32>
    %174 = vector.shape_cast %170 : vector<8x128xf32> to vector<1x8x128xf32>
    tpu.vector_store %arg8[%c0_59, %171, %c0_60], %174 {strides = array<i32>} : memref<1x64x128xf32, #tpu.memory_space<vmem>>, vector<1x8x128xf32>,
    %c6_i32 = arith.constant 6 : i32
    %c8_i32_61 = arith.constant 8 : i32
    %175 = arith.muli %c6_i32, %c8_i32_61 : i32
    %176 = tpu.assume_multiple %175, 8 : i32
    %177 = arith.index_cast %176 : i32 to index
    %c0_62 = arith.constant 0 : index
    %178 = vector.load %arg11[%177, %c0_62] : memref<64x512xf32, #tpu.memory_space<vmem>>, vector<8x512xf32>
    %c0_63 = arith.constant 0 : index
    %c0_64 = arith.constant 0 : index
    %179 = vector.load %arg6[%c0_63, %c0_64] : memref<128x512xf32, #tpu.memory_space<vmem>>, vector<128x512xf32>
    %cst_65 = arith.constant dense<0.000000e+00> : vector<8x512xf32>
    %180 = tpu.matmul %170, %179, %cst_65 {dimension_numbers = #tpu.dot_dimension_numbers<[1], [0], [0], [1], [0, 0, 1, 1], [], []>} : vector<8x128xf32>, vector<128x512xf32>, vector<8x512xf32> -> vector<8x512xf32>
    %181 = arith.addf %178, %180 : vector<8x512xf32>
    %182 = vector.extract_strided_slice %181 {offsets = [0, 0], sizes = [8, 384], strides = [1, 1]} : vector<8x512xf32> to vector<8x384xf32>
    %183 = arith.negf %182 : vector<8x384xf32>
    %184 = math.exp %183 : vector<8x384xf32>
    %cst_66 = arith.constant 1.000000e+00 : f32
    %185 = vector.broadcast %cst_66 : f32 to vector<8x384xf32>
    %186 = arith.addf %185, %184 : vector<8x384xf32>
    %187 = arith.divf %185, %186 : vector<8x384xf32>
    %188 = vector.extract_strided_slice %181 {offsets = [0, 384], sizes = [8, 128], strides = [1, 1]} : vector<8x512xf32> to vector<8x128xf32>
    %189 = math.tanh %188 : vector<8x128xf32>
    %190 = vector.extract_strided_slice %187 {offsets = [0, 128], sizes = [8, 128], strides = [1, 1]} : vector<8x384xf32> to vector<8x128xf32>
    %191 = arith.mulf %190, %167 : vector<8x128xf32>
    %192 = vector.extract_strided_slice %187 {offsets = [0, 0], sizes = [8, 128], strides = [1, 1]} : vector<8x384xf32> to vector<8x128xf32>
    %193 = arith.mulf %192, %189 : vector<8x128xf32>
    %194 = arith.addf %191, %193 : vector<8x128xf32>
    %195 = vector.extract_strided_slice %187 {offsets = [0, 256], sizes = [8, 128], strides = [1, 1]} : vector<8x384xf32> to vector<8x128xf32>
    %196 = math.tanh %194 : vector<8x128xf32>
    %197 = arith.mulf %195, %196 : vector<8x128xf32>
    %c0_67 = arith.constant 0 : index
    %198 = arith.index_cast %176 : i32 to index
    %c0_68 = arith.constant 0 : index
    %199 = vector.load %arg8[%c0_67, %198, %c0_68] : memref<1x64x128xf32, #tpu.memory_space<vmem>>, vector<1x8x128xf32>
    %200 = vector.shape_cast %199 : vector<1x8x128xf32> to vector<8x128xf32>
    %201 = vector.shape_cast %197 : vector<8x128xf32> to vector<1x8x128xf32>
    tpu.vector_store %arg8[%c0_67, %198, %c0_68], %201 {strides = array<i32>} : memref<1x64x128xf32, #tpu.memory_space<vmem>>, vector<1x8x128xf32>,
    %c7_i32 = arith.constant 7 : i32
    %c8_i32_69 = arith.constant 8 : i32
    %202 = arith.muli %c7_i32, %c8_i32_69 : i32
    %203 = tpu.assume_multiple %202, 8 : i32
    %204 = arith.index_cast %203 : i32 to index
    %c0_70 = arith.constant 0 : index
    %205 = vector.load %arg11[%204, %c0_70] : memref<64x512xf32, #tpu.memory_space<vmem>>, vector<8x512xf32>
    %c0_71 = arith.constant 0 : index
    %c0_72 = arith.constant 0 : index
    %206 = vector.load %arg6[%c0_71, %c0_72] : memref<128x512xf32, #tpu.memory_space<vmem>>, vector<128x512xf32>
    %cst_73 = arith.constant dense<0.000000e+00> : vector<8x512xf32>
    %207 = tpu.matmul %197, %206, %cst_73 {dimension_numbers = #tpu.dot_dimension_numbers<[1], [0], [0], [1], [0, 0, 1, 1], [], []>} : vector<8x128xf32>, vector<128x512xf32>, vector<8x512xf32> -> vector<8x512xf32>
    %208 = arith.addf %205, %207 : vector<8x512xf32>
    %209 = vector.extract_strided_slice %208 {offsets = [0, 0], sizes = [8, 384], strides = [1, 1]} : vector<8x512xf32> to vector<8x384xf32>
    %210 = arith.negf %209 : vector<8x384xf32>
    %211 = math.exp %210 : vector<8x384xf32>
    %cst_74 = arith.constant 1.000000e+00 : f32
    %212 = vector.broadcast %cst_74 : f32 to vector<8x384xf32>
    %213 = arith.addf %212, %211 : vector<8x384xf32>
    %214 = arith.divf %212, %213 : vector<8x384xf32>
    %215 = vector.extract_strided_slice %208 {offsets = [0, 384], sizes = [8, 128], strides = [1, 1]} : vector<8x512xf32> to vector<8x128xf32>
    %216 = math.tanh %215 : vector<8x128xf32>
    %217 = vector.extract_strided_slice %214 {offsets = [0, 128], sizes = [8, 128], strides = [1, 1]} : vector<8x384xf32> to vector<8x128xf32>
    %218 = arith.mulf %217, %194 : vector<8x128xf32>
    %219 = vector.extract_strided_slice %214 {offsets = [0, 0], sizes = [8, 128], strides = [1, 1]} : vector<8x384xf32> to vector<8x128xf32>
    %220 = arith.mulf %219, %216 : vector<8x128xf32>
    %221 = arith.addf %218, %220 : vector<8x128xf32>
    %222 = vector.extract_strided_slice %214 {offsets = [0, 256], sizes = [8, 128], strides = [1, 1]} : vector<8x384xf32> to vector<8x128xf32>
    %223 = math.tanh %221 : vector<8x128xf32>
    %224 = arith.mulf %222, %223 : vector<8x128xf32>
    %c0_75 = arith.constant 0 : index
    %225 = arith.index_cast %203 : i32 to index
    %c0_76 = arith.constant 0 : index
    %226 = vector.load %arg8[%c0_75, %225, %c0_76] : memref<1x64x128xf32, #tpu.memory_space<vmem>>, vector<1x8x128xf32>
    %227 = vector.shape_cast %226 : vector<1x8x128xf32> to vector<8x128xf32>
    %228 = vector.shape_cast %224 : vector<8x128xf32> to vector<1x8x128xf32>
    tpu.vector_store %arg8[%c0_75, %225, %c0_76], %228 {strides = array<i32>} : memref<1x64x128xf32, #tpu.memory_space<vmem>>, vector<1x8x128xf32>,
    %c8_i32_77 = arith.constant 8 : i32
    %c0_78 = arith.constant 0 : index
    %c0_79 = arith.constant 0 : index
    %229 = vector.load %arg9[%c0_78, %c0_79] : memref<8x128xf32, #tpu.memory_space<vmem>>, vector<8x128xf32>
    tpu.vector_store %arg9[%c0_78, %c0_79], %224 {strides = array<i32>} : memref<8x128xf32, #tpu.memory_space<vmem>>, vector<8x128xf32>,
    %c0_80 = arith.constant 0 : index
    %c0_81 = arith.constant 0 : index
    %230 = vector.load %arg10[%c0_80, %c0_81] : memref<8x128xf32, #tpu.memory_space<vmem>>, vector<8x128xf32>
    tpu.vector_store %arg10[%c0_80, %c0_81], %221 {strides = array<i32>} : memref<8x128xf32, #tpu.memory_space<vmem>>, vector<8x128xf32>,
    return
  }
  func.func @transform_0(%arg0: i32, %arg1: i32) -> (i32, i32, i32) {
    %c0_i32 = arith.constant 0 : i32
    %c0_i32_0 = arith.constant 0 : i32
    return %arg0, %arg1, %c0_i32 : i32, i32, i32
  }
  func.func @transform_1(%arg0: i32, %arg1: i32) -> (i32, i32) {
    %c0_i32 = arith.constant 0 : i32
    %c0_i32_0 = arith.constant 0 : i32
    return %arg0, %c0_i32 : i32, i32
  }
  func.func @transform_2(%arg0: i32, %arg1: i32) -> (i32, i32) {
    %c0_i32 = arith.constant 0 : i32
    %c0_i32_0 = arith.constant 0 : i32
    return %arg0, %c0_i32 : i32, i32
  }
  func.func @transform_3(%arg0: i32, %arg1: i32) -> (i32, i32) {
    %c0_i32 = arith.constant 0 : i32
    %c0_i32_0 = arith.constant 0 : i32
    %c0_i32_1 = arith.constant 0 : i32
    return %c0_i32, %c0_i32_0 : i32, i32
  }
  func.func @transform_4(%arg0: i32, %arg1: i32) -> (i32, i32) {
    %c0_i32 = arith.constant 0 : i32
    %c0_i32_0 = arith.constant 0 : i32
    %c0_i32_1 = arith.constant 0 : i32
    return %c0_i32, %c0_i32_0 : i32, i32
  }
  func.func @transform_5(%arg0: i32, %arg1: i32) -> (i32, i32) {
    %c0_i32 = arith.constant 0 : i32
    %c0_i32_0 = arith.constant 0 : i32
    %c0_i32_1 = arith.constant 0 : i32
    return %c0_i32, %c0_i32_0 : i32, i32
  }
  func.func @transform_6(%arg0: i32, %arg1: i32) -> (i32, i32, i32) {
    %c0_i32 = arith.constant 0 : i32
    %c0_i32_0 = arith.constant 0 : i32
    return %arg0, %arg1, %c0_i32 : i32, i32, i32
  }
  func.func @transform_7(%arg0: i32, %arg1: i32) -> (i32, i32) {
    %c0_i32 = arith.constant 0 : i32
    %c0_i32_0 = arith.constant 0 : i32
    return %arg0, %c0_i32 : i32, i32
  }
  func.func @transform_8(%arg0: i32, %arg1: i32) -> (i32, i32) {
    %c0_i32 = arith.constant 0 : i32
    %c0_i32_0 = arith.constant 0 : i32
    return %arg0, %c0_i32 : i32, i32
  }
}

module attributes {stable_mosaic.version = 11 : i64} {
  func.func @_lstm_block_head_kernel(%arg0: i32, %arg1: i32, %arg2: memref<1x64x128xf32, #tpu.memory_space<vmem>>, %arg3: memref<8x128xf32, #tpu.memory_space<vmem>>, %arg4: memref<8x128xf32, #tpu.memory_space<vmem>>, %arg5: memref<128x512xf32, #tpu.memory_space<vmem>>, %arg6: memref<128x512xf32, #tpu.memory_space<vmem>>, %arg7: memref<1x512xf32, #tpu.memory_space<vmem>>, %arg8: memref<128x128xf32, #tpu.memory_space<vmem>>, %arg9: memref<1x128xf32, #tpu.memory_space<vmem>>, %arg10: memref<1x64x128xf32, #tpu.memory_space<vmem>>, %arg11: memref<8x128xf32, #tpu.memory_space<vmem>>, %arg12: memref<8x128xf32, #tpu.memory_space<vmem>>, %arg13: memref<1x64x128xf32, #tpu.memory_space<vmem>>, %arg14: memref<64x512xf32, #tpu.memory_space<vmem>>) attributes {dimension_semantics = [#tpu.dimension_semantics<parallel>, #tpu.dimension_semantics<arbitrary>], iteration_bounds = array<i64: 1, 1>, scalar_prefetch = 0 : i64, scratch_operands = 1 : i64, tpu.core_type = #tpu.core_type<tc>, window_params = [{transform_indices = @transform_0, window_bounds = array<i64: 1, 64, 128>}, {transform_indices = @transform_1, window_bounds = array<i64: 8, 128>}, {transform_indices = @transform_2, window_bounds = array<i64: 8, 128>}, {pipeline_mode = #tpu.pipeline_mode<synchronous>, transform_indices = @transform_3, window_bounds = array<i64: 128, 512>}, {pipeline_mode = #tpu.pipeline_mode<synchronous>, transform_indices = @transform_4, window_bounds = array<i64: 128, 512>}, {pipeline_mode = #tpu.pipeline_mode<synchronous>, transform_indices = @transform_5, window_bounds = array<i64: 1, 512>}, {pipeline_mode = #tpu.pipeline_mode<synchronous>, transform_indices = @transform_6, window_bounds = array<i64: 128, 128>}, {pipeline_mode = #tpu.pipeline_mode<synchronous>, transform_indices = @transform_7, window_bounds = array<i64: 1, 128>}, {transform_indices = @transform_8, window_bounds = array<i64: 1, 64, 128>}, {transform_indices = @transform_9, window_bounds = array<i64: 8, 128>}, {transform_indices = @transform_10, window_bounds = array<i64: 8, 128>}, {transform_indices = @transform_11, window_bounds = array<i64: 1, 64, 128>}]} {
    %c0_i32 = arith.constant 0 : i32
    %0 = arith.cmpi eq, %arg1, %c0_i32 : i32
    %1 = arith.extui %0 : i1 to i32
    %c0_i32_0 = arith.constant 0 : i32
    %2 = arith.cmpi ne, %1, %c0_i32_0 : i32
    scf.if %2 {
      %c0_93 = arith.constant 0 : index
      %c0_94 = arith.constant 0 : index
      %241 = vector.load %arg3[%c0_93, %c0_94] : memref<8x128xf32, #tpu.memory_space<vmem>>, vector<8x128xf32>
      %c0_95 = arith.constant 0 : index
      %c0_96 = arith.constant 0 : index
      %242 = vector.load %arg11[%c0_95, %c0_96] : memref<8x128xf32, #tpu.memory_space<vmem>>, vector<8x128xf32>
      tpu.vector_store %arg11[%c0_95, %c0_96], %241 {strides = array<i32>} : memref<8x128xf32, #tpu.memory_space<vmem>>, vector<8x128xf32>,
      %c0_97 = arith.constant 0 : index
      %c0_98 = arith.constant 0 : index
      %243 = vector.load %arg4[%c0_97, %c0_98] : memref<8x128xf32, #tpu.memory_space<vmem>>, vector<8x128xf32>
      %c0_99 = arith.constant 0 : index
      %c0_100 = arith.constant 0 : index
      %244 = vector.load %arg12[%c0_99, %c0_100] : memref<8x128xf32, #tpu.memory_space<vmem>>, vector<8x128xf32>
      tpu.vector_store %arg12[%c0_99, %c0_100], %243 {strides = array<i32>} : memref<8x128xf32, #tpu.memory_space<vmem>>, vector<8x128xf32>,
    } else {
    }
    %c0 = arith.constant 0 : index
    %c0_1 = arith.constant 0 : index
    %c0_2 = arith.constant 0 : index
    %3 = vector.load %arg2[%c0, %c0_1, %c0_2] : memref<1x64x128xf32, #tpu.memory_space<vmem>>, vector<1x64x128xf32>
    %4 = vector.shape_cast %3 : vector<1x64x128xf32> to vector<64x128xf32>
    %c0_3 = arith.constant 0 : index
    %c0_4 = arith.constant 0 : index
    %5 = vector.load %arg5[%c0_3, %c0_4] : memref<128x512xf32, #tpu.memory_space<vmem>>, vector<128x512xf32>
    %cst = arith.constant dense<0.000000e+00> : vector<64x512xf32>
    %6 = tpu.matmul %4, %5, %cst {dimension_numbers = #tpu.dot_dimension_numbers<[1], [0], [0], [1], [0, 0, 1, 1], [], []>} : vector<64x128xf32>, vector<128x512xf32>, vector<64x512xf32> -> vector<64x512xf32>
    %c0_5 = arith.constant 0 : index
    %c0_6 = arith.constant 0 : index
    %7 = vector.load %arg7[%c0_5, %c0_6] : memref<1x512xf32, #tpu.memory_space<vmem>>, vector<1x512xf32>
    %8 = vector.broadcast %7 : vector<1x512xf32> to vector<64x512xf32>
    %9 = arith.addf %6, %8 : vector<64x512xf32>
    %c0_7 = arith.constant 0 : index
    %c0_8 = arith.constant 0 : index
    %10 = vector.load %arg14[%c0_7, %c0_8] : memref<64x512xf32, #tpu.memory_space<vmem>>, vector<64x512xf32>
    tpu.vector_store %arg14[%c0_7, %c0_8], %9 {strides = array<i32>} : memref<64x512xf32, #tpu.memory_space<vmem>>, vector<64x512xf32>,
    %c0_9 = arith.constant 0 : index
    %c0_10 = arith.constant 0 : index
    %11 = vector.load %arg11[%c0_9, %c0_10] : memref<8x128xf32, #tpu.memory_space<vmem>>, vector<8x128xf32>
    %c0_11 = arith.constant 0 : index
    %c0_12 = arith.constant 0 : index
    %12 = vector.load %arg12[%c0_11, %c0_12] : memref<8x128xf32, #tpu.memory_space<vmem>>, vector<8x128xf32>
    %c0_i32_13 = arith.constant 0 : i32
    %c8_i32 = arith.constant 8 : i32
    %13 = arith.muli %c0_i32_13, %c8_i32 : i32
    %14 = tpu.assume_multiple %13, 8 : i32
    %15 = arith.index_cast %14 : i32 to index
    %c0_14 = arith.constant 0 : index
    %16 = vector.load %arg14[%15, %c0_14] : memref<64x512xf32, #tpu.memory_space<vmem>>, vector<8x512xf32>
    %c0_15 = arith.constant 0 : index
    %c0_16 = arith.constant 0 : index
    %17 = vector.load %arg6[%c0_15, %c0_16] : memref<128x512xf32, #tpu.memory_space<vmem>>, vector<128x512xf32>
    %cst_17 = arith.constant dense<0.000000e+00> : vector<8x512xf32>
    %18 = tpu.matmul %11, %17, %cst_17 {dimension_numbers = #tpu.dot_dimension_numbers<[1], [0], [0], [1], [0, 0, 1, 1], [], []>} : vector<8x128xf32>, vector<128x512xf32>, vector<8x512xf32> -> vector<8x512xf32>
    %19 = arith.addf %16, %18 : vector<8x512xf32>
    %20 = vector.extract_strided_slice %19 {offsets = [0, 0], sizes = [8, 384], strides = [1, 1]} : vector<8x512xf32> to vector<8x384xf32>
    %21 = arith.negf %20 : vector<8x384xf32>
    %22 = math.exp %21 : vector<8x384xf32>
    %cst_18 = arith.constant 1.000000e+00 : f32
    %23 = vector.broadcast %cst_18 : f32 to vector<8x384xf32>
    %24 = arith.addf %23, %22 : vector<8x384xf32>
    %25 = arith.divf %23, %24 : vector<8x384xf32>
    %26 = vector.extract_strided_slice %19 {offsets = [0, 384], sizes = [8, 128], strides = [1, 1]} : vector<8x512xf32> to vector<8x128xf32>
    %27 = math.tanh %26 : vector<8x128xf32>
    %28 = vector.extract_strided_slice %25 {offsets = [0, 128], sizes = [8, 128], strides = [1, 1]} : vector<8x384xf32> to vector<8x128xf32>
    %29 = arith.mulf %28, %12 : vector<8x128xf32>
    %30 = vector.extract_strided_slice %25 {offsets = [0, 0], sizes = [8, 128], strides = [1, 1]} : vector<8x384xf32> to vector<8x128xf32>
    %31 = arith.mulf %30, %27 : vector<8x128xf32>
    %32 = arith.addf %29, %31 : vector<8x128xf32>
    %33 = vector.extract_strided_slice %25 {offsets = [0, 256], sizes = [8, 128], strides = [1, 1]} : vector<8x384xf32> to vector<8x128xf32>
    %34 = math.tanh %32 : vector<8x128xf32>
    %35 = arith.mulf %33, %34 : vector<8x128xf32>
    %c0_19 = arith.constant 0 : index
    %36 = arith.index_cast %14 : i32 to index
    %c0_20 = arith.constant 0 : index
    %37 = vector.load %arg10[%c0_19, %36, %c0_20] : memref<1x64x128xf32, #tpu.memory_space<vmem>>, vector<1x8x128xf32>
    %38 = vector.shape_cast %37 : vector<1x8x128xf32> to vector<8x128xf32>
    %39 = vector.shape_cast %35 : vector<8x128xf32> to vector<1x8x128xf32>
    tpu.vector_store %arg10[%c0_19, %36, %c0_20], %39 {strides = array<i32>} : memref<1x64x128xf32, #tpu.memory_space<vmem>>, vector<1x8x128xf32>,
    %c1_i32 = arith.constant 1 : i32
    %c8_i32_21 = arith.constant 8 : i32
    %40 = arith.muli %c1_i32, %c8_i32_21 : i32
    %41 = tpu.assume_multiple %40, 8 : i32
    %42 = arith.index_cast %41 : i32 to index
    %c0_22 = arith.constant 0 : index
    %43 = vector.load %arg14[%42, %c0_22] : memref<64x512xf32, #tpu.memory_space<vmem>>, vector<8x512xf32>
    %c0_23 = arith.constant 0 : index
    %c0_24 = arith.constant 0 : index
    %44 = vector.load %arg6[%c0_23, %c0_24] : memref<128x512xf32, #tpu.memory_space<vmem>>, vector<128x512xf32>
    %cst_25 = arith.constant dense<0.000000e+00> : vector<8x512xf32>
    %45 = tpu.matmul %35, %44, %cst_25 {dimension_numbers = #tpu.dot_dimension_numbers<[1], [0], [0], [1], [0, 0, 1, 1], [], []>} : vector<8x128xf32>, vector<128x512xf32>, vector<8x512xf32> -> vector<8x512xf32>
    %46 = arith.addf %43, %45 : vector<8x512xf32>
    %47 = vector.extract_strided_slice %46 {offsets = [0, 0], sizes = [8, 384], strides = [1, 1]} : vector<8x512xf32> to vector<8x384xf32>
    %48 = arith.negf %47 : vector<8x384xf32>
    %49 = math.exp %48 : vector<8x384xf32>
    %cst_26 = arith.constant 1.000000e+00 : f32
    %50 = vector.broadcast %cst_26 : f32 to vector<8x384xf32>
    %51 = arith.addf %50, %49 : vector<8x384xf32>
    %52 = arith.divf %50, %51 : vector<8x384xf32>
    %53 = vector.extract_strided_slice %46 {offsets = [0, 384], sizes = [8, 128], strides = [1, 1]} : vector<8x512xf32> to vector<8x128xf32>
    %54 = math.tanh %53 : vector<8x128xf32>
    %55 = vector.extract_strided_slice %52 {offsets = [0, 128], sizes = [8, 128], strides = [1, 1]} : vector<8x384xf32> to vector<8x128xf32>
    %56 = arith.mulf %55, %32 : vector<8x128xf32>
    %57 = vector.extract_strided_slice %52 {offsets = [0, 0], sizes = [8, 128], strides = [1, 1]} : vector<8x384xf32> to vector<8x128xf32>
    %58 = arith.mulf %57, %54 : vector<8x128xf32>
    %59 = arith.addf %56, %58 : vector<8x128xf32>
    %60 = vector.extract_strided_slice %52 {offsets = [0, 256], sizes = [8, 128], strides = [1, 1]} : vector<8x384xf32> to vector<8x128xf32>
    %61 = math.tanh %59 : vector<8x128xf32>
    %62 = arith.mulf %60, %61 : vector<8x128xf32>
    %c0_27 = arith.constant 0 : index
    %63 = arith.index_cast %41 : i32 to index
    %c0_28 = arith.constant 0 : index
    %64 = vector.load %arg10[%c0_27, %63, %c0_28] : memref<1x64x128xf32, #tpu.memory_space<vmem>>, vector<1x8x128xf32>
    %65 = vector.shape_cast %64 : vector<1x8x128xf32> to vector<8x128xf32>
    %66 = vector.shape_cast %62 : vector<8x128xf32> to vector<1x8x128xf32>
    tpu.vector_store %arg10[%c0_27, %63, %c0_28], %66 {strides = array<i32>} : memref<1x64x128xf32, #tpu.memory_space<vmem>>, vector<1x8x128xf32>,
    %c2_i32 = arith.constant 2 : i32
    %c8_i32_29 = arith.constant 8 : i32
    %67 = arith.muli %c2_i32, %c8_i32_29 : i32
    %68 = tpu.assume_multiple %67, 8 : i32
    %69 = arith.index_cast %68 : i32 to index
    %c0_30 = arith.constant 0 : index
    %70 = vector.load %arg14[%69, %c0_30] : memref<64x512xf32, #tpu.memory_space<vmem>>, vector<8x512xf32>
    %c0_31 = arith.constant 0 : index
    %c0_32 = arith.constant 0 : index
    %71 = vector.load %arg6[%c0_31, %c0_32] : memref<128x512xf32, #tpu.memory_space<vmem>>, vector<128x512xf32>
    %cst_33 = arith.constant dense<0.000000e+00> : vector<8x512xf32>
    %72 = tpu.matmul %62, %71, %cst_33 {dimension_numbers = #tpu.dot_dimension_numbers<[1], [0], [0], [1], [0, 0, 1, 1], [], []>} : vector<8x128xf32>, vector<128x512xf32>, vector<8x512xf32> -> vector<8x512xf32>
    %73 = arith.addf %70, %72 : vector<8x512xf32>
    %74 = vector.extract_strided_slice %73 {offsets = [0, 0], sizes = [8, 384], strides = [1, 1]} : vector<8x512xf32> to vector<8x384xf32>
    %75 = arith.negf %74 : vector<8x384xf32>
    %76 = math.exp %75 : vector<8x384xf32>
    %cst_34 = arith.constant 1.000000e+00 : f32
    %77 = vector.broadcast %cst_34 : f32 to vector<8x384xf32>
    %78 = arith.addf %77, %76 : vector<8x384xf32>
    %79 = arith.divf %77, %78 : vector<8x384xf32>
    %80 = vector.extract_strided_slice %73 {offsets = [0, 384], sizes = [8, 128], strides = [1, 1]} : vector<8x512xf32> to vector<8x128xf32>
    %81 = math.tanh %80 : vector<8x128xf32>
    %82 = vector.extract_strided_slice %79 {offsets = [0, 128], sizes = [8, 128], strides = [1, 1]} : vector<8x384xf32> to vector<8x128xf32>
    %83 = arith.mulf %82, %59 : vector<8x128xf32>
    %84 = vector.extract_strided_slice %79 {offsets = [0, 0], sizes = [8, 128], strides = [1, 1]} : vector<8x384xf32> to vector<8x128xf32>
    %85 = arith.mulf %84, %81 : vector<8x128xf32>
    %86 = arith.addf %83, %85 : vector<8x128xf32>
    %87 = vector.extract_strided_slice %79 {offsets = [0, 256], sizes = [8, 128], strides = [1, 1]} : vector<8x384xf32> to vector<8x128xf32>
    %88 = math.tanh %86 : vector<8x128xf32>
    %89 = arith.mulf %87, %88 : vector<8x128xf32>
    %c0_35 = arith.constant 0 : index
    %90 = arith.index_cast %68 : i32 to index
    %c0_36 = arith.constant 0 : index
    %91 = vector.load %arg10[%c0_35, %90, %c0_36] : memref<1x64x128xf32, #tpu.memory_space<vmem>>, vector<1x8x128xf32>
    %92 = vector.shape_cast %91 : vector<1x8x128xf32> to vector<8x128xf32>
    %93 = vector.shape_cast %89 : vector<8x128xf32> to vector<1x8x128xf32>
    tpu.vector_store %arg10[%c0_35, %90, %c0_36], %93 {strides = array<i32>} : memref<1x64x128xf32, #tpu.memory_space<vmem>>, vector<1x8x128xf32>,
    %c3_i32 = arith.constant 3 : i32
    %c8_i32_37 = arith.constant 8 : i32
    %94 = arith.muli %c3_i32, %c8_i32_37 : i32
    %95 = tpu.assume_multiple %94, 8 : i32
    %96 = arith.index_cast %95 : i32 to index
    %c0_38 = arith.constant 0 : index
    %97 = vector.load %arg14[%96, %c0_38] : memref<64x512xf32, #tpu.memory_space<vmem>>, vector<8x512xf32>
    %c0_39 = arith.constant 0 : index
    %c0_40 = arith.constant 0 : index
    %98 = vector.load %arg6[%c0_39, %c0_40] : memref<128x512xf32, #tpu.memory_space<vmem>>, vector<128x512xf32>
    %cst_41 = arith.constant dense<0.000000e+00> : vector<8x512xf32>
    %99 = tpu.matmul %89, %98, %cst_41 {dimension_numbers = #tpu.dot_dimension_numbers<[1], [0], [0], [1], [0, 0, 1, 1], [], []>} : vector<8x128xf32>, vector<128x512xf32>, vector<8x512xf32> -> vector<8x512xf32>
    %100 = arith.addf %97, %99 : vector<8x512xf32>
    %101 = vector.extract_strided_slice %100 {offsets = [0, 0], sizes = [8, 384], strides = [1, 1]} : vector<8x512xf32> to vector<8x384xf32>
    %102 = arith.negf %101 : vector<8x384xf32>
    %103 = math.exp %102 : vector<8x384xf32>
    %cst_42 = arith.constant 1.000000e+00 : f32
    %104 = vector.broadcast %cst_42 : f32 to vector<8x384xf32>
    %105 = arith.addf %104, %103 : vector<8x384xf32>
    %106 = arith.divf %104, %105 : vector<8x384xf32>
    %107 = vector.extract_strided_slice %100 {offsets = [0, 384], sizes = [8, 128], strides = [1, 1]} : vector<8x512xf32> to vector<8x128xf32>
    %108 = math.tanh %107 : vector<8x128xf32>
    %109 = vector.extract_strided_slice %106 {offsets = [0, 128], sizes = [8, 128], strides = [1, 1]} : vector<8x384xf32> to vector<8x128xf32>
    %110 = arith.mulf %109, %86 : vector<8x128xf32>
    %111 = vector.extract_strided_slice %106 {offsets = [0, 0], sizes = [8, 128], strides = [1, 1]} : vector<8x384xf32> to vector<8x128xf32>
    %112 = arith.mulf %111, %108 : vector<8x128xf32>
    %113 = arith.addf %110, %112 : vector<8x128xf32>
    %114 = vector.extract_strided_slice %106 {offsets = [0, 256], sizes = [8, 128], strides = [1, 1]} : vector<8x384xf32> to vector<8x128xf32>
    %115 = math.tanh %113 : vector<8x128xf32>
    %116 = arith.mulf %114, %115 : vector<8x128xf32>
    %c0_43 = arith.constant 0 : index
    %117 = arith.index_cast %95 : i32 to index
    %c0_44 = arith.constant 0 : index
    %118 = vector.load %arg10[%c0_43, %117, %c0_44] : memref<1x64x128xf32, #tpu.memory_space<vmem>>, vector<1x8x128xf32>
    %119 = vector.shape_cast %118 : vector<1x8x128xf32> to vector<8x128xf32>
    %120 = vector.shape_cast %116 : vector<8x128xf32> to vector<1x8x128xf32>
    tpu.vector_store %arg10[%c0_43, %117, %c0_44], %120 {strides = array<i32>} : memref<1x64x128xf32, #tpu.memory_space<vmem>>, vector<1x8x128xf32>,
    %c4_i32 = arith.constant 4 : i32
    %c8_i32_45 = arith.constant 8 : i32
    %121 = arith.muli %c4_i32, %c8_i32_45 : i32
    %122 = tpu.assume_multiple %121, 8 : i32
    %123 = arith.index_cast %122 : i32 to index
    %c0_46 = arith.constant 0 : index
    %124 = vector.load %arg14[%123, %c0_46] : memref<64x512xf32, #tpu.memory_space<vmem>>, vector<8x512xf32>
    %c0_47 = arith.constant 0 : index
    %c0_48 = arith.constant 0 : index
    %125 = vector.load %arg6[%c0_47, %c0_48] : memref<128x512xf32, #tpu.memory_space<vmem>>, vector<128x512xf32>
    %cst_49 = arith.constant dense<0.000000e+00> : vector<8x512xf32>
    %126 = tpu.matmul %116, %125, %cst_49 {dimension_numbers = #tpu.dot_dimension_numbers<[1], [0], [0], [1], [0, 0, 1, 1], [], []>} : vector<8x128xf32>, vector<128x512xf32>, vector<8x512xf32> -> vector<8x512xf32>
    %127 = arith.addf %124, %126 : vector<8x512xf32>
    %128 = vector.extract_strided_slice %127 {offsets = [0, 0], sizes = [8, 384], strides = [1, 1]} : vector<8x512xf32> to vector<8x384xf32>
    %129 = arith.negf %128 : vector<8x384xf32>
    %130 = math.exp %129 : vector<8x384xf32>
    %cst_50 = arith.constant 1.000000e+00 : f32
    %131 = vector.broadcast %cst_50 : f32 to vector<8x384xf32>
    %132 = arith.addf %131, %130 : vector<8x384xf32>
    %133 = arith.divf %131, %132 : vector<8x384xf32>
    %134 = vector.extract_strided_slice %127 {offsets = [0, 384], sizes = [8, 128], strides = [1, 1]} : vector<8x512xf32> to vector<8x128xf32>
    %135 = math.tanh %134 : vector<8x128xf32>
    %136 = vector.extract_strided_slice %133 {offsets = [0, 128], sizes = [8, 128], strides = [1, 1]} : vector<8x384xf32> to vector<8x128xf32>
    %137 = arith.mulf %136, %113 : vector<8x128xf32>
    %138 = vector.extract_strided_slice %133 {offsets = [0, 0], sizes = [8, 128], strides = [1, 1]} : vector<8x384xf32> to vector<8x128xf32>
    %139 = arith.mulf %138, %135 : vector<8x128xf32>
    %140 = arith.addf %137, %139 : vector<8x128xf32>
    %141 = vector.extract_strided_slice %133 {offsets = [0, 256], sizes = [8, 128], strides = [1, 1]} : vector<8x384xf32> to vector<8x128xf32>
    %142 = math.tanh %140 : vector<8x128xf32>
    %143 = arith.mulf %141, %142 : vector<8x128xf32>
    %c0_51 = arith.constant 0 : index
    %144 = arith.index_cast %122 : i32 to index
    %c0_52 = arith.constant 0 : index
    %145 = vector.load %arg10[%c0_51, %144, %c0_52] : memref<1x64x128xf32, #tpu.memory_space<vmem>>, vector<1x8x128xf32>
    %146 = vector.shape_cast %145 : vector<1x8x128xf32> to vector<8x128xf32>
    %147 = vector.shape_cast %143 : vector<8x128xf32> to vector<1x8x128xf32>
    tpu.vector_store %arg10[%c0_51, %144, %c0_52], %147 {strides = array<i32>} : memref<1x64x128xf32, #tpu.memory_space<vmem>>, vector<1x8x128xf32>,
    %c5_i32 = arith.constant 5 : i32
    %c8_i32_53 = arith.constant 8 : i32
    %148 = arith.muli %c5_i32, %c8_i32_53 : i32
    %149 = tpu.assume_multiple %148, 8 : i32
    %150 = arith.index_cast %149 : i32 to index
    %c0_54 = arith.constant 0 : index
    %151 = vector.load %arg14[%150, %c0_54] : memref<64x512xf32, #tpu.memory_space<vmem>>, vector<8x512xf32>
    %c0_55 = arith.constant 0 : index
    %c0_56 = arith.constant 0 : index
    %152 = vector.load %arg6[%c0_55, %c0_56] : memref<128x512xf32, #tpu.memory_space<vmem>>, vector<128x512xf32>
    %cst_57 = arith.constant dense<0.000000e+00> : vector<8x512xf32>
    %153 = tpu.matmul %143, %152, %cst_57 {dimension_numbers = #tpu.dot_dimension_numbers<[1], [0], [0], [1], [0, 0, 1, 1], [], []>} : vector<8x128xf32>, vector<128x512xf32>, vector<8x512xf32> -> vector<8x512xf32>
    %154 = arith.addf %151, %153 : vector<8x512xf32>
    %155 = vector.extract_strided_slice %154 {offsets = [0, 0], sizes = [8, 384], strides = [1, 1]} : vector<8x512xf32> to vector<8x384xf32>
    %156 = arith.negf %155 : vector<8x384xf32>
    %157 = math.exp %156 : vector<8x384xf32>
    %cst_58 = arith.constant 1.000000e+00 : f32
    %158 = vector.broadcast %cst_58 : f32 to vector<8x384xf32>
    %159 = arith.addf %158, %157 : vector<8x384xf32>
    %160 = arith.divf %158, %159 : vector<8x384xf32>
    %161 = vector.extract_strided_slice %154 {offsets = [0, 384], sizes = [8, 128], strides = [1, 1]} : vector<8x512xf32> to vector<8x128xf32>
    %162 = math.tanh %161 : vector<8x128xf32>
    %163 = vector.extract_strided_slice %160 {offsets = [0, 128], sizes = [8, 128], strides = [1, 1]} : vector<8x384xf32> to vector<8x128xf32>
    %164 = arith.mulf %163, %140 : vector<8x128xf32>
    %165 = vector.extract_strided_slice %160 {offsets = [0, 0], sizes = [8, 128], strides = [1, 1]} : vector<8x384xf32> to vector<8x128xf32>
    %166 = arith.mulf %165, %162 : vector<8x128xf32>
    %167 = arith.addf %164, %166 : vector<8x128xf32>
    %168 = vector.extract_strided_slice %160 {offsets = [0, 256], sizes = [8, 128], strides = [1, 1]} : vector<8x384xf32> to vector<8x128xf32>
    %169 = math.tanh %167 : vector<8x128xf32>
    %170 = arith.mulf %168, %169 : vector<8x128xf32>
    %c0_59 = arith.constant 0 : index
    %171 = arith.index_cast %149 : i32 to index
    %c0_60 = arith.constant 0 : index
    %172 = vector.load %arg10[%c0_59, %171, %c0_60] : memref<1x64x128xf32, #tpu.memory_space<vmem>>, vector<1x8x128xf32>
    %173 = vector.shape_cast %172 : vector<1x8x128xf32> to vector<8x128xf32>
    %174 = vector.shape_cast %170 : vector<8x128xf32> to vector<1x8x128xf32>
    tpu.vector_store %arg10[%c0_59, %171, %c0_60], %174 {strides = array<i32>} : memref<1x64x128xf32, #tpu.memory_space<vmem>>, vector<1x8x128xf32>,
    %c6_i32 = arith.constant 6 : i32
    %c8_i32_61 = arith.constant 8 : i32
    %175 = arith.muli %c6_i32, %c8_i32_61 : i32
    %176 = tpu.assume_multiple %175, 8 : i32
    %177 = arith.index_cast %176 : i32 to index
    %c0_62 = arith.constant 0 : index
    %178 = vector.load %arg14[%177, %c0_62] : memref<64x512xf32, #tpu.memory_space<vmem>>, vector<8x512xf32>
    %c0_63 = arith.constant 0 : index
    %c0_64 = arith.constant 0 : index
    %179 = vector.load %arg6[%c0_63, %c0_64] : memref<128x512xf32, #tpu.memory_space<vmem>>, vector<128x512xf32>
    %cst_65 = arith.constant dense<0.000000e+00> : vector<8x512xf32>
    %180 = tpu.matmul %170, %179, %cst_65 {dimension_numbers = #tpu.dot_dimension_numbers<[1], [0], [0], [1], [0, 0, 1, 1], [], []>} : vector<8x128xf32>, vector<128x512xf32>, vector<8x512xf32> -> vector<8x512xf32>
    %181 = arith.addf %178, %180 : vector<8x512xf32>
    %182 = vector.extract_strided_slice %181 {offsets = [0, 0], sizes = [8, 384], strides = [1, 1]} : vector<8x512xf32> to vector<8x384xf32>
    %183 = arith.negf %182 : vector<8x384xf32>
    %184 = math.exp %183 : vector<8x384xf32>
    %cst_66 = arith.constant 1.000000e+00 : f32
    %185 = vector.broadcast %cst_66 : f32 to vector<8x384xf32>
    %186 = arith.addf %185, %184 : vector<8x384xf32>
    %187 = arith.divf %185, %186 : vector<8x384xf32>
    %188 = vector.extract_strided_slice %181 {offsets = [0, 384], sizes = [8, 128], strides = [1, 1]} : vector<8x512xf32> to vector<8x128xf32>
    %189 = math.tanh %188 : vector<8x128xf32>
    %190 = vector.extract_strided_slice %187 {offsets = [0, 128], sizes = [8, 128], strides = [1, 1]} : vector<8x384xf32> to vector<8x128xf32>
    %191 = arith.mulf %190, %167 : vector<8x128xf32>
    %192 = vector.extract_strided_slice %187 {offsets = [0, 0], sizes = [8, 128], strides = [1, 1]} : vector<8x384xf32> to vector<8x128xf32>
    %193 = arith.mulf %192, %189 : vector<8x128xf32>
    %194 = arith.addf %191, %193 : vector<8x128xf32>
    %195 = vector.extract_strided_slice %187 {offsets = [0, 256], sizes = [8, 128], strides = [1, 1]} : vector<8x384xf32> to vector<8x128xf32>
    %196 = math.tanh %194 : vector<8x128xf32>
    %197 = arith.mulf %195, %196 : vector<8x128xf32>
    %c0_67 = arith.constant 0 : index
    %198 = arith.index_cast %176 : i32 to index
    %c0_68 = arith.constant 0 : index
    %199 = vector.load %arg10[%c0_67, %198, %c0_68] : memref<1x64x128xf32, #tpu.memory_space<vmem>>, vector<1x8x128xf32>
    %200 = vector.shape_cast %199 : vector<1x8x128xf32> to vector<8x128xf32>
    %201 = vector.shape_cast %197 : vector<8x128xf32> to vector<1x8x128xf32>
    tpu.vector_store %arg10[%c0_67, %198, %c0_68], %201 {strides = array<i32>} : memref<1x64x128xf32, #tpu.memory_space<vmem>>, vector<1x8x128xf32>,
    %c7_i32 = arith.constant 7 : i32
    %c8_i32_69 = arith.constant 8 : i32
    %202 = arith.muli %c7_i32, %c8_i32_69 : i32
    %203 = tpu.assume_multiple %202, 8 : i32
    %204 = arith.index_cast %203 : i32 to index
    %c0_70 = arith.constant 0 : index
    %205 = vector.load %arg14[%204, %c0_70] : memref<64x512xf32, #tpu.memory_space<vmem>>, vector<8x512xf32>
    %c0_71 = arith.constant 0 : index
    %c0_72 = arith.constant 0 : index
    %206 = vector.load %arg6[%c0_71, %c0_72] : memref<128x512xf32, #tpu.memory_space<vmem>>, vector<128x512xf32>
    %cst_73 = arith.constant dense<0.000000e+00> : vector<8x512xf32>
    %207 = tpu.matmul %197, %206, %cst_73 {dimension_numbers = #tpu.dot_dimension_numbers<[1], [0], [0], [1], [0, 0, 1, 1], [], []>} : vector<8x128xf32>, vector<128x512xf32>, vector<8x512xf32> -> vector<8x512xf32>
    %208 = arith.addf %205, %207 : vector<8x512xf32>
    %209 = vector.extract_strided_slice %208 {offsets = [0, 0], sizes = [8, 384], strides = [1, 1]} : vector<8x512xf32> to vector<8x384xf32>
    %210 = arith.negf %209 : vector<8x384xf32>
    %211 = math.exp %210 : vector<8x384xf32>
    %cst_74 = arith.constant 1.000000e+00 : f32
    %212 = vector.broadcast %cst_74 : f32 to vector<8x384xf32>
    %213 = arith.addf %212, %211 : vector<8x384xf32>
    %214 = arith.divf %212, %213 : vector<8x384xf32>
    %215 = vector.extract_strided_slice %208 {offsets = [0, 384], sizes = [8, 128], strides = [1, 1]} : vector<8x512xf32> to vector<8x128xf32>
    %216 = math.tanh %215 : vector<8x128xf32>
    %217 = vector.extract_strided_slice %214 {offsets = [0, 128], sizes = [8, 128], strides = [1, 1]} : vector<8x384xf32> to vector<8x128xf32>
    %218 = arith.mulf %217, %194 : vector<8x128xf32>
    %219 = vector.extract_strided_slice %214 {offsets = [0, 0], sizes = [8, 128], strides = [1, 1]} : vector<8x384xf32> to vector<8x128xf32>
    %220 = arith.mulf %219, %216 : vector<8x128xf32>
    %221 = arith.addf %218, %220 : vector<8x128xf32>
    %222 = vector.extract_strided_slice %214 {offsets = [0, 256], sizes = [8, 128], strides = [1, 1]} : vector<8x384xf32> to vector<8x128xf32>
    %223 = math.tanh %221 : vector<8x128xf32>
    %224 = arith.mulf %222, %223 : vector<8x128xf32>
    %c0_75 = arith.constant 0 : index
    %225 = arith.index_cast %203 : i32 to index
    %c0_76 = arith.constant 0 : index
    %226 = vector.load %arg10[%c0_75, %225, %c0_76] : memref<1x64x128xf32, #tpu.memory_space<vmem>>, vector<1x8x128xf32>
    %227 = vector.shape_cast %226 : vector<1x8x128xf32> to vector<8x128xf32>
    %228 = vector.shape_cast %224 : vector<8x128xf32> to vector<1x8x128xf32>
    tpu.vector_store %arg10[%c0_75, %225, %c0_76], %228 {strides = array<i32>} : memref<1x64x128xf32, #tpu.memory_space<vmem>>, vector<1x8x128xf32>,
    %c8_i32_77 = arith.constant 8 : i32
    %c0_78 = arith.constant 0 : index
    %c0_79 = arith.constant 0 : index
    %229 = vector.load %arg11[%c0_78, %c0_79] : memref<8x128xf32, #tpu.memory_space<vmem>>, vector<8x128xf32>
    tpu.vector_store %arg11[%c0_78, %c0_79], %224 {strides = array<i32>} : memref<8x128xf32, #tpu.memory_space<vmem>>, vector<8x128xf32>,
    %c0_80 = arith.constant 0 : index
    %c0_81 = arith.constant 0 : index
    %230 = vector.load %arg12[%c0_80, %c0_81] : memref<8x128xf32, #tpu.memory_space<vmem>>, vector<8x128xf32>
    tpu.vector_store %arg12[%c0_80, %c0_81], %221 {strides = array<i32>} : memref<8x128xf32, #tpu.memory_space<vmem>>, vector<8x128xf32>,
    %c0_82 = arith.constant 0 : index
    %c0_83 = arith.constant 0 : index
    %c0_84 = arith.constant 0 : index
    %231 = vector.load %arg10[%c0_82, %c0_83, %c0_84] : memref<1x64x128xf32, #tpu.memory_space<vmem>>, vector<1x64x128xf32>
    %232 = vector.shape_cast %231 : vector<1x64x128xf32> to vector<64x128xf32>
    %c0_85 = arith.constant 0 : index
    %c0_86 = arith.constant 0 : index
    %233 = vector.load %arg8[%c0_85, %c0_86] : memref<128x128xf32, #tpu.memory_space<vmem>>, vector<128x128xf32>
    %cst_87 = arith.constant dense<0.000000e+00> : vector<64x128xf32>
    %234 = tpu.matmul %232, %233, %cst_87 {dimension_numbers = #tpu.dot_dimension_numbers<[1], [0], [0], [1], [0, 0, 1, 1], [], []>} : vector<64x128xf32>, vector<128x128xf32>, vector<64x128xf32> -> vector<64x128xf32>
    %c0_88 = arith.constant 0 : index
    %c0_89 = arith.constant 0 : index
    %235 = vector.load %arg9[%c0_88, %c0_89] : memref<1x128xf32, #tpu.memory_space<vmem>>, vector<1x128xf32>
    %236 = vector.broadcast %235 : vector<1x128xf32> to vector<64x128xf32>
    %237 = arith.addf %234, %236 : vector<64x128xf32>
    %c0_90 = arith.constant 0 : index
    %c0_91 = arith.constant 0 : index
    %c0_92 = arith.constant 0 : index
    %238 = vector.load %arg13[%c0_90, %c0_91, %c0_92] : memref<1x64x128xf32, #tpu.memory_space<vmem>>, vector<1x64x128xf32>
    %239 = vector.shape_cast %238 : vector<1x64x128xf32> to vector<64x128xf32>
    %240 = vector.shape_cast %237 : vector<64x128xf32> to vector<1x64x128xf32>
    tpu.vector_store %arg13[%c0_90, %c0_91, %c0_92], %240 {strides = array<i32>} : memref<1x64x128xf32, #tpu.memory_space<vmem>>, vector<1x64x128xf32>,
    return
  }
  func.func @transform_0(%arg0: i32, %arg1: i32) -> (i32, i32, i32) {
    %c0_i32 = arith.constant 0 : i32
    %c0_i32_0 = arith.constant 0 : i32
    return %arg0, %arg1, %c0_i32 : i32, i32, i32
  }
  func.func @transform_1(%arg0: i32, %arg1: i32) -> (i32, i32) {
    %c0_i32 = arith.constant 0 : i32
    %c0_i32_0 = arith.constant 0 : i32
    return %arg0, %c0_i32 : i32, i32
  }
  func.func @transform_2(%arg0: i32, %arg1: i32) -> (i32, i32) {
    %c0_i32 = arith.constant 0 : i32
    %c0_i32_0 = arith.constant 0 : i32
    return %arg0, %c0_i32 : i32, i32
  }
  func.func @transform_3(%arg0: i32, %arg1: i32) -> (i32, i32) {
    %c0_i32 = arith.constant 0 : i32
    %c0_i32_0 = arith.constant 0 : i32
    %c0_i32_1 = arith.constant 0 : i32
    return %c0_i32, %c0_i32_0 : i32, i32
  }
  func.func @transform_4(%arg0: i32, %arg1: i32) -> (i32, i32) {
    %c0_i32 = arith.constant 0 : i32
    %c0_i32_0 = arith.constant 0 : i32
    %c0_i32_1 = arith.constant 0 : i32
    return %c0_i32, %c0_i32_0 : i32, i32
  }
  func.func @transform_5(%arg0: i32, %arg1: i32) -> (i32, i32) {
    %c0_i32 = arith.constant 0 : i32
    %c0_i32_0 = arith.constant 0 : i32
    %c0_i32_1 = arith.constant 0 : i32
    return %c0_i32, %c0_i32_0 : i32, i32
  }
  func.func @transform_6(%arg0: i32, %arg1: i32) -> (i32, i32) {
    %c0_i32 = arith.constant 0 : i32
    %c0_i32_0 = arith.constant 0 : i32
    %c0_i32_1 = arith.constant 0 : i32
    return %c0_i32, %c0_i32_0 : i32, i32
  }
  func.func @transform_7(%arg0: i32, %arg1: i32) -> (i32, i32) {
    %c0_i32 = arith.constant 0 : i32
    %c0_i32_0 = arith.constant 0 : i32
    %c0_i32_1 = arith.constant 0 : i32
    return %c0_i32, %c0_i32_0 : i32, i32
  }
  func.func @transform_8(%arg0: i32, %arg1: i32) -> (i32, i32, i32) {
    %c0_i32 = arith.constant 0 : i32
    %c0_i32_0 = arith.constant 0 : i32
    return %arg0, %arg1, %c0_i32 : i32, i32, i32
  }
  func.func @transform_9(%arg0: i32, %arg1: i32) -> (i32, i32) {
    %c0_i32 = arith.constant 0 : i32
    %c0_i32_0 = arith.constant 0 : i32
    return %arg0, %c0_i32 : i32, i32
  }
  func.func @transform_10(%arg0: i32, %arg1: i32) -> (i32, i32) {
    %c0_i32 = arith.constant 0 : i32
    %c0_i32_0 = arith.constant 0 : i32
    return %arg0, %c0_i32 : i32, i32
  }
  func.func @transform_11(%arg0: i32, %arg1: i32) -> (i32, i32, i32) {
    %c0_i32 = arith.constant 0 : i32
    %c0_i32_0 = arith.constant 0 : i32
    return %arg0, %arg1, %c0_i32 : i32, i32, i32
  }
}

</mosaic_0001>

<bundles_post_ra>
// kernel: _mdnrnn_forward.2
= control target key start
LH: loop header
LB: loop body
LE: loop exit
PB: predicated region body
PF: predicated region fallthrough
CT: control target
= control target key end

     0   :  { %14 = vsyncpa [#allocation4], 0  ;;  %s3870_s0 = inlined_call_operand.vmem [shape: f32[1,64,12], index: 0, kind: input, shape index: {}]   ;;  %s3871_s1 = inlined_call_operand.vmem [shape: f32[8,128], index: 1, kind: input, shape index: {}, may-alias: {1,2}]   ;;  %s3872_s2 = inlined_call_operand.vmem [shape: f32[8,128], index: 2, kind: input, shape index: {}, may-alias: {1,2}]   ;;  %s3873_s3 = inlined_call_operand.hbm [shape: f32[12,512], index: 3, kind: input, shape index: {}]   ;;  %s3874_s4 = inlined_call_operand.hbm [shape: f32[128,512], index: 4, kind: input, shape index: {}]   ;;  %s3875_s5 = inlined_call_operand.hbm [shape: f32[1,512], index: 5, kind: input, shape index: {}]   ;;  %s3876_s6 = inlined_call_operand.vmem [shape: f32[1,64,128], index: 6, kind: output, shape index: {0}]   ;;  %s3877_s7 = inlined_call_operand.vmem [shape: f32[8,128], index: 7, kind: output, shape index: {1}]   ;;  %s3878_s8 = inlined_call_operand.vmem [shape: f32[8,128], index: 8, kind: output, shape index: {2}]  }
   0x1   :  { %15 = vsyncpa [#allocation6], 0  ;;  %s3219_s27 = smov [#allocation5]   ;;  %s3220_s29 = smov [#allocation3]  }
   0x2   :  { %s39_s28 = sshll.u32 %s3219_s27, 4  ;;  %s27_s30 = sshll.u32 %s3220_s29, 4  ;;  %s40_s28 = int_to_ptr.vmem [resolvable:$true] %s39_s28  ;;  %s3271_s30 = int_to_ptr.vmem [resolvable:$true] %s27_s30 }
   0x3   :  { %s3149_s11 = scalar_lea.hbm %s3874_s4, 8192 }
   0x4   :  { %p3150_p0 = scmp.ne.s32.totalorder %s3874_s4, %s3149_s11  ;;  %p3153_p1 = scmp.lt.u32.totalorder %s3149_s11, %s3874_s4 }
   0x6   :  { %p3155_p2 = pnand %p3153_p1, %p3150_p0 }
   0x8   :  { %3158 = shalt.err (!%p3155_p2)
}
   0x9   :  { %s3159_s16 = scalar_lea.vmem %s40_s28, 8192  ;;  %p3164_p4 = scmp.lt.s32.totalorder %s40_s28, %s40_s28 }
   0xa   :  { %p3160_p3 = scmp.ne.s32.totalorder %s40_s28, %s3159_s16  ;;  %p3165_p5 = scmp.lt.s32.totalorder %s3159_s16, %s3159_s16 }
   0xc   :  { %p3166_p6 = por %p3165_p5, %p3164_p4 }
   0xe   :  { %p3167_p7 = pnand %p3166_p6, %p3160_p3 }
  0x10   :  { %3170 = shalt.err (!%p3167_p7)
}
  0x11   :  { %s3221_s17 = smov 512   ;;  %s3222_s18 = smov 32  }
  0x12   :  { %45 = dma.hbm_to_vmem [thread:$0]  %s3874_s4, 8192, %s40_s28, [#allocation6], %s3221_s17, %s3221_s17, %s3222_s18  }
  0x13   :  { %s3171_s23 = scalar_lea.hbm %s3873_s3, 1024 }
  0x14   :  { %p3172_p8 = scmp.ne.s32.totalorder %s3873_s3, %s3171_s23  ;;  %p3175_p9 = scmp.lt.u32.totalorder %s3171_s23, %s3873_s3 }
  0x16   :  { %p3177_p10 = pnand %p3175_p9, %p3172_p8 }
  0x18   :  { %3180 = shalt.err (!%p3177_p10)
}
  0x19   :  { %s3181_s29 = scalar_lea.vmem %s3271_s30, 1024  ;;  %p3186_p12 = scmp.lt.s32.totalorder %s3271_s30, %s3271_s30 }
  0x1a   :  { %p3182_p11 = scmp.ne.s32.totalorder %s3271_s30, %s3181_s29  ;;  %p3187_p13 = scmp.lt.s32.totalorder %s3181_s29, %s3181_s29 }
  0x1c   :  { %p3188_p0 = por %p3187_p13, %p3186_p12 }
  0x1e   :  { %p3189_p1 = pnand %p3188_p0, %p3182_p11 }
  0x20   :  { %3192 = shalt.err (!%p3189_p1)
}
  0x21   :  { %33 = dma.hbm_to_vmem [thread:$0]  %s3873_s3, 1024, %s3271_s30, [#allocation4], %s3221_s17, %s3221_s17, %s3222_s18  }
  0x22   :  { %s3223_s9 = smov [#allocation7]   ;;  %s3193_s13 = scalar_lea.hbm %s3875_s5, 64 }
  0x23   :  { %s52_s10 = sshll.u32 %s3223_s9, 4  ;;  %p3194_p2 = scmp.ne.s32.totalorder %s3875_s5, %s3193_s13  ;;  %s53_s10 = int_to_ptr.vmem [resolvable:$true] %s52_s10 }
  0x24   :  { %p3197_p3 = scmp.lt.u32.totalorder %s3193_s13, %s3875_s5 }
  0x26   :  { %p3199_p4 = pnand %p3197_p3, %p3194_p2 }
  0x28   :  { %3202 = shalt.err (!%p3199_p4)
}
  0x29   :  { %s3203_s20 = scalar_lea.vmem %s53_s10, 64  ;;  %p3208_p6 = scmp.lt.s32.totalorder %s53_s10, %s53_s10 }
  0x2a   :  { %p3204_p5 = scmp.ne.s32.totalorder %s53_s10, %s3203_s20  ;;  %p3209_p7 = scmp.lt.s32.totalorder %s3203_s20, %s3203_s20 }
  0x2c   :  { %p3210_p8 = por %p3209_p7, %p3208_p6 }
  0x2e   :  { %p3211_p9 = pnand %p3210_p8, %p3204_p5 }
  0x30   :  { %3214 = shalt.err (!%p3211_p9)
}
  0x31   :  { %55 = dma.hbm_to_vmem [thread:$0]  %s3875_s5, 64, %s53_s10, [#allocation6]  }
  0x32   :  { %3215 = dma.done.wait [#allocation4], 1024  }
  0x33   :  { %3216 = vsyncadd [#allocation4], 4294966272 }
  0x34   :  { %3217 = dma.done.wait [#allocation6], 8256  }
  0x35   :  { %3218 = vsyncadd [#allocation6], 4294959040  ;;  %v3224_v0 = vmov 0.0   ;;  %vm136_vm0 = vcmask 1043456   ;;  %vm3225_vm1 = vmmov 1   ;;  %v82_v2 = vld [vmem:[#allocation3 + $0x8] sm:$0xff] }
  0x36   :  { %213 = vmatprep.mubr.f32.mxu0 %v3224_v0  ;;  %326 = vmatprep.mubr.f32.mxu1 %v3224_v0  ;;  %vm3316_vm2 = vmpackc.low %vm136_vm0, %vm3225_vm1  ;;  %v86_v3 = vld [vmem:[#allocation3 + $0x28] sm:$0xf]  ;;  %v84_v4 = vld [vmem:[#allocation3 + $0x18] sm:$0xff]  ;;  %vm111_vm3 = vcmask 97280  }
  0x37   :  { %v2426_v5 = vpack.c.bf16 %v86_v3, %v82_v2  ;;  %v88_v6 = vld [vmem:[#allocation3 + $0x38] sm:$0xf]  ;;  %v81_v7 = vld [vmem:[#allocation3] sm:$0xff]  ;;  %v83_v11 = vld [vmem:[#allocation3 + $0x10] sm:$0xff] }
  0x38   :  { %v85_v8 = vld [vmem:[#allocation3 + $0x20] sm:$0xf]  ;;  %v2432_v9 = vpack.c.bf16 %v88_v6, %v84_v4  ;;  %v87_v12 = vld [vmem:[#allocation3 + $0x30] sm:$0xf]  ;;  %v417_v15 = vld [vmem:[#allocation5 + $0x8] sm:$0xff] }
  0x39   :  { %v2429_v10 = vpack.c.bf16 %v85_v8, %v81_v7  ;;  %v73_v13 = vld [vmem:[%s3870_s0] sm:$0xff]  ;;  %2428 = vmatprep.subr.msk.bf16.mxu0 %vm3316_vm2, %v2426_v5  ;;  %v2435_v14 = vpack.c.bf16 %v87_v12, %v83_v11  ;;  %v421_v16 = vld [vmem:[#allocation5 + $0x28] sm:$0xff]  ;;  %v419_v17 = vld [vmem:[#allocation5 + $0x18] sm:$0xff] }
  0x3a   :  { %2434 = vmatprep.subr.msk.bf16.mxu1 %vm3316_vm2, %v2432_v9  ;;  %v3329_v18 = vpack.c.bf16 %v421_v16, %v417_v15  ;;  %v423_v19 = vld [vmem:[#allocation5 + $0x38] sm:$0xff]  ;;  %v416_v20 = vld [vmem:[#allocation5] sm:$0xff]  ;;  %v418_v24 = vld [vmem:[#allocation5 + $0x10] sm:$0xff] }
  0x3b   :  { %2431 = vmatpush1.bf16.msk.msra.mxu0 %vm3316_vm2, %v2429_v10  ;;  %v420_v21 = vld [vmem:[#allocation5 + $0x20] sm:$0xff]  ;;  %2437 = vmatpush1.bf16.msk.msra.mxu1 %vm3316_vm2, %v2435_v14  ;;  %v3333_v22 = vpack.c.bf16 %v423_v19, %v419_v17  ;;  %v422_v25 = vld [vmem:[#allocation5 + $0x30] sm:$0xff]  ;;  %v425_v27 = vld [vmem:[#allocation5 + $0x48] sm:$0xff] }
  0x3c   :  { %v3335_v23 = vpack.c.bf16 %v420_v21, %v416_v20  ;;  %2439 = vmatprep.subr.bf16.mxu0 %v3329_v18  ;;  %v3338_v26 = vpack.c.bf16 %v422_v25, %v418_v24  ;;  %v429_v28 = vld [vmem:[#allocation5 + $0x68] sm:$0xff]  ;;  %v427_v29 = vld [vmem:[#allocation5 + $0x58] sm:$0xff]  ;;  %v424_v32 = vld [vmem:[#allocation5 + $0x40] sm:$0xff] }
  0x3d   :  { %2471 = vmatprep.subr.bf16.mxu1 %v3333_v22  ;;  %v3342_v30 = vpack.c.bf16 %v429_v28, %v425_v27  ;;  %v431_v31 = vld [vmem:[#allocation5 + $0x78] sm:$0xff]  ;;  %v428_v33 = vld [vmem:[#allocation5 + $0x60] sm:$0xff]  ;;  %v74_v34 = vld [vmem:[%s3870_s0 + $0x8] sm:$0xff] }
  0x3e   :  { %2377 = vmatmul.mubr.msk.f32.vlgmr.msra.gmra.mrb[0].mxu0 %vm111_vm3, %v73_v13  ;;  %2387 = vmatmul.mubr.msk.f32.vlgmr.msra.gmra.mrb[0].mxu1 %vm111_vm3, %v73_v13  ;;  %v3349_v35 = vpack.c.bf16 %v431_v31, %v427_v29  ;;  %v3351_v36 = vpack.c.bf16 %v428_v33, %v424_v32  ;;  %v426_v37 = vld [vmem:[#allocation5 + $0x50] sm:$0xff]  ;;  %v433_v40 = vld [vmem:[#allocation5 + $0x88] sm:$0xff]  ;;  %v435_v42 = vld [vmem:[#allocation5 + $0x98] sm:$0xff] }
  0x3f   :  { %2441 = vmatpush1.bf16.msra.mxu0 %v3335_v23  ;;  %v430_v38 = vld [vmem:[#allocation5 + $0x70] sm:$0xff]  ;;  %2473 = vmatpush1.bf16.msra.mxu1 %v3338_v26  ;;  %v437_v41 = vld [vmem:[#allocation5 + $0xa8] sm:$0xff]  ;;  %v439_v44 = vld [vmem:[#allocation5 + $0xb8] sm:$0xff] }
  0x40   :  { %219 = vmatprep.mubr.f32.mxu0 %v3224_v0  ;;  %v3355_v39 = vpack.c.bf16 %v430_v38, %v426_v37  ;;  %332 = vmatprep.mubr.f32.mxu1 %v3224_v0  ;;  %v3359_v43 = vpack.c.bf16 %v437_v41, %v433_v40  ;;  %v432_v45 = vld [vmem:[#allocation5 + $0x80] sm:$0xff]  ;;  %v75_v47 = vld [vmem:[%s3870_s0 + $0x10] sm:$0xff]  ;;  %v3366_v48 = vpack.c.bf16 %v439_v44, %v435_v42  ;;  %v441_v52 = vld [vmem:[#allocation5 + $0xc8] sm:$0xff] }
  0x41   :  { %2443 = vmatprep.subr.bf16.mxu0 %v3342_v30  ;;  %v436_v46 = vld [vmem:[#allocation5 + $0xa0] sm:$0xff]  ;;  %2475 = vmatprep.subr.bf16.mxu1 %v3349_v35  ;;  %v434_v49 = vld [vmem:[#allocation5 + $0x90] sm:$0xff]  ;;  %v445_v53 = vld [vmem:[#allocation5 + $0xe8] sm:$0xff] }
  0x42   :  { %2378 = vmatmul.mubr.msk.f32.gmra.mrb[2].mxu0 %vm111_vm3, %v74_v34  ;;  %v438_v50 = vld [vmem:[#allocation5 + $0xb0] sm:$0xff]  ;;  %2388 = vmatmul.mubr.msk.f32.gmra.mrb[2].mxu1 %vm111_vm3, %v74_v34  ;;  %v3370_v51 = vpack.c.bf16 %v436_v46, %v432_v45  ;;  %v443_v54 = vld [vmem:[#allocation5 + $0xd8] sm:$0xff]  ;;  %v440_v57 = vld [vmem:[#allocation5 + $0xc0] sm:$0xff]  ;;  %v3378_v59 = vpack.c.bf16 %v445_v53, %v441_v52 }
  0x43   :  { %2445 = vmatpush1.bf16.msra.mxu0 %v3351_v36  ;;  %2477 = vmatpush1.bf16.msra.mxu1 %v3355_v39  ;;  %v3374_v55 = vpack.c.bf16 %v438_v50, %v434_v49  ;;  %v447_v56 = vld [vmem:[#allocation5 + $0xf8] sm:$0xff]  ;;  %v444_v58 = vld [vmem:[#allocation5 + $0xe0] sm:$0xff]  ;;  %v442_v60 = vld [vmem:[#allocation5 + $0xd0] sm:$0xff] }
  0x44   :  { %225 = vmatprep.mubr.f32.mxu0 %v3224_v0  ;;  %338 = vmatprep.mubr.f32.mxu1 %v3224_v0  ;;  %v446_v61 = vld [vmem:[#allocation5 + $0xf0] sm:$0xff]  ;;  %v3382_v62 = vpack.c.bf16 %v447_v56, %v443_v54  ;;  %v449_v63 = vld [vmem:[#allocation5 + $0x108] sm:$0xff]  ;;  %v76_v2 = vld [vmem:[%s3870_s0 + $0x18] sm:$0xff]  ;;  %v3389_v3 = vpack.c.bf16 %v444_v58, %v440_v57 }
  0x45   :  { %2447 = vmatprep.subr.bf16.mxu0 %v3359_v43  ;;  %2479 = vmatprep.subr.bf16.mxu1 %v3366_v48  ;;  %v453_v1 = vld [vmem:[#allocation5 + $0x128] sm:$0xff]  ;;  %v451_v4 = vld [vmem:[#allocation5 + $0x118] sm:$0xff]  ;;  %v3393_v6 = vpack.c.bf16 %v446_v61, %v442_v60  ;;  %v448_v7 = vld [vmem:[#allocation5 + $0x100] sm:$0xff] }
  0x46   :  { %2379 = vmatmul.mubr.msk.f32.gmra.mrb[4].mxu0 %vm111_vm3, %v75_v47  ;;  %2389 = vmatmul.mubr.msk.f32.gmra.mrb[4].mxu1 %vm111_vm3, %v75_v47  ;;  %v455_v5 = vld [vmem:[#allocation5 + $0x138] sm:$0xff]  ;;  %v452_v8 = vld [vmem:[#allocation5 + $0x120] sm:$0xff]  ;;  %v3397_v9 = vpack.c.bf16 %v453_v1, %v449_v63  ;;  %v450_v10 = vld [vmem:[#allocation5 + $0x110] sm:$0xff] }
  0x47   :  { %2449 = vmatpush1.bf16.msra.mxu0 %v3370_v51  ;;  %2481 = vmatpush1.bf16.msra.mxu1 %v3374_v55  ;;  %v454_v11 = vld [vmem:[#allocation5 + $0x130] sm:$0xff]  ;;  %v3401_v12 = vpack.c.bf16 %v455_v5, %v451_v4  ;;  %v457_v13 = vld [vmem:[#allocation5 + $0x148] sm:$0xff]  ;;  %v77_v15 = vld [vmem:[%s3870_s0 + $0x20] sm:$0xff]  ;;  %v3408_v16 = vpack.c.bf16 %v452_v8, %v448_v7 }
  0x48   :  { %231 = vmatprep.mubr.f32.mxu0 %v3224_v0  ;;  %344 = vmatprep.mubr.f32.mxu1 %v3224_v0  ;;  %v461_v14 = vld [vmem:[#allocation5 + $0x168] sm:$0xff]  ;;  %v459_v17 = vld [vmem:[#allocation5 + $0x158] sm:$0xff]  ;;  %v3412_v20 = vpack.c.bf16 %v454_v11, %v450_v10  ;;  %v456_v21 = vld [vmem:[#allocation5 + $0x140] sm:$0xff]  ;;  %v91_v10 = vlaneseq }
  0x49   :  { %2451 = vmatprep.subr.bf16.mxu0 %v3378_v59  ;;  %2483 = vmatprep.subr.bf16.mxu1 %v3382_v62  ;;  %v463_v19 = vld [vmem:[#allocation5 + $0x178] sm:$0xff]  ;;  %v460_v24 = vld [vmem:[#allocation5 + $0x160] sm:$0xff]  ;;  %v3416_v25 = vpack.c.bf16 %v461_v14, %v457_v13  ;;  %v458_v27 = vld [vmem:[#allocation5 + $0x150] sm:$0xff] }
  0x4a   :  { %2380 = vmatmul.mubr.msk.f32.gmra.mrb[6].mxu0 %vm111_vm3, %v76_v2  ;;  %2390 = vmatmul.mubr.msk.f32.gmra.mrb[6].mxu1 %vm111_vm3, %v76_v2  ;;  %v462_v28 = vld [vmem:[#allocation5 + $0x170] sm:$0xff]  ;;  %v3420_v29 = vpack.c.bf16 %v463_v19, %v459_v17  ;;  %v465_v31 = vld [vmem:[#allocation5 + $0x188] sm:$0xff]  ;;  %v3427_v34 = vpack.c.bf16 %v460_v24, %v456_v21  ;;  %v467_v37 = vld [vmem:[#allocation5 + $0x198] sm:$0xff]  ;;  %v92_v11 = vshrl.u32 %v91_v10, 7 }
  0x4b   :  { %2453 = vmatpush1.bf16.msra.mxu0 %v3389_v3  ;;  %2485 = vmatpush1.bf16.msra.mxu1 %v3393_v6  ;;  %v469_v32 = vld [vmem:[#allocation5 + $0x1a8] sm:$0xff]  ;;  %v471_v38 = vld [vmem:[#allocation5 + $0x1b8] sm:$0xff]  ;;  %v3431_v40 = vpack.c.bf16 %v462_v28, %v458_v27  ;;  %v464_v41 = vld [vmem:[#allocation5 + $0x180] sm:$0xff] }
  0x4c   :  { %237 = vmatprep.mubr.f32.mxu0 %v3224_v0  ;;  %350 = vmatprep.mubr.f32.mxu1 %v3224_v0  ;;  %v78_v33 = vld [vmem:[%s3870_s0 + $0x28] sm:$0xff]  ;;  %v468_v42 = vld [vmem:[#allocation5 + $0x1a0] sm:$0xff]  ;;  %v3435_v44 = vpack.c.bf16 %v469_v32, %v465_v31  ;;  %v466_v45 = vld [vmem:[#allocation5 + $0x190] sm:$0xff]  ;;  %v3439_v47 = vpack.c.bf16 %v471_v38, %v467_v37  ;;  %v93_v13 = vsub.s32 0, %v92_v11  ;;  %v101_v24 = vsub.s32 2, %v92_v11 }
  0x4d   :  { %2455 = vmatprep.subr.bf16.mxu0 %v3397_v9  ;;  %2487 = vmatprep.subr.bf16.mxu1 %v3401_v12  ;;  %v470_v46 = vld [vmem:[#allocation5 + $0x1b0] sm:$0xff]  ;;  %v473_v49 = vld [vmem:[#allocation5 + $0x1c8] sm:$0xff]  ;;  %v3446_v53 = vpack.c.bf16 %v468_v42, %v464_v41  ;;  %v475_v54 = vld [vmem:[#allocation5 + $0x1d8] sm:$0xff]  ;;  %v105_v38 = vsub.s32 3, %v92_v11 }
  0x4e   :  { %2381 = vmatmul.mubr.msk.f32.gmra.mrb[8].mxu0 %vm111_vm3, %v77_v15  ;;  %2391 = vmatmul.mubr.msk.f32.gmra.mrb[8].mxu1 %vm111_vm3, %v77_v15  ;;  %v477_v50 = vld [vmem:[#allocation5 + $0x1e8] sm:$0xff]  ;;  %v79_v52 = vld [vmem:[%s3870_s0 + $0x30] sm:$0xff]  ;;  %v479_v56 = vld [vmem:[#allocation5 + $0x1f8] sm:$0xff]  ;;  %v3450_v57 = vpack.c.bf16 %v470_v46, %v466_v45  ;;  %v97_v15 = vsub.s32 1, %v92_v11 }
  0x4f   :  { %2457 = vmatpush1.bf16.msra.mxu0 %v3408_v16  ;;  %2489 = vmatpush1.bf16.msra.mxu1 %v3412_v20  ;;  %v472_v58 = vld [vmem:[#allocation5 + $0x1c0] sm:$0xff]  ;;  %v3454_v61 = vpack.c.bf16 %v477_v50, %v473_v49  ;;  %v474_v63 = vld [vmem:[#allocation5 + $0x1d0] sm:$0xff]  ;;  %v3458_v2 = vpack.c.bf16 %v479_v56, %v475_v54  ;;  %v80_v4 = vld [vmem:[%s3870_s0 + $0x38] sm:$0xff] }
  0x50   :  { %243 = vmatprep.mubr.f32.mxu0 %v3224_v0  ;;  %356 = vmatprep.mubr.f32.mxu1 %v3224_v0  ;;  %v476_v60 = vld [vmem:[#allocation5 + $0x1e0] sm:$0xff]  ;;  %v478_v1 = vld [vmem:[#allocation5 + $0x1f0] sm:$0xff] }
  0x51   :  { %2459 = vmatprep.subr.bf16.mxu0 %v3416_v25  ;;  %2491 = vmatprep.subr.bf16.mxu1 %v3420_v29  ;;  %v3465_v5 = vpack.c.bf16 %v476_v60, %v472_v58  ;;  %v3469_v7 = vpack.c.bf16 %v478_v1, %v474_v63  ;;  %v69_v8 = vld [vmem:[%s3871_s1] sm:$0xff] }
  0x52   :  { %2382 = vmatmul.mubr.msk.f32.gmra.mrb[10].mxu0 %vm111_vm3, %v78_v33  ;;  %2392 = vmatmul.mubr.msk.f32.gmra.mrb[10].mxu1 %vm111_vm3, %v78_v33  ;;  %v89_v14 = vld [vmem:[#allocation7] sm:$0xf] }
  0x53   :  { %2461 = vmatpush1.bf16.msra.mxu0 %v3427_v34  ;;  %2493 = vmatpush1.bf16.msra.mxu1 %v3431_v40  ;;  %v3519_v17 = vrot.slane %v89_v14, %v93_v13  ;;  %v3521_v19 = vrot.slane %v89_v14, %v97_v15  ;;  %v3528_v42 = vrot.slane %v89_v14, %v105_v38  ;;  %v71_v63 = vld [vmem:[%s3872_s2] sm:$0xff] }
  0x54   :  { %249 = vmatprep.mubr.f32.mxu0 %v3224_v0  ;;  %362 = vmatprep.mubr.f32.mxu1 %v3224_v0 }
  0x55   :  { %2463 = vmatprep.subr.bf16.mxu0 %v3435_v44  ;;  %2495 = vmatprep.subr.bf16.mxu1 %v3439_v47 }
  0x56   :  { %2383 = vmatmul.mubr.msk.f32.gmra.mrb[12].mxu0 %vm111_vm3, %v79_v52  ;;  %2393 = vmatmul.mubr.msk.f32.gmra.mrb[12].mxu1 %vm111_vm3, %v79_v52 }
  0x57   :  { %2465 = vmatpush1.bf16.msra.mxu0 %v3446_v53  ;;  %2497 = vmatpush1.bf16.msra.mxu1 %v3450_v57 }
  0x58   :  { %255 = vmatprep.mubr.f32.mxu0 %v3224_v0  ;;  %368 = vmatprep.mubr.f32.mxu1 %v3224_v0 }
  0x59   :  { %2467 = vmatprep.subr.bf16.mxu0 %v3454_v61  ;;  %2499 = vmatprep.subr.bf16.mxu1 %v3458_v2 }
  0x5a   :  { %2384 = vmatmul.mubr.msk.f32.gmra.mrb[14].mxu0 %vm111_vm3, %v80_v4  ;;  %2394 = vmatmul.mubr.msk.f32.gmra.mrb[14].mxu1 %vm111_vm3, %v80_v4 }
  0x5b   :  { %2469 = vmatpush1.bf16.msra.mxu0 %v3465_v5  ;;  %2501 = vmatpush1.bf16.msra.mxu1 %v3469_v7 }
  0x5c   :  { %544 = vmatprep.mubr.f32.mxu0 %v3224_v0  ;;  %615 = vmatprep.mubr.f32.mxu1 %v3224_v0 }
  0x5d   :  { %2503 = vmatprep.subr.bf16.mxu0 %v3329_v18  ;;  %2535 = vmatprep.subr.bf16.mxu1 %v3333_v22 }
  0x5e   :  { %545 = vmatmul.mubr.f32.vlgmr.msra.gmra.mrb[0].mxu0 %v69_v8  ;;  %616 = vmatmul.mubr.f32.vlgmr.msra.gmra.mrb[0].mxu1 %v69_v8 }
  0x5f   :  { %2505 = vmatpush1.bf16.msra.mxu0 %v3335_v23  ;;  %2537 = vmatpush1.bf16.msra.mxu1 %v3338_v26 }
  0x60   :  { %2507 = vmatprep.subr.bf16.mxu0 %v3342_v30  ;;  %2539 = vmatprep.subr.bf16.mxu1 %v3349_v35 }
  0x61   :  { %786 = vmatprep.mubr.f32.mxu0 %v3224_v0  ;;  %857 = vmatprep.mubr.f32.mxu1 %v3224_v0 }
  0x63   :  { %2509 = vmatpush1.bf16.msra.mxu0 %v3351_v36  ;;  %2541 = vmatpush1.bf16.msra.mxu1 %v3355_v39 }
  0x64   :  { %2511 = vmatprep.subr.bf16.mxu0 %v3359_v43  ;;  %2543 = vmatprep.subr.bf16.mxu1 %v3366_v48 }
  0x67   :  { %2513 = vmatpush1.bf16.msra.mxu0 %v3370_v51  ;;  %2545 = vmatpush1.bf16.msra.mxu1 %v3374_v55 }
  0x68   :  { %2515 = vmatprep.subr.bf16.mxu0 %v3378_v59  ;;  %2547 = vmatprep.subr.bf16.mxu1 %v3382_v62 }
  0x6b   :  { %2517 = vmatpush1.bf16.msra.mxu0 %v3389_v3  ;;  %2549 = vmatpush1.bf16.msra.mxu1 %v3393_v6 }
  0x6c   :  { %2519 = vmatprep.subr.bf16.mxu0 %v3397_v9  ;;  %2551 = vmatprep.subr.bf16.mxu1 %v3401_v12 }
  0x6f   :  { %2521 = vmatpush1.bf16.msra.mxu0 %v3408_v16  ;;  %2553 = vmatpush1.bf16.msra.mxu1 %v3412_v20 }
  0x70   :  { %2523 = vmatprep.subr.bf16.mxu0 %v3416_v25  ;;  %2555 = vmatprep.subr.bf16.mxu1 %v3420_v29 }
  0x73   :  { %2525 = vmatpush1.bf16.msra.mxu0 %v3427_v34  ;;  %2557 = vmatpush1.bf16.msra.mxu1 %v3431_v40 }
  0x74   :  { %2527 = vmatprep.subr.bf16.mxu0 %v3435_v44  ;;  %2559 = vmatprep.subr.bf16.mxu1 %v3439_v47 }
  0x77   :  { %2529 = vmatpush1.bf16.msra.mxu0 %v3446_v53  ;;  %2561 = vmatpush1.bf16.msra.mxu1 %v3450_v57 }
  0x78   :  { %2531 = vmatprep.subr.bf16.mxu0 %v3454_v61  ;;  %2563 = vmatprep.subr.bf16.mxu1 %v3458_v2 }
  0x7b   :  { %2533 = vmatpush1.bf16.msra.mxu0 %v3465_v5  ;;  %2565 = vmatpush1.bf16.msra.mxu1 %v3469_v7 }
  0x7c   :  { %2567 = vmatprep.subr.bf16.mxu0 %v3329_v18  ;;  %2599 = vmatprep.subr.bf16.mxu1 %v3333_v22  ;;  %v3525_v22 = vrot.slane %v89_v14, %v101_v24 }
 0x131   :  { %v546_v21 = vpop.f32.mrb[0].mxu0  ;;  %v617_v28 = vpop.f32.mrb[0].mxu1 }
 0x132   :  { %v2950_v27 = vadd.f32 %v546_v21, %v3519_v17  ;;  %v548_v31 = vpop.f32.mrb[1].mxu0  ;;  %v619_v18 = vpop.f32.mrb[1].mxu1  ;;  %v2966_v41 = vadd.f32 %v617_v28, %v3525_v22 }
 0x133   :  { %v2951_v32 = vadd.f32 %v548_v31, %v3521_v19  ;;  %v2967_v46 = vadd.f32 %v619_v18, %v3528_v42 }
 0x134   :  { %v2395_v33 = vmul.f32 -1.442695, %v2950_v27  ;;  %v2397_v45 = vmul.f32 -1.442695, %v2966_v41 }
 0x135   :  { %v2396_v37 = vmul.f32 -1.442695, %v2951_v32 }
 0x136   :  { %3021 = vpow2.f32 %v2395_v33 }
 0x137   :  { %3023 = vpow2.f32 %v2396_v37 }
 0x138   :  { %3025 = vpow2.f32 %v2397_v45 }
 0x139   :  { %3027 = vtanh.f32 %v2967_v46 }
 0x140   :  { %v3022_v49 = vpop.eup %3021 }
 0x141   :  { %v635_v50 = vadd.f32 1.0, %v3022_v49  ;;  %v3024_v52 = vpop.eup %3023 }
 0x142   :  { %v636_v54 = vadd.f32 1.0, %v3024_v52  ;;  %v3026_v56 = vpop.eup %3025 }
 0x143   :  { %3029 = vrcp.f32 %v635_v50  ;;  %v3028_v58 = vpop.eup %3027  ;;  %v637_v8 = vadd.f32 1.0, %v3026_v56  ;;  %v1149_v56 = vld [vmem:[#allocation5 + $0x28] sm:$0xff] }
 0x144   :  { %3031 = vrcp.f32 %v636_v54  ;;  %v1145_v54 = vld [vmem:[#allocation5 + $0x8] sm:$0xff] }
 0x145   :  { %3033 = vrcp.f32 %v637_v8 }
 0x14d   :  { %v3030_v60 = vpop.eup %3029 }
 0x14e   :  { %v646_v1 = vmul.f32 %v3030_v60, %v3028_v58  ;;  %v3032_v4 = vpop.eup %3031  ;;  %v1147_v58 = vld [vmem:[#allocation5 + $0x18] sm:$0xff]  ;;  %v3585_v60 = vpack.c.bf16 %v1149_v56, %v1145_v54 }
 0x14f   :  { %v645_v10 = vmul.f32 %v3032_v4, %v71_v63  ;;  %v3034_v13 = vpop.eup %3033  ;;  %v1151_v63 = vld [vmem:[#allocation5 + $0x38] sm:$0xff]  ;;  %v1148_v4 = vld [vmem:[#allocation5 + $0x20] sm:$0xff] }
 0x150   :  { %v3587_v8 = vpack.c.bf16 %v1151_v63, %v1147_v58 }
 0x151   :  { %v3534_v11 = vadd.f32 %v646_v1, %v645_v10  ;;  %v1144_v1 = vld [vmem:[#allocation5] sm:$0xff] }
 0x152   :  { %v3589_v10 = vpack.c.bf16 %v1148_v4, %v1144_v1  ;;  %v1416_v1 = vld [vmem:[#allocation5 + $0xe8] sm:$0xff]  ;;  %v1414_v4 = vld [vmem:[#allocation5 + $0xd8] sm:$0xff] }
 0x153   :  { %3035 = vtanh.f32 %v3534_v11 }
 0x15d   :  { %v3036_v14 = vpop.eup %3035 }
 0x15e   :  { %v649_v15 = vmul.f32 %v3036_v14, %v3034_v13  ;;  %v1150_v13 = vld [vmem:[#allocation5 + $0x30] sm:$0xff] }
 0x160   :  { %650 = vst [vmem:[%s3876_s6] sm:$0xff] %v649_v15  ;;  %787 = vmatmul.mubr.f32.vlgmr.msra.gmra.mrb[2].mxu0 %v649_v15  ;;  %858 = vmatmul.mubr.f32.vlgmr.msra.gmra.mrb[2].mxu1 %v649_v15  ;;  %v1153_v15 = vld [vmem:[#allocation5 + $0x48] sm:$0xff] }
 0x161   :  { %2569 = vmatpush1.bf16.msra.mxu0 %v3335_v23  ;;  %2601 = vmatpush1.bf16.msra.mxu1 %v3338_v26 }
 0x162   :  { %2571 = vmatprep.subr.bf16.mxu0 %v3342_v30  ;;  %2603 = vmatprep.subr.bf16.mxu1 %v3349_v35 }
 0x163   :  { %1029 = vmatprep.mubr.f32.mxu0 %v3224_v0  ;;  %1100 = vmatprep.mubr.f32.mxu1 %v3224_v0 }
 0x165   :  { %2573 = vmatpush1.bf16.msra.mxu0 %v3351_v36  ;;  %2605 = vmatpush1.bf16.msra.mxu1 %v3355_v39 }
 0x166   :  { %2575 = vmatprep.subr.bf16.mxu0 %v3359_v43  ;;  %2607 = vmatprep.subr.bf16.mxu1 %v3366_v48 }
 0x169   :  { %2577 = vmatpush1.bf16.msra.mxu0 %v3370_v51  ;;  %2609 = vmatpush1.bf16.msra.mxu1 %v3374_v55 }
 0x16a   :  { %2579 = vmatprep.subr.bf16.mxu0 %v3378_v59  ;;  %2611 = vmatprep.subr.bf16.mxu1 %v3382_v62 }
 0x16d   :  { %2581 = vmatpush1.bf16.msra.mxu0 %v3389_v3  ;;  %2613 = vmatpush1.bf16.msra.mxu1 %v3393_v6 }
 0x16e   :  { %2583 = vmatprep.subr.bf16.mxu0 %v3397_v9  ;;  %2615 = vmatprep.subr.bf16.mxu1 %v3401_v12 }
 0x171   :  { %2585 = vmatpush1.bf16.msra.mxu0 %v3408_v16  ;;  %2617 = vmatpush1.bf16.msra.mxu1 %v3412_v20 }
 0x172   :  { %2587 = vmatprep.subr.bf16.mxu0 %v3416_v25  ;;  %2619 = vmatprep.subr.bf16.mxu1 %v3420_v29 }
 0x175   :  { %2589 = vmatpush1.bf16.msra.mxu0 %v3427_v34  ;;  %2621 = vmatpush1.bf16.msra.mxu1 %v3431_v40 }
 0x176   :  { %2591 = vmatprep.subr.bf16.mxu0 %v3435_v44  ;;  %2623 = vmatprep.subr.bf16.mxu1 %v3439_v47 }
 0x179   :  { %2593 = vmatpush1.bf16.msra.mxu0 %v3446_v53  ;;  %2625 = vmatpush1.bf16.msra.mxu1 %v3450_v57 }
 0x17a   :  { %2595 = vmatprep.subr.bf16.mxu0 %v3454_v61  ;;  %2627 = vmatprep.subr.bf16.mxu1 %v3458_v2 }
 0x17d   :  { %2597 = vmatpush1.bf16.msra.mxu0 %v3465_v5  ;;  %2629 = vmatpush1.bf16.msra.mxu1 %v3469_v7 }
 0x17e   :  { %2631 = vmatprep.subr.bf16.mxu0 %v3585_v60  ;;  %2663 = vmatprep.subr.bf16.mxu1 %v3587_v8 }
 0x233   :  { %v788_v23 = vpop.f32.mrb[2].mxu0  ;;  %v859_v26 = vpop.f32.mrb[2].mxu1 }
 0x234   :  { %v2952_v30 = vadd.f32 %v788_v23, %v3519_v17  ;;  %v790_v35 = vpop.f32.mrb[3].mxu0  ;;  %v861_v36 = vpop.f32.mrb[3].mxu1  ;;  %v2968_v51 = vadd.f32 %v859_v26, %v3525_v22  ;;  %v1157_v23 = vld [vmem:[#allocation5 + $0x68] sm:$0xff]  ;;  %v1155_v26 = vld [vmem:[#allocation5 + $0x58] sm:$0xff] }
 0x235   :  { %v2953_v39 = vadd.f32 %v790_v35, %v3521_v19  ;;  %v2969_v55 = vadd.f32 %v861_v36, %v3528_v42  ;;  %v1159_v35 = vld [vmem:[#allocation5 + $0x78] sm:$0xff]  ;;  %v1152_v36 = vld [vmem:[#allocation5 + $0x40] sm:$0xff] }
 0x236   :  { %v2398_v43 = vmul.f32 -1.442695, %v2952_v30  ;;  %v2400_v21 = vmul.f32 -1.442695, %v2968_v51  ;;  %v3597_v30 = vpack.c.bf16 %v1157_v23, %v1153_v15  ;;  %v1154_v51 = vld [vmem:[#allocation5 + $0x50] sm:$0xff]  ;;  %v1411_v15 = vld [vmem:[#allocation5 + $0xc0] sm:$0xff] }
 0x237   :  { %v2399_v48 = vmul.f32 -1.442695, %v2953_v39  ;;  %v1156_v39 = vld [vmem:[#allocation5 + $0x60] sm:$0xff] }
 0x238   :  { %3037 = vpow2.f32 %v2398_v43  ;;  %v3599_v43 = vpack.c.bf16 %v1159_v35, %v1155_v26  ;;  %v1415_v23 = vld [vmem:[#allocation5 + $0xe0] sm:$0xff] }
 0x239   :  { %3039 = vpow2.f32 %v2399_v48  ;;  %v3601_v48 = vpack.c.bf16 %v1156_v39, %v1152_v36  ;;  %v3670_v35 = vpack.c.bf16 %v1415_v23, %v1411_v15  ;;  %v1413_v36 = vld [vmem:[#allocation5 + $0xd0] sm:$0xff]  ;;  %v1446_v23 = vld [vmem:[#allocation5 + $0x1d8] sm:$0xff] }
 0x23a   :  { %3041 = vtanh.f32 %v2969_v55  ;;  %v1158_v55 = vld [vmem:[#allocation5 + $0x70] sm:$0xff] }
 0x23b   :  { %3043 = vpow2.f32 %v2400_v21  ;;  %v3604_v21 = vpack.c.bf16 %v1158_v55, %v1154_v51  ;;  %v1417_v39 = vld [vmem:[#allocation5 + $0xf0] sm:$0xff]  ;;  %v1420_v55 = vld [vmem:[#allocation5 + $0x108] sm:$0xff] }
 0x23c   :  { %v3673_v51 = vpack.c.bf16 %v1417_v39, %v1413_v36  ;;  %v1450_v36 = vld [vmem:[#allocation5 + $0x1f8] sm:$0xff]  ;;  %v1443_v39 = vld [vmem:[#allocation5 + $0x1c0] sm:$0xff] }
 0x242   :  { %v3038_v24 = vpop.eup %3037 }
 0x243   :  { %v877_v27 = vadd.f32 1.0, %v3038_v24  ;;  %v3040_v28 = vpop.eup %3039  ;;  %v1161_v24 = vld [vmem:[#allocation5 + $0x88] sm:$0xff] }
 0x244   :  { %v878_v31 = vadd.f32 1.0, %v3040_v28  ;;  %v3042_v32 = vpop.eup %3041  ;;  %v1163_v28 = vld [vmem:[#allocation5 + $0x98] sm:$0xff] }
 0x245   :  { %3045 = vrcp.f32 %v877_v27  ;;  %v3044_v18 = vpop.eup %3043  ;;  %v1165_v27 = vld [vmem:[#allocation5 + $0xa8] sm:$0xff] }
 0x246   :  { %3047 = vrcp.f32 %v878_v31  ;;  %v879_v41 = vadd.f32 1.0, %v3044_v18  ;;  %v3609_v31 = vpack.c.bf16 %v1165_v27, %v1161_v24  ;;  %v1160_v18 = vld [vmem:[#allocation5 + $0x80] sm:$0xff]  ;;  %v1424_v24 = vld [vmem:[#allocation5 + $0x128] sm:$0xff]  ;;  %v1422_v27 = vld [vmem:[#allocation5 + $0x118] sm:$0xff] }
 0x248   :  { %3049 = vrcp.f32 %v879_v41  ;;  %v1162_v41 = vld [vmem:[#allocation5 + $0x90] sm:$0xff] }
 0x24f   :  { %v3046_v33 = vpop.eup %3045 }
 0x250   :  { %v888_v37 = vmul.f32 %v3046_v33, %v3042_v32  ;;  %v3048_v38 = vpop.eup %3047  ;;  %v1167_v32 = vld [vmem:[#allocation5 + $0xb8] sm:$0xff]  ;;  %v1164_v33 = vld [vmem:[#allocation5 + $0xa0] sm:$0xff] }
 0x251   :  { %v887_v45 = vmul.f32 %v3048_v38, %v3534_v11  ;;  %v1146_v11 = vld [vmem:[#allocation5 + $0x10] sm:$0xff]  ;;  %v3613_v38 = vpack.c.bf16 %v1164_v33, %v1160_v18  ;;  %v1419_v18 = vld [vmem:[#allocation5 + $0x100] sm:$0xff] }
 0x252   :  { %v3050_v49 = vpop.eup %3049  ;;  %v3592_v14 = vpack.c.bf16 %v1150_v13, %v1146_v11  ;;  %v1418_v13 = vld [vmem:[#allocation5 + $0xf8] sm:$0xff]  ;;  %v1423_v33 = vld [vmem:[#allocation5 + $0x120] sm:$0xff] }
 0x253   :  { %v3577_v46 = vadd.f32 %v888_v37, %v887_v45  ;;  %v3611_v37 = vpack.c.bf16 %v1167_v32, %v1163_v28  ;;  %v1166_v45 = vld [vmem:[#allocation5 + $0xb0] sm:$0xff]  ;;  %v3668_v26 = vpack.c.bf16 %v1418_v13, %v1414_v4  ;;  %v3678_v28 = vpack.c.bf16 %v1424_v24, %v1420_v55  ;;  %v1426_v32 = vld [vmem:[#allocation5 + $0x138] sm:$0xff]  ;;  %v1448_v4 = vld [vmem:[#allocation5 + $0x1e8] sm:$0xff] }
 0x254   :  { %v3714_v55 = vpack.c.bf16 %v1450_v36, %v1446_v23  ;;  %v1447_v24 = vld [vmem:[#allocation5 + $0x1e0] sm:$0xff] }
 0x255   :  { %3051 = vtanh.f32 %v3577_v46 }
 0x25f   :  { %v3052_v50 = vpop.eup %3051 }
 0x260   :  { %v891_v52 = vmul.f32 %v3052_v50, %v3050_v49  ;;  %v3616_v49 = vpack.c.bf16 %v1166_v45, %v1162_v41  ;;  %v3680_v41 = vpack.c.bf16 %v1426_v32, %v1422_v27  ;;  %v3682_v45 = vpack.c.bf16 %v1423_v33, %v1419_v18  ;;  %v1445_v27 = vld [vmem:[#allocation5 + $0x1d0] sm:$0xff] }
 0x261   :  { %v1449_v32 = vld [vmem:[#allocation5 + $0x1f0] sm:$0xff]  ;;  %v3717_v18 = vpack.c.bf16 %v1447_v24, %v1443_v39 }
 0x262   :  { %2401 = vst [vmem:[%s3876_s6 + $0x8] sm:$0xff] %v891_v52  ;;  %1030 = vmatmul.mubr.f32.vlgmr.msra.gmra.mrb[4].mxu0 %v891_v52  ;;  %1101 = vmatmul.mubr.f32.vlgmr.msra.gmra.mrb[4].mxu1 %v891_v52  ;;  %v3721_v33 = vpack.c.bf16 %v1449_v32, %v1445_v27 }
 0x263   :  { %1272 = vmatprep.mubr.f32.mxu0 %v3224_v0  ;;  %1343 = vmatprep.mubr.f32.mxu1 %v3224_v0 }
 0x264   :  { %2633 = vmatpush1.bf16.msra.mxu0 %v3589_v10  ;;  %2665 = vmatpush1.bf16.msra.mxu1 %v3592_v14 }
 0x265   :  { %2635 = vmatprep.subr.bf16.mxu0 %v3597_v30  ;;  %2667 = vmatprep.subr.bf16.mxu1 %v3599_v43 }
 0x268   :  { %2637 = vmatpush1.bf16.msra.mxu0 %v3601_v48  ;;  %2669 = vmatpush1.bf16.msra.mxu1 %v3604_v21 }
 0x269   :  { %2639 = vmatprep.subr.bf16.mxu0 %v3609_v31  ;;  %2671 = vmatprep.subr.bf16.mxu1 %v3611_v37 }
 0x26c   :  { %2641 = vmatpush1.bf16.msra.mxu0 %v3613_v38  ;;  %2673 = vmatpush1.bf16.msra.mxu1 %v3616_v49 }
 0x26d   :  { %2643 = vmatprep.subr.bf16.mxu0 %v3378_v59  ;;  %2675 = vmatprep.subr.bf16.mxu1 %v3382_v62 }
 0x270   :  { %2645 = vmatpush1.bf16.msra.mxu0 %v3389_v3  ;;  %2677 = vmatpush1.bf16.msra.mxu1 %v3393_v6 }
 0x271   :  { %2647 = vmatprep.subr.bf16.mxu0 %v3397_v9  ;;  %2679 = vmatprep.subr.bf16.mxu1 %v3401_v12 }
 0x274   :  { %2649 = vmatpush1.bf16.msra.mxu0 %v3408_v16  ;;  %2681 = vmatpush1.bf16.msra.mxu1 %v3412_v20 }
 0x275   :  { %2651 = vmatprep.subr.bf16.mxu0 %v3416_v25  ;;  %2683 = vmatprep.subr.bf16.mxu1 %v3420_v29 }
 0x278   :  { %2653 = vmatpush1.bf16.msra.mxu0 %v3427_v34  ;;  %2685 = vmatpush1.bf16.msra.mxu1 %v3431_v40 }
 0x279   :  { %2655 = vmatprep.subr.bf16.mxu0 %v3435_v44  ;;  %2687 = vmatprep.subr.bf16.mxu1 %v3439_v47 }
 0x27c   :  { %2657 = vmatpush1.bf16.msra.mxu0 %v3446_v53  ;;  %2689 = vmatpush1.bf16.msra.mxu1 %v3450_v57 }
 0x27d   :  { %2659 = vmatprep.subr.bf16.mxu0 %v3454_v61  ;;  %2691 = vmatprep.subr.bf16.mxu1 %v3458_v2 }
 0x280   :  { %2661 = vmatpush1.bf16.msra.mxu0 %v3465_v5  ;;  %2693 = vmatpush1.bf16.msra.mxu1 %v3469_v7 }
 0x281   :  { %2695 = vmatprep.subr.bf16.mxu0 %v3585_v60  ;;  %2727 = vmatprep.subr.bf16.mxu1 %v3587_v8 }
 0x335   :  { %v1031_v59 = vpop.f32.mrb[4].mxu0  ;;  %v1102_v62 = vpop.f32.mrb[4].mxu1 }
 0x336   :  { %v2954_v3 = vadd.f32 %v1031_v59, %v3519_v17  ;;  %v1033_v6 = vpop.f32.mrb[5].mxu0  ;;  %v1104_v9 = vpop.f32.mrb[5].mxu1  ;;  %v2970_v25 = vadd.f32 %v1102_v62, %v3525_v22  ;;  %v1421_v59 = vld [vmem:[#allocation5 + $0x110] sm:$0xff] }
 0x337   :  { %v2955_v12 = vadd.f32 %v1033_v6, %v3521_v19  ;;  %v2971_v29 = vadd.f32 %v1104_v9, %v3528_v42  ;;  %v1425_v62 = vld [vmem:[#allocation5 + $0x130] sm:$0xff]  ;;  %v1428_v6 = vld [vmem:[#allocation5 + $0x148] sm:$0xff] }
 0x338   :  { %v2402_v16 = vmul.f32 -1.442695, %v2954_v3  ;;  %v2404_v34 = vmul.f32 -1.442695, %v2970_v25  ;;  %v3685_v3 = vpack.c.bf16 %v1425_v62, %v1421_v59  ;;  %v1432_v9 = vld [vmem:[#allocation5 + $0x168] sm:$0xff]  ;;  %v1427_v25 = vld [vmem:[#allocation5 + $0x140] sm:$0xff] }
 0x339   :  { %v2403_v20 = vmul.f32 -1.442695, %v2955_v12  ;;  %v1430_v12 = vld [vmem:[#allocation5 + $0x158] sm:$0xff] }
 0x33a   :  { %3053 = vpow2.f32 %v2402_v16  ;;  %v3690_v16 = vpack.c.bf16 %v1432_v9, %v1428_v6 }
 0x33b   :  { %3055 = vpow2.f32 %v2403_v20  ;;  %v1434_v20 = vld [vmem:[#allocation5 + $0x178] sm:$0xff] }
 0x33c   :  { %3057 = vtanh.f32 %v2971_v29  ;;  %v1431_v29 = vld [vmem:[#allocation5 + $0x160] sm:$0xff] }
 0x33d   :  { %3059 = vpow2.f32 %v2404_v34  ;;  %v3692_v34 = vpack.c.bf16 %v1434_v20, %v1430_v12 }
 0x344   :  { %v3054_v40 = vpop.eup %3053 }
 0x345   :  { %v1120_v44 = vadd.f32 1.0, %v3054_v40  ;;  %v3056_v47 = vpop.eup %3055  ;;  %v3694_v40 = vpack.c.bf16 %v1431_v29, %v1427_v25 }
 0x346   :  { %v1121_v53 = vadd.f32 1.0, %v3056_v47  ;;  %v3058_v57 = vpop.eup %3057  ;;  %v1433_v47 = vld [vmem:[#allocation5 + $0x170] sm:$0xff] }
 0x347   :  { %3061 = vrcp.f32 %v1120_v44  ;;  %v3060_v61 = vpop.eup %3059  ;;  %v1429_v44 = vld [vmem:[#allocation5 + $0x150] sm:$0xff] }
 0x348   :  { %3063 = vrcp.f32 %v1121_v53  ;;  %v1122_v50 = vadd.f32 1.0, %v3060_v61  ;;  %v1436_v53 = vld [vmem:[#allocation5 + $0x188] sm:$0xff] }
 0x349   :  { %v1440_v61 = vld [vmem:[#allocation5 + $0x1a8] sm:$0xff] }
 0x34a   :  { %3065 = vrcp.f32 %v1122_v50 }
 0x351   :  { %v3062_v2 = vpop.eup %3061 }
 0x352   :  { %v1131_v5 = vmul.f32 %v3062_v2, %v3058_v57  ;;  %v3064_v7 = vpop.eup %3063  ;;  %v3697_v57 = vpack.c.bf16 %v1433_v47, %v1429_v44  ;;  %v1438_v2 = vld [vmem:[#allocation5 + $0x198] sm:$0xff] }
 0x353   :  { %v1130_v52 = vmul.f32 %v3064_v7, %v3577_v46  ;;  %v1412_v46 = vld [vmem:[#allocation5 + $0xc8] sm:$0xff]  ;;  %v3701_v7 = vpack.c.bf16 %v1440_v61, %v1436_v53 }
 0x354   :  { %v3066_v56 = vpop.eup %3065  ;;  %v3666_v11 = vpack.c.bf16 %v1416_v1, %v1412_v46  ;;  %v1441_v46 = vld [vmem:[#allocation5 + $0x1b0] sm:$0xff]  ;;  %v1444_v1 = vld [vmem:[#allocation5 + $0x1c8] sm:$0xff] }
 0x355   :  { %v3648_v54 = vadd.f32 %v1131_v5, %v1130_v52  ;;  %v1442_v5 = vld [vmem:[#allocation5 + $0x1b8] sm:$0xff]  ;;  %v1435_v52 = vld [vmem:[#allocation5 + $0x180] sm:$0xff]  ;;  %v3712_v15 = vpack.c.bf16 %v1448_v4, %v1444_v1 }
 0x356   :  { %v3703_v50 = vpack.c.bf16 %v1442_v5, %v1438_v2 }
 0x357   :  { %3067 = vtanh.f32 %v3648_v54 }
 0x361   :  { %v3068_v58 = vpop.eup %3067 }
 0x362   :  { %v1134_v63 = vmul.f32 %v3068_v58, %v3066_v56  ;;  %v1439_v56 = vld [vmem:[#allocation5 + $0x1a0] sm:$0xff]  ;;  %v1437_v58 = vld [vmem:[#allocation5 + $0x190] sm:$0xff] }
 0x363   :  { %v3710_v13 = vpack.c.bf16 %v1441_v46, %v1437_v58 }
 0x364   :  { %2405 = vst [vmem:[%s3876_s6 + $0x10] sm:$0xff] %v1134_v63  ;;  %1273 = vmatmul.mubr.f32.vlgmr.msra.gmra.mrb[6].mxu0 %v1134_v63  ;;  %1344 = vmatmul.mubr.f32.vlgmr.msra.gmra.mrb[6].mxu1 %v1134_v63  ;;  %v3706_v63 = vpack.c.bf16 %v1439_v56, %v1435_v52 }
 0x365   :  { %2697 = vmatpush1.bf16.msra.mxu0 %v3589_v10  ;;  %2729 = vmatpush1.bf16.msra.mxu1 %v3592_v14 }
 0x366   :  { %2699 = vmatprep.subr.bf16.mxu0 %v3597_v30  ;;  %2731 = vmatprep.subr.bf16.mxu1 %v3599_v43 }
 0x367   :  { %1515 = vmatprep.mubr.f32.mxu0 %v3224_v0  ;;  %1586 = vmatprep.mubr.f32.mxu1 %v3224_v0 }
 0x369   :  { %2701 = vmatpush1.bf16.msra.mxu0 %v3601_v48  ;;  %2733 = vmatpush1.bf16.msra.mxu1 %v3604_v21 }
 0x36a   :  { %2703 = vmatprep.subr.bf16.mxu0 %v3609_v31  ;;  %2735 = vmatprep.subr.bf16.mxu1 %v3611_v37 }
 0x36d   :  { %2705 = vmatpush1.bf16.msra.mxu0 %v3613_v38  ;;  %2737 = vmatpush1.bf16.msra.mxu1 %v3616_v49 }
 0x36e   :  { %2707 = vmatprep.subr.bf16.mxu0 %v3666_v11  ;;  %2739 = vmatprep.subr.bf16.mxu1 %v3668_v26 }
 0x371   :  { %2709 = vmatpush1.bf16.msra.mxu0 %v3670_v35  ;;  %2741 = vmatpush1.bf16.msra.mxu1 %v3673_v51 }
 0x372   :  { %2711 = vmatprep.subr.bf16.mxu0 %v3678_v28  ;;  %2743 = vmatprep.subr.bf16.mxu1 %v3680_v41 }
 0x375   :  { %2713 = vmatpush1.bf16.msra.mxu0 %v3682_v45  ;;  %2745 = vmatpush1.bf16.msra.mxu1 %v3685_v3 }
 0x376   :  { %2715 = vmatprep.subr.bf16.mxu0 %v3690_v16  ;;  %2747 = vmatprep.subr.bf16.mxu1 %v3692_v34 }
 0x379   :  { %2717 = vmatpush1.bf16.msra.mxu0 %v3694_v40  ;;  %2749 = vmatpush1.bf16.msra.mxu1 %v3697_v57 }
 0x37a   :  { %2719 = vmatprep.subr.bf16.mxu0 %v3701_v7  ;;  %2751 = vmatprep.subr.bf16.mxu1 %v3703_v50 }
 0x37d   :  { %2721 = vmatpush1.bf16.msra.mxu0 %v3706_v63  ;;  %2753 = vmatpush1.bf16.msra.mxu1 %v3710_v13 }
 0x37e   :  { %2723 = vmatprep.subr.bf16.mxu0 %v3712_v15  ;;  %2755 = vmatprep.subr.bf16.mxu1 %v3714_v55 }
 0x381   :  { %2725 = vmatpush1.bf16.msra.mxu0 %v3717_v18  ;;  %2757 = vmatpush1.bf16.msra.mxu1 %v3721_v33 }
 0x382   :  { %2759 = vmatprep.subr.bf16.mxu0 %v3585_v60  ;;  %2791 = vmatprep.subr.bf16.mxu1 %v3587_v8 }
 0x437   :  { %v1274_v59 = vpop.f32.mrb[6].mxu0  ;;  %v1345_v62 = vpop.f32.mrb[6].mxu1 }
 0x438   :  { %v2956_v6 = vadd.f32 %v1274_v59, %v3519_v17  ;;  %v1276_v9 = vpop.f32.mrb[7].mxu0  ;;  %v1347_v12 = vpop.f32.mrb[7].mxu1  ;;  %v2972_v44 = vadd.f32 %v1345_v62, %v3525_v22 }
 0x439   :  { %v2957_v20 = vadd.f32 %v1276_v9, %v3521_v19  ;;  %v2973_v47 = vadd.f32 %v1347_v12, %v3528_v42 }
 0x43a   :  { %v2406_v25 = vmul.f32 -1.442695, %v2956_v6  ;;  %v2408_v53 = vmul.f32 -1.442695, %v2972_v44 }
 0x43b   :  { %v2407_v29 = vmul.f32 -1.442695, %v2957_v20 }
 0x43c   :  { %3069 = vpow2.f32 %v2406_v25 }
 0x43d   :  { %3071 = vpow2.f32 %v2407_v29 }
 0x43e   :  { %3073 = vtanh.f32 %v2973_v47 }
 0x43f   :  { %3075 = vpow2.f32 %v2408_v53 }
 0x446   :  { %v3070_v61 = vpop.eup %3069 }
 0x447   :  { %v1363_v2 = vadd.f32 1.0, %v3070_v61  ;;  %v3072_v5 = vpop.eup %3071 }
 0x448   :  { %v1364_v52 = vadd.f32 1.0, %v3072_v5  ;;  %v3074_v56 = vpop.eup %3073 }
 0x449   :  { %3077 = vrcp.f32 %v1363_v2  ;;  %v3076_v58 = vpop.eup %3075 }
 0x44a   :  { %3079 = vrcp.f32 %v1364_v52  ;;  %v1365_v23 = vadd.f32 1.0, %v3076_v58 }
 0x44c   :  { %3081 = vrcp.f32 %v1365_v23 }
 0x453   :  { %v3078_v46 = vpop.eup %3077 }
 0x454   :  { %v1374_v1 = vmul.f32 %v3078_v46, %v3074_v56  ;;  %v3080_v4 = vpop.eup %3079 }
 0x455   :  { %v1373_v36 = vmul.f32 %v3080_v4, %v3648_v54 }
 0x456   :  { %v3082_v24 = vpop.eup %3081 }
 0x457   :  { %v3733_v39 = vadd.f32 %v1374_v1, %v1373_v36 }
 0x459   :  { %3083 = vtanh.f32 %v3733_v39 }
 0x463   :  { %v3084_v27 = vpop.eup %3083 }
 0x464   :  { %v1377_v32 = vmul.f32 %v3084_v27, %v3082_v24 }
 0x466   :  { %2409 = vst [vmem:[%s3876_s6 + $0x18] sm:$0xff] %v1377_v32  ;;  %1516 = vmatmul.mubr.f32.vlgmr.msra.gmra.mrb[8].mxu0 %v1377_v32  ;;  %1587 = vmatmul.mubr.f32.vlgmr.msra.gmra.mrb[8].mxu1 %v1377_v32 }
 0x467   :  { %2761 = vmatpush1.bf16.msra.mxu0 %v3589_v10  ;;  %2793 = vmatpush1.bf16.msra.mxu1 %v3592_v14 }
 0x468   :  { %2763 = vmatprep.subr.bf16.mxu0 %v3597_v30  ;;  %2795 = vmatprep.subr.bf16.mxu1 %v3599_v43 }
 0x469   :  { %1758 = vmatprep.mubr.f32.mxu0 %v3224_v0  ;;  %1829 = vmatprep.mubr.f32.mxu1 %v3224_v0 }
 0x46b   :  { %2765 = vmatpush1.bf16.msra.mxu0 %v3601_v48  ;;  %2797 = vmatpush1.bf16.msra.mxu1 %v3604_v21 }
 0x46c   :  { %2767 = vmatprep.subr.bf16.mxu0 %v3609_v31  ;;  %2799 = vmatprep.subr.bf16.mxu1 %v3611_v37 }
 0x46f   :  { %2769 = vmatpush1.bf16.msra.mxu0 %v3613_v38  ;;  %2801 = vmatpush1.bf16.msra.mxu1 %v3616_v49 }
 0x470   :  { %2771 = vmatprep.subr.bf16.mxu0 %v3666_v11  ;;  %2803 = vmatprep.subr.bf16.mxu1 %v3668_v26 }
 0x473   :  { %2773 = vmatpush1.bf16.msra.mxu0 %v3670_v35  ;;  %2805 = vmatpush1.bf16.msra.mxu1 %v3673_v51 }
 0x474   :  { %2775 = vmatprep.subr.bf16.mxu0 %v3678_v28  ;;  %2807 = vmatprep.subr.bf16.mxu1 %v3680_v41 }
 0x477   :  { %2777 = vmatpush1.bf16.msra.mxu0 %v3682_v45  ;;  %2809 = vmatpush1.bf16.msra.mxu1 %v3685_v3 }
 0x478   :  { %2779 = vmatprep.subr.bf16.mxu0 %v3690_v16  ;;  %2811 = vmatprep.subr.bf16.mxu1 %v3692_v34 }
 0x47b   :  { %2781 = vmatpush1.bf16.msra.mxu0 %v3694_v40  ;;  %2813 = vmatpush1.bf16.msra.mxu1 %v3697_v57 }
 0x47c   :  { %2783 = vmatprep.subr.bf16.mxu0 %v3701_v7  ;;  %2815 = vmatprep.subr.bf16.mxu1 %v3703_v50 }
 0x47f   :  { %2785 = vmatpush1.bf16.msra.mxu0 %v3706_v63  ;;  %2817 = vmatpush1.bf16.msra.mxu1 %v3710_v13 }
 0x480   :  { %2787 = vmatprep.subr.bf16.mxu0 %v3712_v15  ;;  %2819 = vmatprep.subr.bf16.mxu1 %v3714_v55 }
 0x483   :  { %2789 = vmatpush1.bf16.msra.mxu0 %v3717_v18  ;;  %2821 = vmatpush1.bf16.msra.mxu1 %v3721_v33 }
 0x484   :  { %2823 = vmatprep.subr.bf16.mxu0 %v3585_v60  ;;  %2855 = vmatprep.subr.bf16.mxu1 %v3587_v8 }
 0x539   :  { %v1517_v54 = vpop.f32.mrb[8].mxu0  ;;  %v1588_v59 = vpop.f32.mrb[8].mxu1 }
 0x53a   :  { %v2958_v62 = vadd.f32 %v1517_v54, %v3519_v17  ;;  %v1519_v6 = vpop.f32.mrb[9].mxu0  ;;  %v1590_v9 = vpop.f32.mrb[9].mxu1  ;;  %v2974_v29 = vadd.f32 %v1588_v59, %v3525_v22 }
 0x53b   :  { %v2959_v12 = vadd.f32 %v1519_v6, %v3521_v19  ;;  %v2975_v44 = vadd.f32 %v1590_v9, %v3528_v42 }
 0x53c   :  { %v2410_v20 = vmul.f32 -1.442695, %v2958_v62  ;;  %v2412_v47 = vmul.f32 -1.442695, %v2974_v29 }
 0x53d   :  { %v2411_v25 = vmul.f32 -1.442695, %v2959_v12 }
 0x53e   :  { %3085 = vpow2.f32 %v2410_v20 }
 0x53f   :  { %3087 = vpow2.f32 %v2411_v25 }
 0x540   :  { %3089 = vtanh.f32 %v2975_v44 }
 0x541   :  { %3091 = vpow2.f32 %v2412_v47 }
 0x548   :  { %v3086_v60 = vpop.eup %3085 }
 0x549   :  { %v1606_v53 = vadd.f32 1.0, %v3086_v60  ;;  %v3088_v8 = vpop.eup %3087 }
 0x54a   :  { %v1607_v61 = vadd.f32 1.0, %v3088_v8  ;;  %v3090_v2 = vpop.eup %3089  ;;  %v2117_v8 = vld [vmem:[#allocation5 + $0x8] sm:$0xff] }
 0x54b   :  { %3093 = vrcp.f32 %v1606_v53  ;;  %v3092_v5 = vpop.eup %3091 }
 0x54c   :  { %3095 = vrcp.f32 %v1607_v61  ;;  %v1608_v46 = vadd.f32 1.0, %v3092_v5  ;;  %v2121_v61 = vld [vmem:[#allocation5 + $0x28] sm:$0xff] }
 0x54d   :  { %v2886_v5 = vpack.c.bf16 %v2121_v61, %v2117_v8 }
 0x54e   :  { %3097 = vrcp.f32 %v1608_v46 }
 0x555   :  { %v3094_v52 = vpop.eup %3093 }
 0x556   :  { %v1617_v56 = vmul.f32 %v3094_v52, %v3090_v2  ;;  %v3096_v58 = vpop.eup %3095  ;;  %v2119_v2 = vld [vmem:[#allocation5 + $0x18] sm:$0xff] }
 0x557   :  { %v1616_v1 = vmul.f32 %v3096_v58, %v3733_v39  ;;  %v2123_v52 = vld [vmem:[#allocation5 + $0x38] sm:$0xff]  ;;  %v2120_v58 = vld [vmem:[#allocation5 + $0x20] sm:$0xff] }
 0x558   :  { %v3098_v23 = vpop.eup %3097  ;;  %v2918_v46 = vpack.c.bf16 %v2123_v52, %v2119_v2 }
 0x559   :  { %v3778_v4 = vadd.f32 %v1617_v56, %v1616_v1  ;;  %v2116_v56 = vld [vmem:[#allocation5] sm:$0xff] }
 0x55a   :  { %v2888_v1 = vpack.c.bf16 %v2120_v58, %v2116_v56 }
 0x55b   :  { %3099 = vtanh.f32 %v3778_v4 }
 0x565   :  { %v3100_v36 = vpop.eup %3099 }
 0x566   :  { %v1620_v24 = vmul.f32 %v3100_v36, %v3098_v23  ;;  %v2122_v23 = vld [vmem:[#allocation5 + $0x30] sm:$0xff] }
 0x568   :  { %2413 = vst [vmem:[%s3876_s6 + $0x20] sm:$0xff] %v1620_v24  ;;  %1759 = vmatmul.mubr.f32.vlgmr.msra.gmra.mrb[10].mxu0 %v1620_v24  ;;  %1830 = vmatmul.mubr.f32.vlgmr.msra.gmra.mrb[10].mxu1 %v1620_v24  ;;  %v2125_v24 = vld [vmem:[#allocation5 + $0x48] sm:$0xff] }
 0x569   :  { %2825 = vmatpush1.bf16.msra.mxu0 %v3589_v10  ;;  %2857 = vmatpush1.bf16.msra.mxu1 %v3592_v14 }
 0x56a   :  { %2827 = vmatprep.subr.bf16.mxu0 %v3597_v30  ;;  %2859 = vmatprep.subr.bf16.mxu1 %v3599_v43 }
 0x56b   :  { %2001 = vmatprep.mubr.f32.mxu0 %v3224_v0  ;;  %2072 = vmatprep.mubr.f32.mxu1 %v3224_v0 }
 0x56d   :  { %2829 = vmatpush1.bf16.msra.mxu0 %v3601_v48  ;;  %2861 = vmatpush1.bf16.msra.mxu1 %v3604_v21 }
 0x56e   :  { %2831 = vmatprep.subr.bf16.mxu0 %v3609_v31  ;;  %2863 = vmatprep.subr.bf16.mxu1 %v3611_v37 }
 0x571   :  { %2833 = vmatpush1.bf16.msra.mxu0 %v3613_v38  ;;  %2865 = vmatpush1.bf16.msra.mxu1 %v3616_v49 }
 0x572   :  { %2835 = vmatprep.subr.bf16.mxu0 %v3666_v11  ;;  %2867 = vmatprep.subr.bf16.mxu1 %v3668_v26 }
 0x575   :  { %2837 = vmatpush1.bf16.msra.mxu0 %v3670_v35  ;;  %2869 = vmatpush1.bf16.msra.mxu1 %v3673_v51 }
 0x576   :  { %2839 = vmatprep.subr.bf16.mxu0 %v3678_v28  ;;  %2871 = vmatprep.subr.bf16.mxu1 %v3680_v41 }
 0x579   :  { %2841 = vmatpush1.bf16.msra.mxu0 %v3682_v45  ;;  %2873 = vmatpush1.bf16.msra.mxu1 %v3685_v3 }
 0x57a   :  { %2843 = vmatprep.subr.bf16.mxu0 %v3690_v16  ;;  %2875 = vmatprep.subr.bf16.mxu1 %v3692_v34 }
 0x57d   :  { %2845 = vmatpush1.bf16.msra.mxu0 %v3694_v40  ;;  %2877 = vmatpush1.bf16.msra.mxu1 %v3697_v57 }
 0x57e   :  { %2847 = vmatprep.subr.bf16.mxu0 %v3701_v7  ;;  %2879 = vmatprep.subr.bf16.mxu1 %v3703_v50 }
 0x581   :  { %2849 = vmatpush1.bf16.msra.mxu0 %v3706_v63  ;;  %2881 = vmatpush1.bf16.msra.mxu1 %v3710_v13 }
 0x582   :  { %2851 = vmatprep.subr.bf16.mxu0 %v3712_v15  ;;  %2883 = vmatprep.subr.bf16.mxu1 %v3714_v55 }
 0x585   :  { %2853 = vmatpush1.bf16.msra.mxu0 %v3717_v18  ;;  %2885 = vmatpush1.bf16.msra.mxu1 %v3721_v33 }
 0x586   :  { %2887 = vmatprep.subr.bf16.mxu0 %v2886_v5  ;;  %2919 = vmatprep.subr.bf16.mxu1 %v2918_v46 }
 0x63b   :  { %v1760_v10 = vpop.f32.mrb[10].mxu0  ;;  %v1831_v14 = vpop.f32.mrb[10].mxu1 }
 0x63c   :  { %v2960_v30 = vadd.f32 %v1760_v10, %v3519_v17  ;;  %v1762_v43 = vpop.f32.mrb[11].mxu0  ;;  %v1833_v48 = vpop.f32.mrb[11].mxu1  ;;  %v2976_v38 = vadd.f32 %v1831_v14, %v3525_v22  ;;  %v2129_v10 = vld [vmem:[#allocation5 + $0x68] sm:$0xff]  ;;  %v2127_v14 = vld [vmem:[#allocation5 + $0x58] sm:$0xff] }
 0x63d   :  { %v2961_v21 = vadd.f32 %v1762_v43, %v3521_v19  ;;  %v2977_v49 = vadd.f32 %v1833_v48, %v3528_v42  ;;  %v2124_v43 = vld [vmem:[#allocation5 + $0x40] sm:$0xff] }
 0x63e   :  { %v2414_v31 = vmul.f32 -1.442695, %v2960_v30  ;;  %v2416_v39 = vmul.f32 -1.442695, %v2976_v38  ;;  %v2131_v30 = vld [vmem:[#allocation5 + $0x78] sm:$0xff]  ;;  %v2128_v48 = vld [vmem:[#allocation5 + $0x60] sm:$0xff] }
 0x63f   :  { %v2415_v37 = vmul.f32 -1.442695, %v2961_v21  ;;  %v2922_v21 = vpack.c.bf16 %v2131_v30, %v2127_v14  ;;  %v2130_v38 = vld [vmem:[#allocation5 + $0x70] sm:$0xff] }
 0x640   :  { %3101 = vpow2.f32 %v2414_v31  ;;  %v2892_v31 = vpack.c.bf16 %v2128_v48, %v2124_v43 }
 0x641   :  { %3103 = vpow2.f32 %v2415_v37  ;;  %v2126_v37 = vld [vmem:[#allocation5 + $0x50] sm:$0xff] }
 0x642   :  { %3105 = vtanh.f32 %v2977_v49  ;;  %v2924_v49 = vpack.c.bf16 %v2130_v38, %v2126_v37 }
 0x643   :  { %3107 = vpow2.f32 %v2416_v39  ;;  %v2133_v39 = vld [vmem:[#allocation5 + $0x88] sm:$0xff] }
 0x64a   :  { %v3102_v27 = vpop.eup %3101 }
 0x64b   :  { %v1849_v32 = vadd.f32 1.0, %v3102_v27  ;;  %v3104_v54 = vpop.eup %3103  ;;  %v2137_v27 = vld [vmem:[#allocation5 + $0xa8] sm:$0xff] }
 0x64c   :  { %v1850_v59 = vadd.f32 1.0, %v3104_v54  ;;  %v3106_v62 = vpop.eup %3105  ;;  %v2894_v54 = vpack.c.bf16 %v2137_v27, %v2133_v39 }
 0x64d   :  { %3109 = vrcp.f32 %v1849_v32  ;;  %v3108_v6 = vpop.eup %3107  ;;  %v2135_v32 = vld [vmem:[#allocation5 + $0x98] sm:$0xff] }
 0x64e   :  { %3111 = vrcp.f32 %v1850_v59  ;;  %v1851_v25 = vadd.f32 1.0, %v3108_v6  ;;  %v2139_v59 = vld [vmem:[#allocation5 + $0xb8] sm:$0xff]  ;;  %v2136_v6 = vld [vmem:[#allocation5 + $0xa0] sm:$0xff] }
 0x650   :  { %3113 = vrcp.f32 %v1851_v25  ;;  %v2138_v25 = vld [vmem:[#allocation5 + $0xb0] sm:$0xff] }
 0x657   :  { %v3110_v9 = vpop.eup %3109 }
 0x658   :  { %v1860_v12 = vmul.f32 %v3110_v9, %v3106_v62  ;;  %v3112_v20 = vpop.eup %3111  ;;  %v2132_v62 = vld [vmem:[#allocation5 + $0x80] sm:$0xff]  ;;  %v2926_v9 = vpack.c.bf16 %v2139_v59, %v2135_v32 }
 0x659   :  { %v1859_v29 = vmul.f32 %v3112_v20, %v3778_v4  ;;  %v2118_v4 = vld [vmem:[#allocation5 + $0x10] sm:$0xff] }
 0x65a   :  { %v3114_v47 = vpop.eup %3113  ;;  %v2920_v36 = vpack.c.bf16 %v2122_v23, %v2118_v4  ;;  %v2134_v20 = vld [vmem:[#allocation5 + $0x90] sm:$0xff] }
 0x65b   :  { %v3821_v44 = vadd.f32 %v1860_v12, %v1859_v29  ;;  %v2896_v12 = vpack.c.bf16 %v2136_v6, %v2132_v62  ;;  %v2928_v29 = vpack.c.bf16 %v2138_v25, %v2134_v20 }
 0x65d   :  { %3115 = vtanh.f32 %v3821_v44 }
 0x667   :  { %v3116_v60 = vpop.eup %3115 }
 0x668   :  { %v1863_v53 = vmul.f32 %v3116_v60, %v3114_v47 }
 0x66a   :  { %2417 = vst [vmem:[%s3876_s6 + $0x28] sm:$0xff] %v1863_v53  ;;  %2002 = vmatmul.mubr.f32.vlgmr.msra.gmra.mrb[12].mxu0 %v1863_v53  ;;  %2073 = vmatmul.mubr.f32.vlgmr.msra.gmra.mrb[12].mxu1 %v1863_v53 }
 0x66b   :  { %2244 = vmatprep.mubr.f32.mxu0 %v3224_v0  ;;  %2315 = vmatprep.mubr.f32.mxu1 %v3224_v0  ;;  %v2890_v0 = vpack.c.bf16 %v2129_v10, %v2125_v24 }
 0x66c   :  { %2889 = vmatpush1.bf16.msra.mxu0 %v2888_v1  ;;  %2921 = vmatpush1.bf16.msra.mxu1 %v2920_v36 }
 0x66d   :  { %2891 = vmatprep.subr.bf16.mxu0 %v2890_v0  ;;  %2923 = vmatprep.subr.bf16.mxu1 %v2922_v21 }
 0x670   :  { %2893 = vmatpush1.bf16.msra.mxu0 %v2892_v31  ;;  %2925 = vmatpush1.bf16.msra.mxu1 %v2924_v49 }
 0x671   :  { %2895 = vmatprep.subr.bf16.mxu0 %v2894_v54  ;;  %2927 = vmatprep.subr.bf16.mxu1 %v2926_v9 }
 0x674   :  { %2897 = vmatpush1.bf16.msra.mxu0 %v2896_v12  ;;  %2929 = vmatpush1.bf16.msra.mxu1 %v2928_v29 }
 0x675   :  { %2899 = vmatprep.subr.bf16.mxu0 %v3666_v11  ;;  %2931 = vmatprep.subr.bf16.mxu1 %v3668_v26 }
 0x678   :  { %2901 = vmatpush1.bf16.msra.mxu0 %v3670_v35  ;;  %2933 = vmatpush1.bf16.msra.mxu1 %v3673_v51 }
 0x679   :  { %2903 = vmatprep.subr.bf16.mxu0 %v3678_v28  ;;  %2935 = vmatprep.subr.bf16.mxu1 %v3680_v41 }
 0x67c   :  { %2905 = vmatpush1.bf16.msra.mxu0 %v3682_v45  ;;  %2937 = vmatpush1.bf16.msra.mxu1 %v3685_v3 }
 0x67d   :  { %2907 = vmatprep.subr.bf16.mxu0 %v3690_v16  ;;  %2939 = vmatprep.subr.bf16.mxu1 %v3692_v34 }
 0x680   :  { %2909 = vmatpush1.bf16.msra.mxu0 %v3694_v40  ;;  %2941 = vmatpush1.bf16.msra.mxu1 %v3697_v57 }
 0x681   :  { %2911 = vmatprep.subr.bf16.mxu0 %v3701_v7  ;;  %2943 = vmatprep.subr.bf16.mxu1 %v3703_v50 }
 0x684   :  { %2913 = vmatpush1.bf16.msra.mxu0 %v3706_v63  ;;  %2945 = vmatpush1.bf16.msra.mxu1 %v3710_v13 }
 0x685   :  { %2915 = vmatprep.subr.bf16.mxu0 %v3712_v15  ;;  %2947 = vmatprep.subr.bf16.mxu1 %v3714_v55 }
 0x688   :  { %2917 = vmatpush1.bf16.msra.mxu0 %v3717_v18  ;;  %2949 = vmatpush1.bf16.msra.mxu1 %v3721_v33 }
 0x73d   :  { %v2003_v11 = vpop.f32.mrb[12].mxu0  ;;  %v2074_v26 = vpop.f32.mrb[12].mxu1 }
 0x73e   :  { %v2962_v35 = vadd.f32 %v2003_v11, %v3519_v17  ;;  %v2005_v51 = vpop.f32.mrb[13].mxu0  ;;  %v2076_v28 = vpop.f32.mrb[13].mxu1  ;;  %v2978_v16 = vadd.f32 %v2074_v26, %v3525_v22 }
 0x73f   :  { %v2963_v41 = vadd.f32 %v2005_v51, %v3521_v19  ;;  %v2979_v34 = vadd.f32 %v2076_v28, %v3528_v42 }
 0x740   :  { %v2418_v45 = vmul.f32 -1.442695, %v2962_v35  ;;  %v2420_v40 = vmul.f32 -1.442695, %v2978_v16 }
 0x741   :  { %v2419_v3 = vmul.f32 -1.442695, %v2963_v41 }
 0x742   :  { %3117 = vpow2.f32 %v2418_v45 }
 0x743   :  { %3119 = vpow2.f32 %v2419_v3 }
 0x744   :  { %3121 = vtanh.f32 %v2979_v34 }
 0x745   :  { %3123 = vpow2.f32 %v2420_v40 }
 0x74c   :  { %v3118_v57 = vpop.eup %3117 }
 0x74d   :  { %v2092_v7 = vadd.f32 1.0, %v3118_v57  ;;  %v3120_v50 = vpop.eup %3119 }
 0x74e   :  { %v2093_v63 = vadd.f32 1.0, %v3120_v50  ;;  %v3122_v13 = vpop.eup %3121 }
 0x74f   :  { %3125 = vrcp.f32 %v2092_v7  ;;  %v3124_v15 = vpop.eup %3123 }
 0x750   :  { %3127 = vrcp.f32 %v2093_v63  ;;  %v2094_v47 = vadd.f32 1.0, %v3124_v15 }
 0x752   :  { %3129 = vrcp.f32 %v2094_v47 }
 0x759   :  { %v3126_v55 = vpop.eup %3125 }
 0x75a   :  { %v2103_v18 = vmul.f32 %v3126_v55, %v3122_v13  ;;  %v3128_v33 = vpop.eup %3127 }
 0x75b   :  { %v2102_v60 = vmul.f32 %v3128_v33, %v3821_v44 }
 0x75c   :  { %v3130_v8 = vpop.eup %3129 }
 0x75d   :  { %v2104_v53 = vadd.f32 %v2103_v18, %v2102_v60 }
 0x75f   :  { %3131 = vtanh.f32 %v2104_v53 }
 0x769   :  { %v3132_v61 = vpop.eup %3131 }
 0x76a   :  { %v2106_v2 = vmul.f32 %v3132_v61, %v3130_v8 }
 0x76c   :  { %2421 = vst [vmem:[%s3876_s6 + $0x30] sm:$0xff] %v2106_v2  ;;  %2245 = vmatmul.mubr.f32.vlgmr.msra.gmra.mrb[14].mxu0 %v2106_v2  ;;  %2316 = vmatmul.mubr.f32.vlgmr.msra.gmra.mrb[14].mxu1 %v2106_v2 }
 0x83f   :  { %v2246_v5 = vpop.f32.mrb[14].mxu0  ;;  %v2317_v52 = vpop.f32.mrb[14].mxu1 }
 0x840   :  { %v2964_v56 = vadd.f32 %v2246_v5, %v3519_v17  ;;  %v2248_v58 = vpop.f32.mrb[15].mxu0  ;;  %v2319_v46 = vpop.f32.mrb[15].mxu1  ;;  %v2980_v23 = vadd.f32 %v2317_v52, %v3525_v22 }
 0x841   :  { %v2965_v44 = vadd.f32 %v2248_v58, %v3521_v19  ;;  %v2981_v36 = vadd.f32 %v2319_v46, %v3528_v42 }
 0x842   :  { %v2422_v1 = vmul.f32 -1.442695, %v2964_v56  ;;  %v2424_v24 = vmul.f32 -1.442695, %v2980_v23 }
 0x843   :  { %v2423_v4 = vmul.f32 -1.442695, %v2965_v44 }
 0x844   :  { %3133 = vpow2.f32 %v2422_v1 }
 0x845   :  { %3135 = vpow2.f32 %v2423_v4 }
 0x846   :  { %3137 = vtanh.f32 %v2981_v36 }
 0x847   :  { %3139 = vpow2.f32 %v2424_v24 }
 0x84e   :  { %v3134_v10 = vpop.eup %3133 }
 0x84f   :  { %v2335_v14 = vadd.f32 1.0, %v3134_v10  ;;  %v3136_v0 = vpop.eup %3135 }
 0x850   :  { %v2336_v17 = vadd.f32 1.0, %v3136_v0  ;;  %v3138_v30 = vpop.eup %3137 }
 0x851   :  { %3141 = vrcp.f32 %v2335_v14  ;;  %v3140_v43 = vpop.eup %3139 }
 0x852   :  { %3143 = vrcp.f32 %v2336_v17  ;;  %v2337_v31 = vadd.f32 1.0, %v3140_v43 }
 0x854   :  { %3145 = vrcp.f32 %v2337_v31 }
 0x85b   :  { %v3142_v19 = vpop.eup %3141 }
 0x85c   :  { %v2346_v48 = vmul.f32 %v3142_v19, %v3138_v30  ;;  %v3144_v21 = vpop.eup %3143 }
 0x85d   :  { %v2345_v37 = vmul.f32 %v3144_v21, %v2104_v53 }
 0x85e   :  { %v3146_v22 = vpop.eup %3145 }
 0x85f   :  { %v2347_v38 = vadd.f32 %v2346_v48, %v2345_v37 }
 0x861   :  { %3147 = vtanh.f32 %v2347_v38  ;;  %2353 = vst [vmem:[%s3878_s8] sm:$0xff] %v2347_v38 }
 0x86b   :  { %v3148_v42 = vpop.eup %3147 }
 0x86c   :  { %v2349_v49 = vmul.f32 %v3148_v42, %v3146_v22 }
 0x86e   :  { %2425 = vst [vmem:[%s3876_s6 + $0x38] sm:$0xff] %v2349_v49  ;;  %2352 = vst [vmem:[%s3877_s7] sm:$0xff] %v2349_v49 }
 0x86f   :  { %2366 = vsyncpa [#allocation4], 1 }
 0x870   :  { %2367 = vsyncpa [#allocation6], 1 }

// kernel: _mdnrnn_forward.3
= control target key start
LH: loop header
LB: loop body
LE: loop exit
PB: predicated region body
PF: predicated region fallthrough
CT: control target
= control target key end

     0   :  { %17 = vsyncpa [#allocation4], 0  ;;  %s3450_s17 = smov [#allocation3]   ;;  %s4447_s0 = inlined_call_operand.vmem [shape: f32[1,64,128], index: 0, kind: input, shape index: {}]   ;;  %s4448_s1 = inlined_call_operand.vmem [shape: f32[8,128], index: 1, kind: input, shape index: {}, may-alias: {1,2}]   ;;  %s4449_s2 = inlined_call_operand.vmem [shape: f32[8,128], index: 2, kind: input, shape index: {}, may-alias: {1,2}]   ;;  %s4450_s3 = inlined_call_operand.vmem [shape: f32[128,512], index: 3, kind: input, shape index: {}]   ;;  %s4451_s4 = inlined_call_operand.hbm [shape: f32[128,512], index: 4, kind: input, shape index: {}]   ;;  %s4452_s5 = inlined_call_operand.vmem [shape: f32[1,512], index: 5, kind: input, shape index: {}]   ;;  %s4453_s6 = inlined_call_operand.vmem [shape: f32[128,128], index: 6, kind: input, shape index: {}]   ;;  %s4454_s7 = inlined_call_operand.vmem [shape: f32[1,128], index: 7, kind: input, shape index: {}]   ;;  %s4455_s8 = inlined_call_operand.vmem [shape: f32[1,64,128], index: 8, kind: output, shape index: {0}]   ;;  %s4456_s9 = inlined_call_operand.vmem [shape: f32[8,128], index: 9, kind: output, shape index: {1}]   ;;  %s4457_s10 = inlined_call_operand.vmem [shape: f32[8,128], index: 10, kind: output, shape index: {2}]   ;;  %s4458_s11 = inlined_call_operand.vmem [shape: f32[1,64,128], index: 11, kind: output, shape index: {3}]  }
   0x1   :  { %s31_s18 = sshll.u32 %s3450_s17, 4  ;;  %s3426_s21 = scalar_lea.hbm %s4451_s4, 8192  ;;  %s32_s18 = int_to_ptr.vmem [resolvable:$true] %s31_s18 }
   0x2   :  { %p3427_p0 = scmp.ne.s32.totalorder %s4451_s4, %s3426_s21  ;;  %p3430_p1 = scmp.lt.u32.totalorder %s3426_s21, %s4451_s4 }
   0x4   :  { %p3432_p2 = pnand %p3430_p1, %p3427_p0 }
   0x6   :  { %3435 = shalt.err (!%p3432_p2)
}
   0x7   :  { %s3436_s26 = scalar_lea.vmem %s32_s18, 8192  ;;  %p3441_p4 = scmp.lt.s32.totalorder %s32_s18, %s32_s18 }
   0x8   :  { %p3437_p3 = scmp.ne.s32.totalorder %s32_s18, %s3436_s26  ;;  %p3442_p5 = scmp.lt.s32.totalorder %s3436_s26, %s3436_s26 }
   0xa   :  { %p3443_p6 = por %p3442_p5, %p3441_p4 }
   0xc   :  { %p3444_p7 = pnand %p3443_p6, %p3437_p3 }
   0xe   :  { %3447 = shalt.err (!%p3444_p7)
}
   0xf   :  { %s3451_s27 = smov 512   ;;  %s3452_s28 = smov 32  }
  0x10   :  { %37 = dma.hbm_to_vmem [thread:$0]  %s4451_s4, 8192, %s32_s18, [#allocation4], %s3451_s27, %s3451_s27, %s3452_s28  }
  0x11   :  { %3448 = dma.done.wait [#allocation4], 8192  }
  0x12   :  { %3449 = vsyncadd [#allocation4], 4294959104  ;;  %v3453_v0 = vmov 0.0   ;;  %v64_v1 = vld [vmem:[%s4450_s3 + $0x8] sm:$0xff]  ;;  %v63_v3 = vld [vmem:[%s4450_s3] sm:$0xff] }
  0x13   :  { %213 = vmatprep.mubr.f32.mxu1 %v3453_v0  ;;  %544 = vmatprep.mubr.f32.mxu0 %v3453_v0  ;;  %v68_v2 = vld [vmem:[%s4450_s3 + $0x28] sm:$0xff]  ;;  %v67_v5 = vld [vmem:[%s4450_s3 + $0x20] sm:$0xff] }
  0x14   :  { %v2622_v4 = vpack.c.bf16 %v68_v2, %v64_v1  ;;  %v417_v6 = vld [vmem:[#allocation3 + $0x8] sm:$0xff]  ;;  %v2624_v8 = vpack.c.bf16 %v67_v5, %v63_v3  ;;  %v416_v10 = vld [vmem:[#allocation3] sm:$0xff] }
  0x15   :  { %v421_v7 = vld [vmem:[#allocation3 + $0x28] sm:$0xff]  ;;  %v420_v11 = vld [vmem:[#allocation3 + $0x20] sm:$0xff] }
  0x16   :  { %v3540_v9 = vpack.c.bf16 %v421_v7, %v417_v6  ;;  %v72_v12 = vld [vmem:[%s4450_s3 + $0x48] sm:$0xff]  ;;  %2623 = vmatprep.subr.bf16.mxu1 %v2622_v4  ;;  %v3545_v13 = vpack.c.bf16 %v420_v11, %v416_v10  ;;  %v71_v15 = vld [vmem:[%s4450_s3 + $0x40] sm:$0xff] }
  0x17   :  { %v76_v14 = vld [vmem:[%s4450_s3 + $0x68] sm:$0xff]  ;;  %v75_v16 = vld [vmem:[%s4450_s3 + $0x60] sm:$0xff]  ;;  %2625 = vmatpush1.bf16.msra.mxu1 %v2624_v8 }
  0x18   :  { %2687 = vmatprep.subr.bf16.mxu0 %v3540_v9  ;;  %v2626_v17 = vpack.c.bf16 %v76_v14, %v72_v12  ;;  %v2628_v18 = vpack.c.bf16 %v75_v16, %v71_v15  ;;  %v425_v19 = vld [vmem:[#allocation3 + $0x48] sm:$0xff]  ;;  %v424_v21 = vld [vmem:[#allocation3 + $0x40] sm:$0xff] }
  0x19   :  { %v429_v20 = vld [vmem:[#allocation3 + $0x68] sm:$0xff]  ;;  %2689 = vmatpush1.bf16.msra.mxu0 %v3545_v13  ;;  %v428_v23 = vld [vmem:[#allocation3 + $0x60] sm:$0xff] }
  0x1a   :  { %v3558_v22 = vpack.c.bf16 %v429_v20, %v425_v19  ;;  %v80_v24 = vld [vmem:[%s4450_s3 + $0x88] sm:$0xff]  ;;  %2627 = vmatprep.subr.bf16.mxu1 %v2626_v17  ;;  %v3566_v26 = vpack.c.bf16 %v428_v23, %v424_v21  ;;  %v79_v28 = vld [vmem:[%s4450_s3 + $0x80] sm:$0xff] }
  0x1b   :  { %v84_v25 = vld [vmem:[%s4450_s3 + $0xa8] sm:$0xff]  ;;  %v83_v29 = vld [vmem:[%s4450_s3 + $0xa0] sm:$0xff]  ;;  %2629 = vmatpush1.bf16.msra.mxu1 %v2628_v18 }
  0x1c   :  { %v2630_v27 = vpack.c.bf16 %v84_v25, %v80_v24  ;;  %v433_v30 = vld [vmem:[#allocation3 + $0x88] sm:$0xff]  ;;  %2691 = vmatprep.subr.bf16.mxu0 %v3558_v22  ;;  %v432_v32 = vld [vmem:[#allocation3 + $0x80] sm:$0xff]  ;;  %v2632_v34 = vpack.c.bf16 %v83_v29, %v79_v28 }
  0x1d   :  { %v437_v31 = vld [vmem:[#allocation3 + $0xa8] sm:$0xff]  ;;  %v436_v33 = vld [vmem:[#allocation3 + $0xa0] sm:$0xff]  ;;  %2693 = vmatpush1.bf16.msra.mxu0 %v3566_v26 }
  0x1e   :  { %v3575_v35 = vpack.c.bf16 %v437_v31, %v433_v30  ;;  %v88_v36 = vld [vmem:[%s4450_s3 + $0xc8] sm:$0xff]  ;;  %v87_v38 = vld [vmem:[%s4450_s3 + $0xc0] sm:$0xff]  ;;  %2631 = vmatprep.subr.bf16.mxu1 %v2630_v27  ;;  %v3587_v39 = vpack.c.bf16 %v436_v33, %v432_v32 }
  0x1f   :  { %v92_v37 = vld [vmem:[%s4450_s3 + $0xe8] sm:$0xff]  ;;  %v91_v41 = vld [vmem:[%s4450_s3 + $0xe0] sm:$0xff]  ;;  %2633 = vmatpush1.bf16.msra.mxu1 %v2632_v34 }
  0x20   :  { %v2634_v40 = vpack.c.bf16 %v92_v37, %v88_v36  ;;  %v441_v42 = vld [vmem:[#allocation3 + $0xc8] sm:$0xff]  ;;  %2695 = vmatprep.subr.bf16.mxu0 %v3575_v35  ;;  %v440_v45 = vld [vmem:[#allocation3 + $0xc0] sm:$0xff]  ;;  %v2636_v49 = vpack.c.bf16 %v91_v41, %v87_v38  ;;  %v66_v37 = vld [vmem:[%s4450_s3 + $0x18] sm:$0xff] }
  0x21   :  { %v445_v43 = vld [vmem:[#allocation3 + $0xe8] sm:$0xff]  ;;  %v444_v46 = vld [vmem:[#allocation3 + $0xe0] sm:$0xff]  ;;  %2697 = vmatpush1.bf16.msra.mxu0 %v3587_v39  ;;  %v70_v38 = vld [vmem:[%s4450_s3 + $0x38] sm:$0xff] }
  0x22   :  { %v3593_v44 = vpack.c.bf16 %v445_v43, %v441_v42  ;;  %v96_v47 = vld [vmem:[%s4450_s3 + $0x108] sm:$0xff]  ;;  %2635 = vmatprep.subr.bf16.mxu1 %v2634_v40  ;;  %v3602_v52 = vpack.c.bf16 %v444_v46, %v440_v45  ;;  %v95_v54 = vld [vmem:[%s4450_s3 + $0x100] sm:$0xff]  ;;  %v2654_v42 = vpack.c.bf16 %v70_v38, %v66_v37  ;;  %v65_v43 = vld [vmem:[%s4450_s3 + $0x10] sm:$0xff] }
  0x23   :  { %v100_v48 = vld [vmem:[%s4450_s3 + $0x128] sm:$0xff]  ;;  %v99_v55 = vld [vmem:[%s4450_s3 + $0x120] sm:$0xff]  ;;  %2637 = vmatpush1.bf16.msra.mxu1 %v2636_v49  ;;  %v69_v45 = vld [vmem:[%s4450_s3 + $0x30] sm:$0xff] }
  0x24   :  { %v449_v50 = vld [vmem:[#allocation3 + $0x108] sm:$0xff]  ;;  %v2638_v53 = vpack.c.bf16 %v100_v48, %v96_v47  ;;  %v448_v56 = vld [vmem:[#allocation3 + $0x100] sm:$0xff]  ;;  %2699 = vmatprep.subr.bf16.mxu0 %v3593_v44  ;;  %v2640_v63 = vpack.c.bf16 %v99_v55, %v95_v54  ;;  %v74_v46 = vld [vmem:[%s4450_s3 + $0x58] sm:$0xff]  ;;  %v2656_v49 = vpack.c.bf16 %v69_v45, %v65_v43 }
  0x25   :  { %v453_v51 = vld [vmem:[#allocation3 + $0x128] sm:$0xff]  ;;  %v452_v58 = vld [vmem:[#allocation3 + $0x120] sm:$0xff]  ;;  %2701 = vmatpush1.bf16.msra.mxu0 %v3602_v52  ;;  %v78_v47 = vld [vmem:[%s4450_s3 + $0x78] sm:$0xff] }
  0x26   :  { %v3611_v57 = vpack.c.bf16 %v453_v51, %v449_v50  ;;  %v104_v59 = vld [vmem:[%s4450_s3 + $0x148] sm:$0xff]  ;;  %2639 = vmatprep.subr.bf16.mxu1 %v2638_v53  ;;  %v3620_v1 = vpack.c.bf16 %v452_v58, %v448_v56  ;;  %v103_v3 = vld [vmem:[%s4450_s3 + $0x140] sm:$0xff]  ;;  %v2658_v51 = vpack.c.bf16 %v78_v47, %v74_v46  ;;  %v73_v53 = vld [vmem:[%s4450_s3 + $0x50] sm:$0xff] }
  0x27   :  { %v108_v60 = vld [vmem:[%s4450_s3 + $0x168] sm:$0xff]  ;;  %v107_v4 = vld [vmem:[%s4450_s3 + $0x160] sm:$0xff]  ;;  %2641 = vmatpush1.bf16.msra.mxu1 %v2640_v63  ;;  %v77_v54 = vld [vmem:[%s4450_s3 + $0x70] sm:$0xff] }
  0x28   :  { %v457_v61 = vld [vmem:[#allocation3 + $0x148] sm:$0xff]  ;;  %v2642_v2 = vpack.c.bf16 %v108_v60, %v104_v59  ;;  %v456_v5 = vld [vmem:[#allocation3 + $0x140] sm:$0xff]  ;;  %2703 = vmatprep.subr.bf16.mxu0 %v3611_v57  ;;  %v2644_v14 = vpack.c.bf16 %v107_v4, %v103_v3  ;;  %v82_v55 = vld [vmem:[%s4450_s3 + $0x98] sm:$0xff]  ;;  %v2660_v59 = vpack.c.bf16 %v77_v54, %v73_v53 }
  0x29   :  { %v461_v62 = vld [vmem:[#allocation3 + $0x168] sm:$0xff]  ;;  %v460_v7 = vld [vmem:[#allocation3 + $0x160] sm:$0xff]  ;;  %2705 = vmatpush1.bf16.msra.mxu0 %v3620_v1  ;;  %v86_v56 = vld [vmem:[%s4450_s3 + $0xb8] sm:$0xff] }
  0x2a   :  { %v3629_v6 = vpack.c.bf16 %v461_v62, %v457_v61  ;;  %v112_v8 = vld [vmem:[%s4450_s3 + $0x188] sm:$0xff]  ;;  %2643 = vmatprep.subr.bf16.mxu1 %v2642_v2  ;;  %v3638_v15 = vpack.c.bf16 %v460_v7, %v456_v5  ;;  %v111_v17 = vld [vmem:[%s4450_s3 + $0x180] sm:$0xff]  ;;  %v2662_v60 = vpack.c.bf16 %v86_v56, %v82_v55  ;;  %v81_v61 = vld [vmem:[%s4450_s3 + $0x90] sm:$0xff] }
  0x2b   :  { %v116_v10 = vld [vmem:[%s4450_s3 + $0x1a8] sm:$0xff]  ;;  %v115_v18 = vld [vmem:[%s4450_s3 + $0x1a0] sm:$0xff]  ;;  %2645 = vmatpush1.bf16.msra.mxu1 %v2644_v14  ;;  %v90_v62 = vld [vmem:[%s4450_s3 + $0xd8] sm:$0xff] }
  0x2c   :  { %v465_v11 = vld [vmem:[#allocation3 + $0x188] sm:$0xff]  ;;  %v2646_v16 = vpack.c.bf16 %v116_v10, %v112_v8  ;;  %v464_v19 = vld [vmem:[#allocation3 + $0x180] sm:$0xff]  ;;  %2707 = vmatprep.subr.bf16.mxu0 %v3629_v6  ;;  %v2648_v28 = vpack.c.bf16 %v115_v18, %v111_v17  ;;  %v94_v63 = vld [vmem:[%s4450_s3 + $0xf8] sm:$0xff] }
  0x2d   :  { %v469_v12 = vld [vmem:[#allocation3 + $0x1a8] sm:$0xff]  ;;  %v468_v21 = vld [vmem:[#allocation3 + $0x1a0] sm:$0xff]  ;;  %2709 = vmatpush1.bf16.msra.mxu0 %v3638_v15  ;;  %v3741_v2 = vld [vmem:[%s4447_s0 + $0x10] sm:$0xff]  ;;  %v2666_v4 = vpack.c.bf16 %v94_v63, %v90_v62 }
  0x2e   :  { %v3647_v20 = vpack.c.bf16 %v469_v12, %v465_v11  ;;  %v120_v23 = vld [vmem:[%s4450_s3 + $0x1c8] sm:$0xff]  ;;  %2647 = vmatprep.subr.bf16.mxu1 %v2646_v16  ;;  %v3656_v29 = vpack.c.bf16 %v468_v21, %v464_v19  ;;  %v119_v31 = vld [vmem:[%s4450_s3 + $0x1c0] sm:$0xff]  ;;  %v93_v5 = vld [vmem:[%s4450_s3 + $0xf0] sm:$0xff] }
  0x2f   :  { %v124_v24 = vld [vmem:[%s4450_s3 + $0x1e8] sm:$0xff]  ;;  %v123_v32 = vld [vmem:[%s4450_s3 + $0x1e0] sm:$0xff]  ;;  %2649 = vmatpush1.bf16.msra.mxu1 %v2648_v28  ;;  %v102_v7 = vld [vmem:[%s4450_s3 + $0x138] sm:$0xff] }
  0x30   :  { %v473_v25 = vld [vmem:[#allocation3 + $0x1c8] sm:$0xff]  ;;  %v2650_v30 = vpack.c.bf16 %v124_v24, %v120_v23  ;;  %v472_v33 = vld [vmem:[#allocation3 + $0x1c0] sm:$0xff]  ;;  %2711 = vmatprep.subr.bf16.mxu0 %v3647_v20  ;;  %v2652_v40 = vpack.c.bf16 %v123_v32, %v119_v31  ;;  %v3762_v8 = vld [vmem:[%s4447_s0 + $0x18] sm:$0xff] }
  0x31   :  { %v477_v27 = vld [vmem:[#allocation3 + $0x1e8] sm:$0xff]  ;;  %v476_v36 = vld [vmem:[#allocation3 + $0x1e0] sm:$0xff]  ;;  %2713 = vmatpush1.bf16.msra.mxu0 %v3656_v29  ;;  %v97_v12 = vld [vmem:[%s4450_s3 + $0x110] sm:$0xff] }
  0x32   :  { %v3665_v34 = vpack.c.bf16 %v477_v27, %v473_v25  ;;  %2651 = vmatprep.subr.bf16.mxu1 %v2650_v30  ;;  %v3674_v41 = vpack.c.bf16 %v476_v36, %v472_v33  ;;  %v3692_v48 = vld [vmem:[%s4447_s0] sm:$0xff]  ;;  %v3718_v58 = vld [vmem:[%s4447_s0 + $0x8] sm:$0xff]  ;;  %v110_v14 = vld [vmem:[%s4450_s3 + $0x178] sm:$0xff] }
  0x33   :  { %2653 = vmatpush1.bf16.msra.mxu1 %v2652_v40  ;;  %v3698_v50 = vld [vmem:[%s4448_s1] sm:$0xff]  ;;  %v105_v19 = vld [vmem:[%s4450_s3 + $0x150] sm:$0xff]  ;;  %v118_v21 = vld [vmem:[%s4450_s3 + $0x1b8] sm:$0xff] }
  0x34   :  { %2715 = vmatprep.subr.bf16.mxu0 %v3665_v34  ;;  %2655 = vmatprep.subr.bf16.mxu1 %v2654_v42  ;;  %v3783_v16 = vld [vmem:[%s4447_s0 + $0x20] sm:$0xff]  ;;  %v3804_v23 = vld [vmem:[%s4447_s0 + $0x28] sm:$0xff]  ;;  %v113_v27 = vld [vmem:[%s4450_s3 + $0x190] sm:$0xff] }
  0x35   :  { %2717 = vmatpush1.bf16.msra.mxu0 %v3674_v41  ;;  %v126_v28 = vld [vmem:[%s4450_s3 + $0x1f8] sm:$0xff]  ;;  %v3825_v30 = vld [vmem:[%s4447_s0 + $0x30] sm:$0xff] }
  0x36   :  { %2751 = vmatprep.subr.bf16.mxu0 %v3540_v9  ;;  %214 = vmatmul.mubr.f32.vlgmr.msra.gmra.mrb[0].mxu1 %v3692_v48  ;;  %v85_v9 = vld [vmem:[%s4450_s3 + $0xb0] sm:$0xff]  ;;  %v423_v36 = vld [vmem:[#allocation3 + $0x38] sm:$0xff] }
  0x37   :  { %2657 = vmatpush1.bf16.msra.mxu1 %v2656_v49  ;;  %219 = vmatprep.mubr.f32.mxu1 %v3453_v0  ;;  %v2664_v3 = vpack.c.bf16 %v85_v9, %v81_v61  ;;  %v121_v33 = vld [vmem:[%s4450_s3 + $0x1d0] sm:$0xff]  ;;  %v3840_v37 = vld [vmem:[%s4447_s0 + $0x38] sm:$0xff] }
  0x38   :  { %545 = vmatmul.mubr.f32.vlgmr.msra.gmra.mrb[0].mxu0 %v3698_v50  ;;  %2659 = vmatprep.subr.bf16.mxu1 %v2658_v51  ;;  %v418_v42 = vld [vmem:[#allocation3 + $0x10] sm:$0xff]  ;;  %v427_v45 = vld [vmem:[#allocation3 + $0x58] sm:$0xff] }
  0x39   :  { %2753 = vmatpush1.bf16.msra.mxu0 %v3545_v13  ;;  %786 = vmatprep.mubr.f32.mxu0 %v3453_v0  ;;  %v89_v13 = vld [vmem:[%s4450_s3 + $0xd0] sm:$0xff]  ;;  %v435_v51 = vld [vmem:[#allocation3 + $0x98] sm:$0xff] }
  0x3a   :  { %220 = vmatmul.mubr.f32.gmra.mrb[2].mxu1 %v3718_v58  ;;  %2755 = vmatprep.subr.bf16.mxu0 %v3558_v22  ;;  %v98_v22 = vld [vmem:[%s4450_s3 + $0x118] sm:$0xff]  ;;  %v2668_v10 = vpack.c.bf16 %v93_v5, %v89_v13  ;;  %v422_v43 = vld [vmem:[#allocation3 + $0x30] sm:$0xff] }
  0x3b   :  { %2661 = vmatpush1.bf16.msra.mxu1 %v2660_v59  ;;  %225 = vmatprep.mubr.f32.mxu1 %v3453_v0  ;;  %v2670_v11 = vpack.c.bf16 %v102_v7, %v98_v22  ;;  %v426_v47 = vld [vmem:[#allocation3 + $0x50] sm:$0xff]  ;;  %v439_v53 = vld [vmem:[#allocation3 + $0xb8] sm:$0xff] }
  0x3c   :  { %2663 = vmatprep.subr.bf16.mxu1 %v2662_v60  ;;  %v430_v49 = vld [vmem:[#allocation3 + $0x70] sm:$0xff]  ;;  %v443_v56 = vld [vmem:[#allocation3 + $0xd8] sm:$0xff] }
  0x3d   :  { %2757 = vmatpush1.bf16.msra.mxu0 %v3566_v26  ;;  %v101_v26 = vld [vmem:[%s4450_s3 + $0x130] sm:$0xff]  ;;  %v447_v59 = vld [vmem:[#allocation3 + $0xf8] sm:$0xff] }
  0x3e   :  { %226 = vmatmul.mubr.f32.gmra.mrb[4].mxu1 %v3741_v2  ;;  %2759 = vmatprep.subr.bf16.mxu0 %v3575_v35  ;;  %v106_v35 = vld [vmem:[%s4450_s3 + $0x158] sm:$0xff]  ;;  %v2672_v17 = vpack.c.bf16 %v101_v26, %v97_v12  ;;  %v434_v54 = vld [vmem:[#allocation3 + $0x90] sm:$0xff] }
  0x3f   :  { %2665 = vmatpush1.bf16.msra.mxu1 %v2664_v3  ;;  %231 = vmatprep.mubr.f32.mxu1 %v3453_v0  ;;  %v2674_v18 = vpack.c.bf16 %v110_v14, %v106_v35  ;;  %v438_v55 = vld [vmem:[#allocation3 + $0xb0] sm:$0xff]  ;;  %v451_v9 = vld [vmem:[#allocation3 + $0x118] sm:$0xff] }
  0x40   :  { %2667 = vmatprep.subr.bf16.mxu1 %v2666_v4  ;;  %v442_v60 = vld [vmem:[#allocation3 + $0xd0] sm:$0xff]  ;;  %v455_v62 = vld [vmem:[#allocation3 + $0x138] sm:$0xff] }
  0x41   :  { %2761 = vmatpush1.bf16.msra.mxu0 %v3587_v39  ;;  %v109_v39 = vld [vmem:[%s4450_s3 + $0x170] sm:$0xff]  ;;  %v3876_v63 = vpack.c.bf16 %v455_v62, %v451_v9  ;;  %v459_v13 = vld [vmem:[#allocation3 + $0x158] sm:$0xff] }
  0x42   :  { %232 = vmatmul.mubr.f32.gmra.mrb[6].mxu1 %v3762_v8  ;;  %2763 = vmatprep.subr.bf16.mxu0 %v3593_v44  ;;  %v114_v44 = vld [vmem:[%s4450_s3 + $0x198] sm:$0xff]  ;;  %v2676_v24 = vpack.c.bf16 %v109_v39, %v105_v19  ;;  %v446_v61 = vld [vmem:[#allocation3 + $0xf0] sm:$0xff] }
  0x43   :  { %2669 = vmatpush1.bf16.msra.mxu1 %v2668_v10  ;;  %237 = vmatprep.mubr.f32.mxu1 %v3453_v0  ;;  %v2678_v25 = vpack.c.bf16 %v118_v21, %v114_v44  ;;  %v450_v3 = vld [vmem:[#allocation3 + $0x110] sm:$0xff]  ;;  %v463_v5 = vld [vmem:[#allocation3 + $0x178] sm:$0xff] }
  0x44   :  { %2671 = vmatprep.subr.bf16.mxu1 %v2670_v11  ;;  %v454_v4 = vld [vmem:[#allocation3 + $0x130] sm:$0xff]  ;;  %v3884_v22 = vpack.c.bf16 %v463_v5, %v459_v13  ;;  %v467_v11 = vld [vmem:[#allocation3 + $0x198] sm:$0xff] }
  0x45   :  { %2765 = vmatpush1.bf16.msra.mxu0 %v3602_v52  ;;  %v117_v52 = vld [vmem:[%s4450_s3 + $0x1b0] sm:$0xff]  ;;  %v471_v12 = vld [vmem:[#allocation3 + $0x1b8] sm:$0xff] }
  0x46   :  { %238 = vmatmul.mubr.f32.gmra.mrb[8].mxu1 %v3783_v16  ;;  %2767 = vmatprep.subr.bf16.mxu0 %v3611_v57  ;;  %v122_v57 = vld [vmem:[%s4450_s3 + $0x1d8] sm:$0xff]  ;;  %v2680_v31 = vpack.c.bf16 %v117_v52, %v113_v27  ;;  %v458_v7 = vld [vmem:[#allocation3 + $0x150] sm:$0xff]  ;;  %v3892_v26 = vpack.c.bf16 %v471_v12, %v467_v11 }
  0x47   :  { %2673 = vmatpush1.bf16.msra.mxu1 %v2672_v17  ;;  %243 = vmatprep.mubr.f32.mxu1 %v3453_v0  ;;  %v2682_v32 = vpack.c.bf16 %v126_v28, %v122_v57  ;;  %v462_v10 = vld [vmem:[#allocation3 + $0x170] sm:$0xff]  ;;  %v475_v17 = vld [vmem:[#allocation3 + $0x1d8] sm:$0xff] }
  0x48   :  { %2675 = vmatprep.subr.bf16.mxu1 %v2674_v18  ;;  %v466_v35 = vld [vmem:[#allocation3 + $0x190] sm:$0xff]  ;;  %v479_v18 = vld [vmem:[#allocation3 + $0x1f8] sm:$0xff] }
  0x49   :  { %2769 = vmatpush1.bf16.msra.mxu0 %v3620_v1  ;;  %v125_v1 = vld [vmem:[%s4450_s3 + $0x1f0] sm:$0xff]  ;;  %v3900_v19 = vpack.c.bf16 %v479_v18, %v475_v17 }
  0x4a   :  { %244 = vmatmul.mubr.f32.gmra.mrb[10].mxu1 %v3804_v23  ;;  %2771 = vmatprep.subr.bf16.mxu0 %v3629_v6  ;;  %v419_v6 = vld [vmem:[#allocation3 + $0x18] sm:$0xff]  ;;  %v2684_v38 = vpack.c.bf16 %v125_v1, %v121_v33  ;;  %v470_v14 = vld [vmem:[#allocation3 + $0x1b0] sm:$0xff] }
  0x4b   :  { %2677 = vmatpush1.bf16.msra.mxu1 %v2676_v24  ;;  %249 = vmatprep.mubr.f32.mxu1 %v3453_v0  ;;  %v3842_v40 = vpack.c.bf16 %v423_v36, %v419_v6  ;;  %v474_v39 = vld [vmem:[#allocation3 + $0x1d0] sm:$0xff] }
  0x4c   :  { %2679 = vmatprep.subr.bf16.mxu1 %v2678_v25  ;;  %v478_v44 = vld [vmem:[#allocation3 + $0x1f0] sm:$0xff]  ;;  %v127_v25 = vld [vmem:[%s4452_s5] sm:$0xf] }
  0x4d   :  { %2773 = vmatpush1.bf16.msra.mxu0 %v3638_v15  ;;  %v431_v15 = vld [vmem:[#allocation3 + $0x78] sm:$0xff]  ;;  %v3905_v21 = vpack.c.bf16 %v478_v44, %v474_v39 }
  0x4e   :  { %250 = vmatmul.mubr.f32.gmra.mrb[12].mxu1 %v3825_v30  ;;  %2775 = vmatprep.subr.bf16.mxu0 %v3647_v20  ;;  %v3848_v20 = vpack.c.bf16 %v422_v43, %v418_v42  ;;  %v3851_v46 = vpack.c.bf16 %v431_v15, %v427_v45 }
  0x4f   :  { %2681 = vmatpush1.bf16.msra.mxu1 %v2680_v31  ;;  %255 = vmatprep.mubr.f32.mxu1 %v3453_v0 }
  0x50   :  { %2683 = vmatprep.subr.bf16.mxu1 %v2682_v32 }
  0x51   :  { %2777 = vmatpush1.bf16.msra.mxu0 %v3656_v29  ;;  %v3857_v29 = vpack.c.bf16 %v430_v49, %v426_v47 }
  0x52   :  { %256 = vmatmul.mubr.f32.gmra.mrb[14].mxu1 %v3840_v37  ;;  %2779 = vmatprep.subr.bf16.mxu0 %v3665_v34  ;;  %v3860_v34 = vpack.c.bf16 %v439_v53, %v435_v51 }
  0x53   :  { %2685 = vmatpush1.bf16.msra.mxu1 %v2684_v38  ;;  %326 = vmatprep.mubr.f32.mxu1 %v3453_v0 }
  0x54   :  { %2719 = vmatprep.subr.bf16.mxu1 %v3842_v40 }
  0x55   :  { %2781 = vmatpush1.bf16.msra.mxu0 %v3674_v41  ;;  %v3865_v41 = vpack.c.bf16 %v438_v55, %v434_v54 }
  0x56   :  { %327 = vmatmul.mubr.f32.vlgmr.msra.gmra.mrb[16].mxu1 %v3692_v48  ;;  %v3868_v48 = vpack.c.bf16 %v447_v59, %v443_v56 }
  0x57   :  { %2721 = vmatpush1.bf16.msra.mxu1 %v3848_v20  ;;  %332 = vmatprep.mubr.f32.mxu1 %v3453_v0 }
  0x58   :  { %2723 = vmatprep.subr.bf16.mxu1 %v3851_v46 }
  0x5a   :  { %333 = vmatmul.mubr.f32.gmra.mrb[18].mxu1 %v3718_v58  ;;  %v3873_v58 = vpack.c.bf16 %v446_v61, %v442_v60 }
  0x5b   :  { %2725 = vmatpush1.bf16.msra.mxu1 %v3857_v29  ;;  %338 = vmatprep.mubr.f32.mxu1 %v3453_v0 }
  0x5c   :  { %2727 = vmatprep.subr.bf16.mxu1 %v3860_v34 }
  0x5e   :  { %339 = vmatmul.mubr.f32.gmra.mrb[20].mxu1 %v3741_v2  ;;  %v3881_v2 = vpack.c.bf16 %v454_v4, %v450_v3 }
  0x5f   :  { %2729 = vmatpush1.bf16.msra.mxu1 %v3865_v41  ;;  %344 = vmatprep.mubr.f32.mxu1 %v3453_v0 }
  0x60   :  { %2731 = vmatprep.subr.bf16.mxu1 %v3868_v48 }
  0x62   :  { %345 = vmatmul.mubr.f32.gmra.mrb[22].mxu1 %v3762_v8  ;;  %v3889_v8 = vpack.c.bf16 %v462_v10, %v458_v7 }
  0x63   :  { %2733 = vmatpush1.bf16.msra.mxu1 %v3873_v58  ;;  %350 = vmatprep.mubr.f32.mxu1 %v3453_v0 }
  0x64   :  { %2735 = vmatprep.subr.bf16.mxu1 %v3876_v63 }
  0x66   :  { %351 = vmatmul.mubr.f32.gmra.mrb[24].mxu1 %v3783_v16  ;;  %v3897_v16 = vpack.c.bf16 %v470_v14, %v466_v35 }
  0x67   :  { %2737 = vmatpush1.bf16.msra.mxu1 %v3881_v2  ;;  %356 = vmatprep.mubr.f32.mxu1 %v3453_v0 }
  0x68   :  { %2739 = vmatprep.subr.bf16.mxu1 %v3884_v22 }
  0x6a   :  { %357 = vmatmul.mubr.f32.gmra.mrb[26].mxu1 %v3804_v23 }
  0x6b   :  { %2741 = vmatpush1.bf16.msra.mxu1 %v3889_v8  ;;  %362 = vmatprep.mubr.f32.mxu1 %v3453_v0 }
  0x6c   :  { %2743 = vmatprep.subr.bf16.mxu1 %v3892_v26 }
  0x6e   :  { %363 = vmatmul.mubr.f32.gmra.mrb[28].mxu1 %v3825_v30 }
  0x6f   :  { %2745 = vmatpush1.bf16.msra.mxu1 %v3897_v16  ;;  %368 = vmatprep.mubr.f32.mxu1 %v3453_v0 }
  0x70   :  { %2747 = vmatprep.subr.bf16.mxu1 %v3900_v19 }
  0x72   :  { %369 = vmatmul.mubr.f32.gmra.mrb[30].mxu1 %v3840_v37 }
  0x73   :  { %2749 = vmatpush1.bf16.msra.mxu1 %v3905_v21  ;;  %615 = vmatprep.mubr.f32.mxu1 %v3453_v0 }
  0x74   :  { %2783 = vmatprep.subr.bf16.mxu1 %v3842_v40 }
  0x76   :  { %616 = vmatmul.mubr.f32.vlgmr.msra.gmra.mrb[16].mxu1 %v3698_v50  ;;  %v129_v50 = vlaneseq }
  0x77   :  { %2785 = vmatpush1.bf16.msra.mxu1 %v3848_v20  ;;  %857 = vmatprep.mubr.f32.mxu1 %v3453_v0 }
  0x78   :  { %2787 = vmatprep.subr.bf16.mxu1 %v3851_v46  ;;  %v130_v23 = vshrl.u32 %v129_v50, 7 }
  0x7a   :  { %v131_v24 = vsub.s32 0, %v130_v23  ;;  %v135_v27 = vsub.s32 1, %v130_v23  ;;  %v139_v39 = vsub.s32 2, %v130_v23  ;;  %v143_v44 = vsub.s32 3, %v130_v23 }
  0x7b   :  { %2789 = vmatpush1.bf16.msra.mxu1 %v3857_v29 }
  0x7c   :  { %2791 = vmatprep.subr.bf16.mxu1 %v3860_v34  ;;  %v132_v52 = vrot.slane %v127_v25, %v131_v24  ;;  %v136_v57 = vrot.slane %v127_v25, %v135_v27  ;;  %v3961_v27 = vrot.slane %v127_v25, %v139_v39 }
  0x7f   :  { %2793 = vmatpush1.bf16.msra.mxu1 %v3865_v41 }
  0x80   :  { %2795 = vmatprep.subr.bf16.mxu1 %v3868_v48 }
  0x83   :  { %2797 = vmatpush1.bf16.msra.mxu1 %v3873_v58 }
  0x84   :  { %2799 = vmatprep.subr.bf16.mxu1 %v3876_v63 }
  0x87   :  { %2801 = vmatpush1.bf16.msra.mxu1 %v3881_v2 }
  0x88   :  { %2803 = vmatprep.subr.bf16.mxu1 %v3884_v22 }
  0x8b   :  { %2805 = vmatpush1.bf16.msra.mxu1 %v3889_v8 }
  0x8c   :  { %2807 = vmatprep.subr.bf16.mxu1 %v3892_v26 }
  0x8f   :  { %2809 = vmatpush1.bf16.msra.mxu1 %v3897_v16 }
  0x90   :  { %2811 = vmatprep.subr.bf16.mxu1 %v3900_v19 }
  0x93   :  { %2813 = vmatpush1.bf16.msra.mxu1 %v3905_v21 }
  0x94   :  { %2847 = vmatprep.subr.bf16.mxu1 %v3842_v40 }
 0x109   :  { %v215_v28 = vpop.f32.mrb[0].mxu1 }
 0x10a   :  { %v216_v30 = vadd.f32 %v215_v28, %v132_v52  ;;  %v217_v31 = vpop.f32.mrb[1].mxu1 }
 0x10b   :  { %v546_v32 = vpop.f32.mrb[0].mxu0  ;;  %v218_v33 = vadd.f32 %v217_v31, %v136_v57 }
 0x10c   :  { %v548_v1 = vpop.f32.mrb[1].mxu0  ;;  %v622_v6 = vadd.f32 %v546_v32, %v216_v30  ;;  %v3963_v30 = vrot.slane %v127_v25, %v143_v44  ;;  %v922_v44 = vld [vmem:[#allocation3 + $0xa8] sm:$0xff] }
 0x10d   :  { %v623_v36 = vadd.f32 %v548_v1, %v218_v33  ;;  %v221_v37 = vpop.f32.mrb[2].mxu1 }
 0x10e   :  { %v3933_v38 = vadd.f32 %v221_v37, %v132_v52  ;;  %v223_v42 = vpop.f32.mrb[3].mxu1  ;;  %v2522_v18 = vmul.f32 -1.442695, %v622_v6  ;;  %v53_v6 = vld [vmem:[%s4449_s2] sm:$0xff] }
 0x10f   :  { %v3935_v43 = vadd.f32 %v223_v42, %v136_v57  ;;  %v2523_v17 = vmul.f32 -1.442695, %v623_v36 }
 0x111   :  { %v227_v45 = vpop.f32.mrb[4].mxu1  ;;  %3298 = vpow2.f32 %v2523_v17  ;;  %v910_v17 = vld [vmem:[#allocation3 + $0x48] sm:$0xff] }
 0x112   :  { %v3937_v15 = vadd.f32 %v227_v45, %v132_v52  ;;  %v229_v47 = vpop.f32.mrb[5].mxu1  ;;  %3300 = vpow2.f32 %v2522_v18 }
 0x113   :  { %v3939_v49 = vadd.f32 %v229_v47, %v136_v57 }
 0x115   :  { %v233_v51 = vpop.f32.mrb[6].mxu1 }
 0x116   :  { %v3941_v53 = vadd.f32 %v233_v51, %v132_v52  ;;  %v235_v54 = vpop.f32.mrb[7].mxu1 }
 0x117   :  { %v3943_v55 = vadd.f32 %v235_v54, %v136_v57 }
 0x119   :  { %v239_v56 = vpop.f32.mrb[8].mxu1 }
 0x11a   :  { %v3945_v59 = vadd.f32 %v239_v56, %v132_v52  ;;  %v241_v60 = vpop.f32.mrb[9].mxu1 }
 0x11b   :  { %v3947_v61 = vadd.f32 %v241_v60, %v136_v57  ;;  %v3299_v50 = vpop.eup %3298 }
 0x11c   :  { %v3301_v24 = vpop.eup %3300  ;;  %v636_v28 = vadd.f32 1.0, %v3299_v50 }
 0x11d   :  { %v245_v9 = vpop.f32.mrb[10].mxu1  ;;  %v635_v31 = vadd.f32 1.0, %v3301_v24  ;;  %v917_v24 = vld [vmem:[#allocation3 + $0x80] sm:$0xff] }
 0x11e   :  { %v3949_v62 = vadd.f32 %v245_v9, %v132_v52  ;;  %v247_v3 = vpop.f32.mrb[11].mxu1  ;;  %3302 = vrcp.f32 %v636_v28  ;;  %v902_v9 = vld [vmem:[#allocation3 + $0x8] sm:$0xff]  ;;  %v921_v28 = vld [vmem:[#allocation3 + $0xa0] sm:$0xff] }
 0x11f   :  { %v3951_v4 = vadd.f32 %v247_v3, %v136_v57  ;;  %3304 = vrcp.f32 %v635_v31  ;;  %v906_v3 = vld [vmem:[#allocation3 + $0x28] sm:$0xff]  ;;  %v4008_v31 = vpack.c.bf16 %v921_v28, %v917_v24  ;;  %v957_v28 = vld [vmem:[#allocation3 + $0x1c0] sm:$0xff] }
 0x121   :  { %v251_v13 = vpop.f32.mrb[12].mxu1 }
 0x122   :  { %v3953_v5 = vadd.f32 %v251_v13, %v132_v52  ;;  %v253_v7 = vpop.f32.mrb[13].mxu1  ;;  %v3994_v13 = vpack.c.bf16 %v906_v3, %v902_v9  ;;  %v945_v9 = vld [vmem:[#allocation3 + $0x160] sm:$0xff] }
 0x123   :  { %v3955_v10 = vadd.f32 %v253_v7, %v136_v57  ;;  %v901_v7 = vld [vmem:[#allocation3] sm:$0xff] }
 0x124   :  { %2815 = vmatprep.subr.bf16.mxu0 %v3994_v13 }
 0x125   :  { %v257_v11 = vpop.f32.mrb[14].mxu1 }
 0x126   :  { %v3957_v12 = vadd.f32 %v257_v11, %v132_v52  ;;  %v259_v35 = vpop.f32.mrb[15].mxu1  ;;  %v905_v11 = vld [vmem:[#allocation3 + $0x20] sm:$0xff] }
 0x127   :  { %v3959_v14 = vadd.f32 %v259_v35, %v136_v57  ;;  %v3996_v35 = vpack.c.bf16 %v905_v11, %v901_v7  ;;  %v950_v7 = vld [vmem:[#allocation3 + $0x188] sm:$0xff] }
 0x128   :  { %v3303_v23 = vpop.eup %3302  ;;  %v954_v11 = vld [vmem:[#allocation3 + $0x1a8] sm:$0xff] }
 0x129   :  { %v3305_v36 = vpop.eup %3304  ;;  %v645_v42 = vmul.f32 %v3303_v23, %v53_v6  ;;  %v934_v6 = vld [vmem:[#allocation3 + $0x108] sm:$0xff] }
 0x149   :  { %v617_v32 = vpop.f32.mrb[16].mxu1 }
 0x14a   :  { %v3262_v52 = vadd.f32 %v617_v32, %v3961_v27  ;;  %v619_v33 = vpop.f32.mrb[17].mxu1  ;;  %v926_v32 = vld [vmem:[#allocation3 + $0xc8] sm:$0xff] }
 0x14b   :  { %v3263_v57 = vadd.f32 %v619_v33, %v3963_v30 }
 0x14c   :  { %v2524_v1 = vmul.f32 -1.442695, %v3262_v52  ;;  %v930_v52 = vld [vmem:[#allocation3 + $0xe8] sm:$0xff] }
 0x14d   :  { %3306 = vtanh.f32 %v3263_v57  ;;  %v4012_v33 = vpack.c.bf16 %v930_v52, %v926_v32  ;;  %v925_v57 = vld [vmem:[#allocation3 + $0xc0] sm:$0xff] }
 0x14e   :  { %3308 = vpow2.f32 %v2524_v1  ;;  %v929_v1 = vld [vmem:[#allocation3 + $0xe0] sm:$0xff] }
 0x14f   :  { %v4014_v23 = vpack.c.bf16 %v929_v1, %v925_v57  ;;  %v961_v32 = vld [vmem:[#allocation3 + $0x1e0] sm:$0xff] }
 0x150   :  { %v4038_v52 = vpack.c.bf16 %v961_v32, %v957_v28 }
 0x157   :  { %v3307_v25 = vpop.eup %3306 }
 0x158   :  { %v3309_v37 = vpop.eup %3308  ;;  %v646_v45 = vmul.f32 %v3307_v25, %v3305_v36  ;;  %v938_v36 = vld [vmem:[#allocation3 + $0x128] sm:$0xff] }
 0x159   :  { %v637_v47 = vadd.f32 1.0, %v3309_v37  ;;  %v4018_v25 = vpack.c.bf16 %v938_v36, %v934_v6  ;;  %v933_v37 = vld [vmem:[#allocation3 + $0x100] sm:$0xff] }
 0x15a   :  { %v3970_v51 = vadd.f32 %v646_v45, %v645_v42  ;;  %v937_v42 = vld [vmem:[#allocation3 + $0x120] sm:$0xff] }
 0x15b   :  { %3310 = vrcp.f32 %v637_v47  ;;  %v4020_v45 = vpack.c.bf16 %v937_v42, %v933_v37  ;;  %v942_v47 = vld [vmem:[#allocation3 + $0x148] sm:$0xff] }
 0x15c   :  { %3312 = vtanh.f32 %v3970_v51 }
 0x165   :  { %v3311_v54 = vpop.eup %3310 }
 0x166   :  { %v3313_v56 = vpop.eup %3312 }
 0x167   :  { %v649_v60 = vmul.f32 %v3313_v56, %v3311_v54  ;;  %v946_v54 = vld [vmem:[#allocation3 + $0x168] sm:$0xff] }
 0x168   :  { %v4024_v56 = vpack.c.bf16 %v946_v54, %v942_v47 }
 0x169   :  { %650 = vst [vmem:[%s4455_s8] sm:$0xff] %v649_v60  ;;  %787 = vmatmul.mubr.f32.vlgmr.msra.gmra.mrb[2].mxu0 %v649_v60  ;;  %858 = vmatmul.mubr.f32.vlgmr.msra.gmra.mrb[18].mxu1 %v649_v60  ;;  %v941_v60 = vld [vmem:[#allocation3 + $0x140] sm:$0xff] }
 0x16a   :  { %2849 = vmatpush1.bf16.msra.mxu1 %v3848_v20  ;;  %1029 = vmatprep.mubr.f32.mxu0 %v3453_v0  ;;  %v4026_v3 = vpack.c.bf16 %v945_v9, %v941_v60 }
 0x16b   :  { %2851 = vmatprep.subr.bf16.mxu1 %v3851_v46  ;;  %1100 = vmatprep.mubr.f32.mxu1 %v3453_v0 }
 0x16c   :  { %2817 = vmatpush1.bf16.msra.mxu0 %v3996_v35 }
 0x16e   :  { %2853 = vmatpush1.bf16.msra.mxu1 %v3857_v29 }
 0x16f   :  { %2855 = vmatprep.subr.bf16.mxu1 %v3860_v34 }
 0x172   :  { %2857 = vmatpush1.bf16.msra.mxu1 %v3865_v41 }
 0x173   :  { %2859 = vmatprep.subr.bf16.mxu1 %v3868_v48 }
 0x176   :  { %2861 = vmatpush1.bf16.msra.mxu1 %v3873_v58 }
 0x177   :  { %2863 = vmatprep.subr.bf16.mxu1 %v3876_v63 }
 0x17a   :  { %2865 = vmatpush1.bf16.msra.mxu1 %v3881_v2 }
 0x17b   :  { %2867 = vmatprep.subr.bf16.mxu1 %v3884_v22 }
 0x17e   :  { %2869 = vmatpush1.bf16.msra.mxu1 %v3889_v8 }
 0x17f   :  { %2871 = vmatprep.subr.bf16.mxu1 %v3892_v26 }
 0x182   :  { %2873 = vmatpush1.bf16.msra.mxu1 %v3897_v16  ;;  %v914_v16 = vld [vmem:[#allocation3 + $0x68] sm:$0xff] }
 0x183   :  { %2875 = vmatprep.subr.bf16.mxu1 %v3900_v19  ;;  %v4000_v18 = vpack.c.bf16 %v914_v16, %v910_v17  ;;  %v909_v19 = vld [vmem:[#allocation3 + $0x40] sm:$0xff]  ;;  %v4029_v16 = vpack.c.bf16 %v954_v11, %v950_v7 }
 0x184   :  { %v949_v17 = vld [vmem:[#allocation3 + $0x180] sm:$0xff] }
 0x185   :  { %2819 = vmatprep.subr.bf16.mxu0 %v4000_v18 }
 0x186   :  { %2877 = vmatpush1.bf16.msra.mxu1 %v3905_v21  ;;  %v913_v21 = vld [vmem:[#allocation3 + $0x60] sm:$0xff] }
 0x187   :  { %2911 = vmatprep.subr.bf16.mxu1 %v3842_v40  ;;  %v4002_v39 = vpack.c.bf16 %v913_v21, %v909_v19  ;;  %v918_v40 = vld [vmem:[#allocation3 + $0x88] sm:$0xff]  ;;  %v953_v19 = vld [vmem:[#allocation3 + $0x1a0] sm:$0xff] }
 0x188   :  { %v4006_v50 = vpack.c.bf16 %v922_v44, %v918_v40  ;;  %v958_v21 = vld [vmem:[#allocation3 + $0x1c8] sm:$0xff]  ;;  %v4032_v44 = vpack.c.bf16 %v953_v19, %v949_v17 }
 0x189   :  { %2821 = vmatpush1.bf16.msra.mxu0 %v4002_v39  ;;  %v962_v40 = vld [vmem:[#allocation3 + $0x1e8] sm:$0xff] }
 0x18a   :  { %2823 = vmatprep.subr.bf16.mxu0 %v4006_v50  ;;  %v4035_v24 = vpack.c.bf16 %v962_v40, %v958_v21 }
 0x18d   :  { %2825 = vmatpush1.bf16.msra.mxu0 %v4008_v31 }
 0x18e   :  { %2827 = vmatprep.subr.bf16.mxu0 %v4012_v33 }
 0x191   :  { %2829 = vmatpush1.bf16.msra.mxu0 %v4014_v23 }
 0x192   :  { %2831 = vmatprep.subr.bf16.mxu0 %v4018_v25 }
 0x195   :  { %2833 = vmatpush1.bf16.msra.mxu0 %v4020_v45 }
 0x196   :  { %2835 = vmatprep.subr.bf16.mxu0 %v4024_v56 }
 0x199   :  { %2837 = vmatpush1.bf16.msra.mxu0 %v4026_v3 }
 0x19a   :  { %2839 = vmatprep.subr.bf16.mxu0 %v4029_v16 }
 0x19d   :  { %2841 = vmatpush1.bf16.msra.mxu0 %v4032_v44 }
 0x19e   :  { %2843 = vmatprep.subr.bf16.mxu0 %v4035_v24 }
 0x1a1   :  { %2845 = vmatpush1.bf16.msra.mxu0 %v4038_v52 }
 0x1a2   :  { %2879 = vmatprep.subr.bf16.mxu0 %v3994_v13 }
 0x23c   :  { %v788_v57 = vpop.f32.mrb[2].mxu0  ;;  %v859_v1 = vpop.f32.mrb[18].mxu1 }
 0x23d   :  { %v864_v6 = vadd.f32 %v788_v57, %v3933_v38  ;;  %v790_v36 = vpop.f32.mrb[3].mxu0  ;;  %v861_v37 = vpop.f32.mrb[19].mxu1  ;;  %v3264_v60 = vadd.f32 %v859_v1, %v3961_v27 }
 0x23e   :  { %v865_v42 = vadd.f32 %v790_v36, %v3935_v43  ;;  %v3265_v9 = vadd.f32 %v861_v37, %v3963_v30 }
 0x23f   :  { %v2525_v47 = vmul.f32 -1.442695, %v864_v6  ;;  %v2527_v7 = vmul.f32 -1.442695, %v3264_v60 }
 0x240   :  { %v2526_v54 = vmul.f32 -1.442695, %v865_v42 }
 0x241   :  { %3314 = vpow2.f32 %v2525_v47 }
 0x242   :  { %3316 = vpow2.f32 %v2526_v54 }
 0x243   :  { %3318 = vtanh.f32 %v3265_v9 }
 0x244   :  { %3320 = vpow2.f32 %v2527_v7 }
 0x24b   :  { %v3315_v11 = vpop.eup %3314 }
 0x24c   :  { %v877_v17 = vadd.f32 1.0, %v3315_v11  ;;  %v3317_v19 = vpop.eup %3316 }
 0x24d   :  { %v878_v38 = vadd.f32 1.0, %v3317_v19  ;;  %v3319_v21 = vpop.eup %3318 }
 0x24e   :  { %3322 = vrcp.f32 %v877_v17  ;;  %v3321_v40 = vpop.eup %3320 }
 0x24f   :  { %3324 = vrcp.f32 %v878_v38  ;;  %v879_v57 = vadd.f32 1.0, %v3321_v40 }
 0x251   :  { %3326 = vrcp.f32 %v879_v57 }
 0x258   :  { %v3323_v43 = vpop.eup %3322 }
 0x259   :  { %v888_v28 = vmul.f32 %v3323_v43, %v3319_v21  ;;  %v3325_v32 = vpop.eup %3324 }
 0x25a   :  { %v887_v6 = vmul.f32 %v3325_v32, %v3970_v51 }
 0x25b   :  { %v3327_v36 = vpop.eup %3326 }
 0x25c   :  { %v4048_v1 = vadd.f32 %v888_v28, %v887_v6 }
 0x25e   :  { %3328 = vtanh.f32 %v4048_v1 }
 0x268   :  { %v3329_v37 = vpop.eup %3328 }
 0x269   :  { %v891_v42 = vmul.f32 %v3329_v37, %v3327_v36 }
 0x26b   :  { %2528 = vst [vmem:[%s4455_s8 + $0x8] sm:$0xff] %v891_v42  ;;  %1030 = vmatmul.mubr.f32.vlgmr.msra.gmra.mrb[4].mxu0 %v891_v42  ;;  %1101 = vmatmul.mubr.f32.vlgmr.msra.gmra.mrb[20].mxu1 %v891_v42 }
 0x26c   :  { %2881 = vmatpush1.bf16.msra.mxu0 %v3996_v35  ;;  %2913 = vmatpush1.bf16.msra.mxu1 %v3848_v20  ;;  %v1194_v20 = vld [vmem:[#allocation3 + $0x190] sm:$0xff] }
 0x26d   :  { %2883 = vmatprep.subr.bf16.mxu0 %v4000_v18  ;;  %2915 = vmatprep.subr.bf16.mxu1 %v3851_v46  ;;  %v1198_v46 = vld [vmem:[#allocation3 + $0x1b0] sm:$0xff] }
 0x26e   :  { %1272 = vmatprep.mubr.f32.mxu0 %v3453_v0  ;;  %1343 = vmatprep.mubr.f32.mxu1 %v3453_v0 }
 0x270   :  { %2885 = vmatpush1.bf16.msra.mxu0 %v4002_v39  ;;  %2917 = vmatpush1.bf16.msra.mxu1 %v3857_v29  ;;  %v1203_v29 = vld [vmem:[#allocation3 + $0x1d8] sm:$0xff] }
 0x271   :  { %2887 = vmatprep.subr.bf16.mxu0 %v4006_v50  ;;  %2919 = vmatprep.subr.bf16.mxu1 %v3860_v34  ;;  %v4084_v34 = vpack.c.bf16 %v1198_v46, %v1194_v20  ;;  %v1394_v46 = vld [vmem:[#allocation3 + $0x38] sm:$0xff] }
 0x274   :  { %2889 = vmatpush1.bf16.msra.mxu0 %v4008_v31  ;;  %2921 = vmatpush1.bf16.msra.mxu1 %v3865_v41  ;;  %v1207_v41 = vld [vmem:[#allocation3 + $0x1f8] sm:$0xff] }
 0x275   :  { %2891 = vmatprep.subr.bf16.mxu0 %v4012_v33  ;;  %2923 = vmatprep.subr.bf16.mxu1 %v3868_v48  ;;  %v1202_v48 = vld [vmem:[#allocation3 + $0x1d0] sm:$0xff] }
 0x278   :  { %2893 = vmatpush1.bf16.msra.mxu0 %v4014_v23  ;;  %2925 = vmatpush1.bf16.msra.mxu1 %v3873_v58  ;;  %v1206_v58 = vld [vmem:[#allocation3 + $0x1f0] sm:$0xff] }
 0x279   :  { %2895 = vmatprep.subr.bf16.mxu0 %v4018_v25  ;;  %2927 = vmatprep.subr.bf16.mxu1 %v3876_v63  ;;  %v4086_v63 = vpack.c.bf16 %v1207_v41, %v1203_v29  ;;  %v1389_v41 = vld [vmem:[#allocation3 + $0x10] sm:$0xff] }
 0x27c   :  { %2897 = vmatpush1.bf16.msra.mxu0 %v4020_v45  ;;  %2929 = vmatpush1.bf16.msra.mxu1 %v3881_v2  ;;  %v4089_v2 = vpack.c.bf16 %v1206_v58, %v1202_v48  ;;  %v1393_v48 = vld [vmem:[#allocation3 + $0x30] sm:$0xff] }
 0x27d   :  { %2899 = vmatprep.subr.bf16.mxu0 %v4024_v56  ;;  %2931 = vmatprep.subr.bf16.mxu1 %v3884_v22  ;;  %v4124_v58 = vpack.c.bf16 %v1393_v48, %v1389_v41  ;;  %v1433_v41 = vld [vmem:[#allocation3 + $0x170] sm:$0xff] }
 0x280   :  { %2901 = vmatpush1.bf16.msra.mxu0 %v4026_v3  ;;  %2933 = vmatpush1.bf16.msra.mxu1 %v3889_v8 }
 0x281   :  { %2903 = vmatprep.subr.bf16.mxu0 %v4029_v16  ;;  %2935 = vmatprep.subr.bf16.mxu1 %v3892_v26 }
 0x284   :  { %2905 = vmatpush1.bf16.msra.mxu0 %v4032_v44  ;;  %2937 = vmatpush1.bf16.msra.mxu1 %v4084_v34 }
 0x285   :  { %2907 = vmatprep.subr.bf16.mxu0 %v4035_v24  ;;  %2939 = vmatprep.subr.bf16.mxu1 %v4086_v63 }
 0x288   :  { %2909 = vmatpush1.bf16.msra.mxu0 %v4038_v52  ;;  %2941 = vmatpush1.bf16.msra.mxu1 %v4089_v2 }
 0x289   :  { %2943 = vmatprep.subr.bf16.mxu0 %v3994_v13 }
 0x33e   :  { %v1031_v22 = vpop.f32.mrb[4].mxu0  ;;  %v1102_v8 = vpop.f32.mrb[20].mxu1 }
 0x33f   :  { %v1107_v26 = vadd.f32 %v1031_v22, %v3937_v15  ;;  %v1033_v51 = vpop.f32.mrb[5].mxu0  ;;  %v1104_v47 = vpop.f32.mrb[21].mxu1  ;;  %v3266_v7 = vadd.f32 %v1102_v8, %v3961_v27  ;;  %v1398_v22 = vld [vmem:[#allocation3 + $0x58] sm:$0xff] }
 0x340   :  { %v1108_v54 = vadd.f32 %v1033_v51, %v3939_v49  ;;  %v3267_v11 = vadd.f32 %v1104_v47, %v3963_v30  ;;  %v1402_v8 = vld [vmem:[#allocation3 + $0x78] sm:$0xff]  ;;  %v1397_v51 = vld [vmem:[#allocation3 + $0x50] sm:$0xff] }
 0x341   :  { %v2529_v60 = vmul.f32 -1.442695, %v1107_v26  ;;  %v2531_v17 = vmul.f32 -1.442695, %v3266_v7  ;;  %v4128_v26 = vpack.c.bf16 %v1402_v8, %v1398_v22  ;;  %v1401_v47 = vld [vmem:[#allocation3 + $0x70] sm:$0xff]  ;;  %v1438_v22 = vld [vmem:[#allocation3 + $0x198] sm:$0xff] }
 0x342   :  { %v2530_v9 = vmul.f32 -1.442695, %v1108_v54  ;;  %v4130_v54 = vpack.c.bf16 %v1401_v47, %v1397_v51  ;;  %v1405_v7 = vld [vmem:[#allocation3 + $0x90] sm:$0xff]  ;;  %v1442_v8 = vld [vmem:[#allocation3 + $0x1b8] sm:$0xff] }
 0x343   :  { %3330 = vpow2.f32 %v2529_v60  ;;  %v1410_v60 = vld [vmem:[#allocation3 + $0xb8] sm:$0xff]  ;;  %v4157_v51 = vpack.c.bf16 %v1442_v8, %v1438_v22 }
 0x344   :  { %3332 = vpow2.f32 %v2530_v9 }
 0x345   :  { %3334 = vtanh.f32 %v3267_v11  ;;  %v1409_v11 = vld [vmem:[#allocation3 + $0xb0] sm:$0xff] }
 0x346   :  { %3336 = vpow2.f32 %v2531_v17  ;;  %v4136_v17 = vpack.c.bf16 %v1409_v11, %v1405_v7 }
 0x34d   :  { %v3331_v19 = vpop.eup %3330 }
 0x34e   :  { %v1120_v38 = vadd.f32 1.0, %v3331_v19  ;;  %v3333_v21 = vpop.eup %3332  ;;  %v1414_v19 = vld [vmem:[#allocation3 + $0xd8] sm:$0xff] }
 0x34f   :  { %v1121_v15 = vadd.f32 1.0, %v3333_v21  ;;  %v3335_v40 = vpop.eup %3334 }
 0x350   :  { %3338 = vrcp.f32 %v1120_v38  ;;  %v3337_v43 = vpop.eup %3336  ;;  %v1418_v38 = vld [vmem:[#allocation3 + $0xf8] sm:$0xff] }
 0x351   :  { %3340 = vrcp.f32 %v1121_v15  ;;  %v1122_v57 = vadd.f32 1.0, %v3337_v43  ;;  %v4140_v21 = vpack.c.bf16 %v1418_v38, %v1414_v19  ;;  %v1413_v15 = vld [vmem:[#allocation3 + $0xd0] sm:$0xff] }
 0x353   :  { %3342 = vrcp.f32 %v1122_v57  ;;  %v1421_v57 = vld [vmem:[#allocation3 + $0x110] sm:$0xff] }
 0x35a   :  { %v3339_v49 = vpop.eup %3338 }
 0x35b   :  { %v1131_v28 = vmul.f32 %v3339_v49, %v3335_v40  ;;  %v3341_v32 = vpop.eup %3340  ;;  %v1417_v40 = vld [vmem:[#allocation3 + $0xf0] sm:$0xff]  ;;  %v1422_v49 = vld [vmem:[#allocation3 + $0x118] sm:$0xff] }
 0x35c   :  { %v1130_v6 = vmul.f32 %v3341_v32, %v4048_v1  ;;  %v1390_v1 = vld [vmem:[#allocation3 + $0x18] sm:$0xff]  ;;  %v4142_v43 = vpack.c.bf16 %v1417_v40, %v1413_v15 }
 0x35d   :  { %v3343_v37 = vpop.eup %3342  ;;  %v4122_v29 = vpack.c.bf16 %v1394_v46, %v1390_v1  ;;  %v1429_v46 = vld [vmem:[#allocation3 + $0x150] sm:$0xff] }
 0x35e   :  { %v4098_v36 = vadd.f32 %v1131_v28, %v1130_v6  ;;  %v1426_v28 = vld [vmem:[#allocation3 + $0x138] sm:$0xff]  ;;  %v1425_v6 = vld [vmem:[#allocation3 + $0x130] sm:$0xff]  ;;  %v4154_v48 = vpack.c.bf16 %v1433_v41, %v1429_v46 }
 0x35f   :  { %2975 = vmatprep.subr.bf16.mxu1 %v4122_v29  ;;  %v4146_v32 = vpack.c.bf16 %v1426_v28, %v1422_v49 }
 0x360   :  { %3344 = vtanh.f32 %v4098_v36 }
 0x36a   :  { %v3345_v42 = vpop.eup %3344 }
 0x36b   :  { %v1134_v20 = vmul.f32 %v3345_v42, %v3343_v37  ;;  %v4148_v37 = vpack.c.bf16 %v1425_v6, %v1421_v57  ;;  %v1430_v42 = vld [vmem:[#allocation3 + $0x158] sm:$0xff] }
 0x36d   :  { %2532 = vst [vmem:[%s4455_s8 + $0x10] sm:$0xff] %v1134_v20  ;;  %1273 = vmatmul.mubr.f32.vlgmr.msra.gmra.mrb[6].mxu0 %v1134_v20  ;;  %1344 = vmatmul.mubr.f32.vlgmr.msra.gmra.mrb[22].mxu1 %v1134_v20  ;;  %v1434_v20 = vld [vmem:[#allocation3 + $0x178] sm:$0xff] }
 0x36e   :  { %2945 = vmatpush1.bf16.msra.mxu0 %v3996_v35  ;;  %1515 = vmatprep.mubr.f32.mxu0 %v3453_v0  ;;  %v4152_v1 = vpack.c.bf16 %v1434_v20, %v1430_v42 }
 0x36f   :  { %2947 = vmatprep.subr.bf16.mxu0 %v4000_v18  ;;  %1586 = vmatprep.mubr.f32.mxu1 %v3453_v0 }
 0x370   :  { %2977 = vmatpush1.bf16.msra.mxu1 %v4124_v58 }
 0x371   :  { %2979 = vmatprep.subr.bf16.mxu1 %v4128_v26 }
 0x372   :  { %2949 = vmatpush1.bf16.msra.mxu0 %v4002_v39 }
 0x373   :  { %2951 = vmatprep.subr.bf16.mxu0 %v4006_v50 }
 0x374   :  { %2981 = vmatpush1.bf16.msra.mxu1 %v4130_v54 }
 0x376   :  { %2953 = vmatpush1.bf16.msra.mxu0 %v4008_v31 }
 0x377   :  { %2955 = vmatprep.subr.bf16.mxu0 %v4012_v33 }
 0x37a   :  { %2957 = vmatpush1.bf16.msra.mxu0 %v4014_v23 }
 0x37b   :  { %2959 = vmatprep.subr.bf16.mxu0 %v4018_v25 }
 0x37e   :  { %2961 = vmatpush1.bf16.msra.mxu0 %v4020_v45 }
 0x37f   :  { %2963 = vmatprep.subr.bf16.mxu0 %v4024_v56 }
 0x382   :  { %2965 = vmatpush1.bf16.msra.mxu0 %v4026_v3 }
 0x383   :  { %2967 = vmatprep.subr.bf16.mxu0 %v4029_v16 }
 0x386   :  { %2969 = vmatpush1.bf16.msra.mxu0 %v4032_v44 }
 0x387   :  { %2971 = vmatprep.subr.bf16.mxu0 %v4035_v24 }
 0x38a   :  { %2973 = vmatpush1.bf16.msra.mxu0 %v4038_v52 }
 0x38b   :  { %3007 = vmatprep.subr.bf16.mxu0 %v3994_v13  ;;  %v1406_v13 = vld [vmem:[#allocation3 + $0x98] sm:$0xff] }
 0x38c   :  { %v4134_v9 = vpack.c.bf16 %v1410_v60, %v1406_v13 }
 0x38e   :  { %2983 = vmatprep.subr.bf16.mxu1 %v4134_v9 }
 0x38f   :  { %2985 = vmatpush1.bf16.msra.mxu1 %v4136_v17 }
 0x390   :  { %2987 = vmatprep.subr.bf16.mxu1 %v4140_v21 }
 0x393   :  { %2989 = vmatpush1.bf16.msra.mxu1 %v4142_v43 }
 0x394   :  { %2991 = vmatprep.subr.bf16.mxu1 %v4146_v32 }
 0x397   :  { %2993 = vmatpush1.bf16.msra.mxu1 %v4148_v37 }
 0x398   :  { %2995 = vmatprep.subr.bf16.mxu1 %v4152_v1 }
 0x39b   :  { %2997 = vmatpush1.bf16.msra.mxu1 %v4154_v48 }
 0x39c   :  { %2999 = vmatprep.subr.bf16.mxu1 %v4157_v51 }
 0x39f   :  { %3001 = vmatpush1.bf16.msra.mxu1 %v4084_v34 }
 0x3a0   :  { %3003 = vmatprep.subr.bf16.mxu1 %v4086_v63 }
 0x3a3   :  { %3005 = vmatpush1.bf16.msra.mxu1 %v4089_v2 }
 0x3a4   :  { %3039 = vmatprep.subr.bf16.mxu1 %v4122_v29 }
 0x440   :  { %v1274_v47 = vpop.f32.mrb[6].mxu0  ;;  %v1345_v13 = vpop.f32.mrb[22].mxu1 }
 0x441   :  { %v1350_v60 = vadd.f32 %v1274_v47, %v3941_v53  ;;  %v1276_v7 = vpop.f32.mrb[7].mxu0  ;;  %v1347_v11 = vpop.f32.mrb[23].mxu1  ;;  %v3268_v40 = vadd.f32 %v1345_v13, %v3961_v27 }
 0x442   :  { %v1351_v19 = vadd.f32 %v1276_v7, %v3943_v55  ;;  %v3269_v49 = vadd.f32 %v1347_v11, %v3963_v30 }
 0x443   :  { %v2533_v38 = vmul.f32 -1.442695, %v1350_v60  ;;  %v2535_v28 = vmul.f32 -1.442695, %v3268_v40 }
 0x444   :  { %v2534_v15 = vmul.f32 -1.442695, %v1351_v19 }
 0x445   :  { %3346 = vpow2.f32 %v2533_v38 }
 0x446   :  { %3348 = vpow2.f32 %v2534_v15 }
 0x447   :  { %3350 = vtanh.f32 %v3269_v49 }
 0x448   :  { %3352 = vpow2.f32 %v2535_v28 }
 0x44f   :  { %v3347_v57 = vpop.eup %3346 }
 0x450   :  { %v1363_v6 = vadd.f32 1.0, %v3347_v57  ;;  %v3349_v42 = vpop.eup %3348 }
 0x451   :  { %v1364_v53 = vadd.f32 1.0, %v3349_v42  ;;  %v3351_v20 = vpop.eup %3350  ;;  %v1874_v42 = vld [vmem:[#allocation3 + $0x8] sm:$0xff] }
 0x452   :  { %3354 = vrcp.f32 %v1363_v6  ;;  %v3353_v46 = vpop.eup %3352 }
 0x453   :  { %3356 = vrcp.f32 %v1364_v53  ;;  %v1365_v8 = vadd.f32 1.0, %v3353_v46  ;;  %v1878_v53 = vld [vmem:[#allocation3 + $0x28] sm:$0xff]  ;;  %v1873_v46 = vld [vmem:[#allocation3] sm:$0xff] }
 0x455   :  { %3358 = vrcp.f32 %v1365_v8  ;;  %v1886_v8 = vld [vmem:[#allocation3 + $0x68] sm:$0xff] }
 0x45c   :  { %v3355_v55 = vpop.eup %3354 }
 0x45d   :  { %v1374_v41 = vmul.f32 %v3355_v55, %v3351_v20  ;;  %v3357_v22 = vpop.eup %3356  ;;  %v3070_v20 = vpack.c.bf16 %v1878_v53, %v1874_v42  ;;  %v1877_v55 = vld [vmem:[#allocation3 + $0x20] sm:$0xff]  ;;  %v1930_v42 = vld [vmem:[#allocation3 + $0x1c8] sm:$0xff] }
 0x45e   :  { %v1373_v47 = vmul.f32 %v3357_v22, %v4098_v36  ;;  %v1882_v22 = vld [vmem:[#allocation3 + $0x48] sm:$0xff] }
 0x45f   :  { %v3359_v60 = vpop.eup %3358  ;;  %v1934_v53 = vld [vmem:[#allocation3 + $0x1e8] sm:$0xff] }
 0x460   :  { %v4170_v13 = vadd.f32 %v1374_v41, %v1373_v47  ;;  %v4243_v41 = vpack.c.bf16 %v1877_v55, %v1873_v46  ;;  %v4246_v47 = vpack.c.bf16 %v1886_v8, %v1882_v22  ;;  %v4281_v55 = vpack.c.bf16 %v1934_v53, %v1930_v42  ;;  %v1929_v22 = vld [vmem:[#allocation3 + $0x1c0] sm:$0xff] }
 0x461   :  { %v1933_v8 = vld [vmem:[#allocation3 + $0x1e0] sm:$0xff] }
 0x462   :  { %3360 = vtanh.f32 %v4170_v13 }
 0x46c   :  { %v3361_v7 = vpop.eup %3360 }
 0x46d   :  { %v1377_v11 = vmul.f32 %v3361_v7, %v3359_v60  ;;  %v1889_v7 = vld [vmem:[#allocation3 + $0x80] sm:$0xff] }
 0x46f   :  { %2536 = vst [vmem:[%s4455_s8 + $0x18] sm:$0xff] %v1377_v11  ;;  %1516 = vmatmul.mubr.f32.vlgmr.msra.gmra.mrb[8].mxu0 %v1377_v11  ;;  %1587 = vmatmul.mubr.f32.vlgmr.msra.gmra.mrb[24].mxu1 %v1377_v11  ;;  %v1893_v11 = vld [vmem:[#allocation3 + $0xa0] sm:$0xff] }
 0x470   :  { %3009 = vmatpush1.bf16.msra.mxu0 %v3996_v35  ;;  %3041 = vmatpush1.bf16.msra.mxu1 %v4124_v58 }
 0x471   :  { %3011 = vmatprep.subr.bf16.mxu0 %v4000_v18  ;;  %3043 = vmatprep.subr.bf16.mxu1 %v4128_v26 }
 0x472   :  { %1758 = vmatprep.mubr.f32.mxu0 %v3453_v0  ;;  %1829 = vmatprep.mubr.f32.mxu1 %v3453_v0 }
 0x474   :  { %3013 = vmatpush1.bf16.msra.mxu0 %v4002_v39  ;;  %3045 = vmatpush1.bf16.msra.mxu1 %v4130_v54 }
 0x475   :  { %3015 = vmatprep.subr.bf16.mxu0 %v4006_v50  ;;  %3047 = vmatprep.subr.bf16.mxu1 %v4134_v9 }
 0x478   :  { %3017 = vmatpush1.bf16.msra.mxu0 %v4008_v31  ;;  %3049 = vmatpush1.bf16.msra.mxu1 %v4136_v17 }
 0x479   :  { %3019 = vmatprep.subr.bf16.mxu0 %v4012_v33  ;;  %3051 = vmatprep.subr.bf16.mxu1 %v4140_v21 }
 0x47c   :  { %3021 = vmatpush1.bf16.msra.mxu0 %v4014_v23  ;;  %3053 = vmatpush1.bf16.msra.mxu1 %v4142_v43 }
 0x47d   :  { %3023 = vmatprep.subr.bf16.mxu0 %v4018_v25  ;;  %3055 = vmatprep.subr.bf16.mxu1 %v4146_v32 }
 0x480   :  { %3025 = vmatpush1.bf16.msra.mxu0 %v4020_v45  ;;  %3057 = vmatpush1.bf16.msra.mxu1 %v4148_v37 }
 0x481   :  { %3027 = vmatprep.subr.bf16.mxu0 %v4024_v56  ;;  %3059 = vmatprep.subr.bf16.mxu1 %v4152_v1 }
 0x484   :  { %3029 = vmatpush1.bf16.msra.mxu0 %v4026_v3  ;;  %3061 = vmatpush1.bf16.msra.mxu1 %v4154_v48 }
 0x485   :  { %3031 = vmatprep.subr.bf16.mxu0 %v4029_v16  ;;  %3063 = vmatprep.subr.bf16.mxu1 %v4157_v51 }
 0x488   :  { %3033 = vmatpush1.bf16.msra.mxu0 %v4032_v44  ;;  %3065 = vmatpush1.bf16.msra.mxu1 %v4084_v34 }
 0x489   :  { %3035 = vmatprep.subr.bf16.mxu0 %v4035_v24  ;;  %3067 = vmatprep.subr.bf16.mxu1 %v4086_v63 }
 0x48c   :  { %3037 = vmatpush1.bf16.msra.mxu0 %v4038_v52  ;;  %3069 = vmatpush1.bf16.msra.mxu1 %v4089_v2 }
 0x48d   :  { %3103 = vmatprep.subr.bf16.mxu1 %v4122_v29  ;;  %3071 = vmatprep.subr.bf16.mxu0 %v3070_v20 }
 0x542   :  { %v1517_v35 = vpop.f32.mrb[8].mxu0  ;;  %v1588_v18 = vpop.f32.mrb[24].mxu1 }
 0x543   :  { %v1593_v39 = vadd.f32 %v1517_v35, %v3945_v59  ;;  %v1519_v50 = vpop.f32.mrb[9].mxu0  ;;  %v1590_v31 = vpop.f32.mrb[25].mxu1  ;;  %v3270_v45 = vadd.f32 %v1588_v18, %v3961_v27  ;;  %v4254_v35 = vpack.c.bf16 %v1893_v11, %v1889_v7  ;;  %v1898_v18 = vld [vmem:[#allocation3 + $0xc8] sm:$0xff] }
 0x544   :  { %v1594_v33 = vadd.f32 %v1519_v50, %v3947_v61  ;;  %v3271_v56 = vadd.f32 %v1590_v31, %v3963_v30  ;;  %v1897_v31 = vld [vmem:[#allocation3 + $0xc0] sm:$0xff] }
 0x545   :  { %v2537_v23 = vmul.f32 -1.442695, %v1593_v39  ;;  %v2539_v3 = vmul.f32 -1.442695, %v3270_v45  ;;  %v1902_v39 = vld [vmem:[#allocation3 + $0xe8] sm:$0xff] }
 0x546   :  { %v2538_v25 = vmul.f32 -1.442695, %v1594_v33  ;;  %v4258_v50 = vpack.c.bf16 %v1902_v39, %v1898_v18  ;;  %v1901_v33 = vld [vmem:[#allocation3 + $0xe0] sm:$0xff]  ;;  %v1910_v45 = vld [vmem:[#allocation3 + $0x128] sm:$0xff] }
 0x547   :  { %3362 = vpow2.f32 %v2537_v23  ;;  %v4260_v23 = vpack.c.bf16 %v1901_v33, %v1897_v31 }
 0x548   :  { %3364 = vpow2.f32 %v2538_v25  ;;  %v1906_v25 = vld [vmem:[#allocation3 + $0x108] sm:$0xff] }
 0x549   :  { %3366 = vtanh.f32 %v3271_v56  ;;  %v4264_v56 = vpack.c.bf16 %v1910_v45, %v1906_v25 }
 0x54a   :  { %3368 = vpow2.f32 %v2539_v3  ;;  %v1905_v3 = vld [vmem:[#allocation3 + $0x100] sm:$0xff] }
 0x551   :  { %v3363_v16 = vpop.eup %3362 }
 0x552   :  { %v1606_v44 = vadd.f32 1.0, %v3363_v16  ;;  %v3365_v24 = vpop.eup %3364  ;;  %v1909_v16 = vld [vmem:[#allocation3 + $0x120] sm:$0xff] }
 0x553   :  { %v1607_v59 = vadd.f32 1.0, %v3365_v24  ;;  %v3367_v52 = vpop.eup %3366  ;;  %v1914_v24 = vld [vmem:[#allocation3 + $0x148] sm:$0xff] }
 0x554   :  { %3370 = vrcp.f32 %v1606_v44  ;;  %v3369_v36 = vpop.eup %3368  ;;  %v4266_v44 = vpack.c.bf16 %v1909_v16, %v1905_v3 }
 0x555   :  { %3372 = vrcp.f32 %v1607_v59  ;;  %v1608_v15 = vadd.f32 1.0, %v3369_v36  ;;  %v1918_v59 = vld [vmem:[#allocation3 + $0x168] sm:$0xff]  ;;  %v1913_v36 = vld [vmem:[#allocation3 + $0x140] sm:$0xff] }
 0x557   :  { %3374 = vrcp.f32 %v1608_v15  ;;  %v1926_v15 = vld [vmem:[#allocation3 + $0x1a8] sm:$0xff] }
 0x55e   :  { %v3371_v61 = vpop.eup %3370 }
 0x55f   :  { %v1617_v19 = vmul.f32 %v3371_v61, %v3367_v52  ;;  %v3373_v38 = vpop.eup %3372  ;;  %v4270_v52 = vpack.c.bf16 %v1918_v59, %v1914_v24  ;;  %v1917_v61 = vld [vmem:[#allocation3 + $0x160] sm:$0xff] }
 0x560   :  { %v1616_v40 = vmul.f32 %v3373_v38, %v4170_v13  ;;  %v1922_v38 = vld [vmem:[#allocation3 + $0x188] sm:$0xff] }
 0x561   :  { %v3375_v28 = vpop.eup %3374 }
 0x562   :  { %v4214_v49 = vadd.f32 %v1617_v19, %v1616_v40  ;;  %v4272_v19 = vpack.c.bf16 %v1917_v61, %v1913_v36  ;;  %v1921_v40 = vld [vmem:[#allocation3 + $0x180] sm:$0xff] }
 0x564   :  { %3376 = vtanh.f32 %v4214_v49 }
 0x56e   :  { %v3377_v57 = vpop.eup %3376 }
 0x56f   :  { %v4217_v6 = vmul.f32 %v3377_v57, %v3375_v28  ;;  %v4275_v28 = vpack.c.bf16 %v1926_v15, %v1922_v38  ;;  %v1925_v57 = vld [vmem:[#allocation3 + $0x1a0] sm:$0xff] }
 0x570   :  { %v4278_v46 = vpack.c.bf16 %v1925_v57, %v1921_v40 }
 0x571   :  { %2540 = vst [vmem:[%s4455_s8 + $0x20] sm:$0xff] %v4217_v6  ;;  %1759 = vmatmul.mubr.f32.vlgmr.msra.gmra.mrb[10].mxu0 %v4217_v6  ;;  %1830 = vmatmul.mubr.f32.vlgmr.msra.gmra.mrb[26].mxu1 %v4217_v6 }
 0x572   :  { %3105 = vmatpush1.bf16.msra.mxu1 %v4124_v58  ;;  %2001 = vmatprep.mubr.f32.mxu0 %v3453_v0 }
 0x573   :  { %3107 = vmatprep.subr.bf16.mxu1 %v4128_v26  ;;  %2072 = vmatprep.mubr.f32.mxu1 %v3453_v0 }
 0x574   :  { %3073 = vmatpush1.bf16.msra.mxu0 %v4243_v41 }
 0x575   :  { %3075 = vmatprep.subr.bf16.mxu0 %v4246_v47 }
 0x576   :  { %3109 = vmatpush1.bf16.msra.mxu1 %v4130_v54 }
 0x577   :  { %3111 = vmatprep.subr.bf16.mxu1 %v4134_v9 }
 0x57a   :  { %3113 = vmatpush1.bf16.msra.mxu1 %v4136_v17 }
 0x57b   :  { %3115 = vmatprep.subr.bf16.mxu1 %v4140_v21 }
 0x57e   :  { %3117 = vmatpush1.bf16.msra.mxu1 %v4142_v43 }
 0x57f   :  { %3119 = vmatprep.subr.bf16.mxu1 %v4146_v32 }
 0x582   :  { %3121 = vmatpush1.bf16.msra.mxu1 %v4148_v37 }
 0x583   :  { %3123 = vmatprep.subr.bf16.mxu1 %v4152_v1 }
 0x586   :  { %3125 = vmatpush1.bf16.msra.mxu1 %v4154_v48 }
 0x587   :  { %3127 = vmatprep.subr.bf16.mxu1 %v4157_v51 }
 0x58a   :  { %3129 = vmatpush1.bf16.msra.mxu1 %v4084_v34  ;;  %v1881_v34 = vld [vmem:[#allocation3 + $0x40] sm:$0xff] }
 0x58b   :  { %3131 = vmatprep.subr.bf16.mxu1 %v4086_v63  ;;  %v1885_v63 = vld [vmem:[#allocation3 + $0x60] sm:$0xff] }
 0x58c   :  { %v4248_v13 = vpack.c.bf16 %v1885_v63, %v1881_v34  ;;  %v4284_v34 = vpack.c.bf16 %v1933_v8, %v1929_v22 }
 0x58e   :  { %3133 = vmatpush1.bf16.msra.mxu1 %v4089_v2  ;;  %3077 = vmatpush1.bf16.msra.mxu0 %v4248_v13  ;;  %v1890_v2 = vld [vmem:[#allocation3 + $0x88] sm:$0xff] }
 0x58f   :  { %3167 = vmatprep.subr.bf16.mxu1 %v4122_v29  ;;  %v1894_v29 = vld [vmem:[#allocation3 + $0xa8] sm:$0xff] }
 0x590   :  { %v4252_v60 = vpack.c.bf16 %v1894_v29, %v1890_v2 }
 0x592   :  { %3079 = vmatprep.subr.bf16.mxu0 %v4252_v60 }
 0x593   :  { %3081 = vmatpush1.bf16.msra.mxu0 %v4254_v35 }
 0x594   :  { %3083 = vmatprep.subr.bf16.mxu0 %v4258_v50 }
 0x597   :  { %3085 = vmatpush1.bf16.msra.mxu0 %v4260_v23 }
 0x598   :  { %3087 = vmatprep.subr.bf16.mxu0 %v4264_v56 }
 0x59b   :  { %3089 = vmatpush1.bf16.msra.mxu0 %v4266_v44 }
 0x59c   :  { %3091 = vmatprep.subr.bf16.mxu0 %v4270_v52 }
 0x59f   :  { %3093 = vmatpush1.bf16.msra.mxu0 %v4272_v19 }
 0x5a0   :  { %3095 = vmatprep.subr.bf16.mxu0 %v4275_v28 }
 0x5a3   :  { %3097 = vmatpush1.bf16.msra.mxu0 %v4278_v46 }
 0x5a4   :  { %3099 = vmatprep.subr.bf16.mxu0 %v4281_v55 }
 0x5a7   :  { %3101 = vmatpush1.bf16.msra.mxu0 %v4284_v34 }
 0x5a8   :  { %3135 = vmatprep.subr.bf16.mxu0 %v3070_v20 }
 0x644   :  { %v1760_v63 = vpop.f32.mrb[10].mxu0  ;;  %v1831_v2 = vpop.f32.mrb[26].mxu1 }
 0x645   :  { %v1836_v29 = vadd.f32 %v1760_v63, %v3949_v62  ;;  %v1762_v7 = vpop.f32.mrb[11].mxu0  ;;  %v1833_v11 = vpop.f32.mrb[27].mxu1  ;;  %v3272_v33 = vadd.f32 %v1831_v2, %v3961_v27 }
 0x646   :  { %v1837_v18 = vadd.f32 %v1762_v7, %v3951_v4  ;;  %v3273_v25 = vadd.f32 %v1833_v11, %v3963_v30  ;;  %v2365_v7 = vld [vmem:[%s4453_s6 + $0x18] sm:$0xff] }
 0x647   :  { %v2541_v39 = vmul.f32 -1.442695, %v1836_v29  ;;  %v2543_v45 = vmul.f32 -1.442695, %v3272_v33  ;;  %v2364_v29 = vld [vmem:[%s4453_s6 + $0x10] sm:$0xff]  ;;  %v2366_v33 = vld [vmem:[%s4453_s6 + $0x20] sm:$0xff] }
 0x648   :  { %v2542_v31 = vmul.f32 -1.442695, %v1837_v18 }
 0x649   :  { %3378 = vpow2.f32 %v2541_v39 }
 0x64a   :  { %3380 = vpow2.f32 %v2542_v31  ;;  %v3202_v31 = vpack.c.bf16 %v2365_v7, %v2364_v29 }
 0x64b   :  { %3382 = vtanh.f32 %v3273_v25  ;;  %v2367_v25 = vld [vmem:[%s4453_s6 + $0x28] sm:$0xff] }
 0x64c   :  { %3384 = vpow2.f32 %v2543_v45  ;;  %v2354_v45 = vld [vmem:[%s4455_s8] sm:$0xff] }
 0x653   :  { %v3379_v3 = vpop.eup %3378 }
 0x654   :  { %v1849_v16 = vadd.f32 1.0, %v3379_v3  ;;  %v3381_v20 = vpop.eup %3380  ;;  %v3206_v3 = vpack.c.bf16 %v2367_v25, %v2366_v33 }
 0x655   :  { %v1850_v62 = vadd.f32 1.0, %v3381_v20  ;;  %v3383_v24 = vpop.eup %3382  ;;  %v2369_v20 = vld [vmem:[%s4453_s6 + $0x38] sm:$0xff] }
 0x656   :  { %3386 = vrcp.f32 %v1849_v16  ;;  %v3385_v59 = vpop.eup %3384  ;;  %v2368_v16 = vld [vmem:[%s4453_s6 + $0x30] sm:$0xff] }
 0x657   :  { %3388 = vrcp.f32 %v1850_v62  ;;  %v1851_v38 = vadd.f32 1.0, %v3385_v59  ;;  %v3210_v62 = vpack.c.bf16 %v2369_v20, %v2368_v16  ;;  %v2371_v59 = vld [vmem:[%s4453_s6 + $0x48] sm:$0xff] }
 0x659   :  { %3390 = vrcp.f32 %v1851_v38 }
 0x660   :  { %v3387_v4 = vpop.eup %3386 }
 0x661   :  { %v1860_v36 = vmul.f32 %v3387_v4, %v3383_v24  ;;  %v3389_v61 = vpop.eup %3388  ;;  %v2370_v24 = vld [vmem:[%s4453_s6 + $0x40] sm:$0xff] }
 0x662   :  { %v1859_v15 = vmul.f32 %v3389_v61, %v4214_v49  ;;  %v3214_v4 = vpack.c.bf16 %v2371_v59, %v2370_v24  ;;  %v2373_v61 = vld [vmem:[%s4453_s6 + $0x58] sm:$0xff] }
 0x663   :  { %v3391_v57 = vpop.eup %3390 }
 0x664   :  { %v4293_v40 = vadd.f32 %v1860_v36, %v1859_v15  ;;  %v2372_v36 = vld [vmem:[%s4453_s6 + $0x50] sm:$0xff]  ;;  %v2374_v15 = vld [vmem:[%s4453_s6 + $0x60] sm:$0xff] }
 0x665   :  { %v3218_v38 = vpack.c.bf16 %v2373_v61, %v2372_v36 }
 0x666   :  { %3392 = vtanh.f32 %v4293_v40 }
 0x670   :  { %v3393_v42 = vpop.eup %3392 }
 0x671   :  { %v4296_v53 = vmul.f32 %v3393_v42, %v3391_v57  ;;  %v2376_v42 = vld [vmem:[%s4453_s6 + $0x70] sm:$0xff] }
 0x673   :  { %2544 = vst [vmem:[%s4455_s8 + $0x28] sm:$0xff] %v4296_v53  ;;  %2002 = vmatmul.mubr.f32.vlgmr.msra.gmra.mrb[12].mxu0 %v4296_v53  ;;  %2073 = vmatmul.mubr.f32.vlgmr.msra.gmra.mrb[28].mxu1 %v4296_v53 }
 0x674   :  { %3137 = vmatpush1.bf16.msra.mxu0 %v4243_v41  ;;  %3169 = vmatpush1.bf16.msra.mxu1 %v4124_v58  ;;  %v2170_v58 = vld [vmem:[#allocation3 + $0x1b0] sm:$0xff] }
 0x675   :  { %3139 = vmatprep.subr.bf16.mxu0 %v4246_v47  ;;  %3171 = vmatprep.subr.bf16.mxu1 %v4128_v26  ;;  %v2175_v26 = vld [vmem:[#allocation3 + $0x1d8] sm:$0xff] }
 0x676   :  { %2244 = vmatprep.mubr.f32.mxu0 %v3453_v0  ;;  %2315 = vmatprep.mubr.f32.mxu1 %v3453_v0  ;;  %v2166_v0 = vld [vmem:[#allocation3 + $0x190] sm:$0xff] }
 0x678   :  { %3141 = vmatpush1.bf16.msra.mxu0 %v4248_v13  ;;  %3173 = vmatpush1.bf16.msra.mxu1 %v4130_v54  ;;  %v3192_v54 = vpack.c.bf16 %v2170_v58, %v2166_v0  ;;  %v2377_v0 = vld [vmem:[%s4453_s6 + $0x78] sm:$0xff] }
 0x679   :  { %3143 = vmatprep.subr.bf16.mxu0 %v4252_v60  ;;  %3175 = vmatprep.subr.bf16.mxu1 %v4134_v9  ;;  %v2179_v9 = vld [vmem:[#allocation3 + $0x1f8] sm:$0xff]  ;;  %v3226_v58 = vpack.c.bf16 %v2377_v0, %v2376_v42 }
 0x67c   :  { %3145 = vmatpush1.bf16.msra.mxu0 %v4254_v35  ;;  %3177 = vmatpush1.bf16.msra.mxu1 %v4136_v17  ;;  %v2174_v17 = vld [vmem:[#allocation3 + $0x1d0] sm:$0xff] }
 0x67d   :  { %3147 = vmatprep.subr.bf16.mxu0 %v4258_v50  ;;  %3179 = vmatprep.subr.bf16.mxu1 %v4140_v21  ;;  %v2178_v21 = vld [vmem:[#allocation3 + $0x1f0] sm:$0xff] }
 0x680   :  { %3149 = vmatpush1.bf16.msra.mxu0 %v4260_v23  ;;  %3181 = vmatpush1.bf16.msra.mxu1 %v4142_v43  ;;  %v3194_v43 = vpack.c.bf16 %v2179_v9, %v2175_v26  ;;  %v2355_v26 = vld [vmem:[%s4455_s8 + $0x8] sm:$0xff]  ;;  %v2357_v9 = vld [vmem:[%s4455_s8 + $0x18] sm:$0xff] }
 0x681   :  { %3151 = vmatprep.subr.bf16.mxu0 %v4264_v56  ;;  %3183 = vmatprep.subr.bf16.mxu1 %v4146_v32  ;;  %v2362_v32 = vld [vmem:[%s4453_s6] sm:$0xff] }
 0x684   :  { %3153 = vmatpush1.bf16.msra.mxu0 %v4266_v44  ;;  %3185 = vmatpush1.bf16.msra.mxu1 %v4148_v37  ;;  %v2363_v37 = vld [vmem:[%s4453_s6 + $0x8] sm:$0xff] }
 0x685   :  { %3155 = vmatprep.subr.bf16.mxu0 %v4270_v52  ;;  %3187 = vmatprep.subr.bf16.mxu1 %v4152_v1  ;;  %v3196_v1 = vpack.c.bf16 %v2178_v21, %v2174_v17 }
 0x688   :  { %3157 = vmatpush1.bf16.msra.mxu0 %v4272_v19  ;;  %3189 = vmatpush1.bf16.msra.mxu1 %v4154_v48  ;;  %v3198_v48 = vpack.c.bf16 %v2363_v37, %v2362_v32 }
 0x689   :  { %3159 = vmatprep.subr.bf16.mxu0 %v4275_v28  ;;  %3191 = vmatprep.subr.bf16.mxu1 %v4157_v51 }
 0x68c   :  { %3161 = vmatpush1.bf16.msra.mxu0 %v4278_v46  ;;  %3193 = vmatpush1.bf16.msra.mxu1 %v3192_v54  ;;  %v2356_v54 = vld [vmem:[%s4455_s8 + $0x10] sm:$0xff] }
 0x68d   :  { %3163 = vmatprep.subr.bf16.mxu0 %v4281_v55  ;;  %3195 = vmatprep.subr.bf16.mxu1 %v3194_v43 }
 0x690   :  { %3165 = vmatpush1.bf16.msra.mxu0 %v4284_v34  ;;  %3197 = vmatpush1.bf16.msra.mxu1 %v3196_v1 }
 0x691   :  { %3199 = vmatprep.subr.bf16.mxu0 %v3198_v48 }
 0x746   :  { %v2003_v51 = vpop.f32.mrb[12].mxu0  ;;  %v2074_v49 = vpop.f32.mrb[28].mxu1 }
 0x747   :  { %v2079_v41 = vadd.f32 %v2003_v51, %v3953_v5  ;;  %v2005_v47 = vpop.f32.mrb[13].mxu0  ;;  %v2076_v13 = vpop.f32.mrb[29].mxu1  ;;  %v3274_v23 = vadd.f32 %v2074_v49, %v3961_v27 }
 0x748   :  { %v2080_v60 = vadd.f32 %v2005_v47, %v3955_v10  ;;  %v3275_v56 = vadd.f32 %v2076_v13, %v3963_v30 }
 0x749   :  { %v2545_v35 = vmul.f32 -1.442695, %v2079_v41  ;;  %v2547_v44 = vmul.f32 -1.442695, %v3274_v23 }
 0x74a   :  { %v2546_v50 = vmul.f32 -1.442695, %v2080_v60 }
 0x74b   :  { %3394 = vpow2.f32 %v2545_v35 }
 0x74c   :  { %3396 = vpow2.f32 %v2546_v50 }
 0x74d   :  { %3398 = vtanh.f32 %v3275_v56 }
 0x74e   :  { %3400 = vpow2.f32 %v2547_v44 }
 0x755   :  { %v3395_v52 = vpop.eup %3394 }
 0x756   :  { %v2092_v19 = vadd.f32 1.0, %v3395_v52  ;;  %v3397_v28 = vpop.eup %3396 }
 0x757   :  { %v2093_v5 = vadd.f32 1.0, %v3397_v28  ;;  %v3399_v46 = vpop.eup %3398 }
 0x758   :  { %3402 = vrcp.f32 %v2092_v19  ;;  %v3401_v55 = vpop.eup %3400 }
 0x759   :  { %3404 = vrcp.f32 %v2093_v5  ;;  %v2094_v34 = vadd.f32 1.0, %v3401_v55 }
 0x75b   :  { %3406 = vrcp.f32 %v2094_v34 }
 0x762   :  { %v3403_v10 = vpop.eup %3402 }
 0x763   :  { %v2103_v22 = vmul.f32 %v3403_v10, %v3399_v46  ;;  %v3405_v8 = vpop.eup %3404 }
 0x764   :  { %v2102_v63 = vmul.f32 %v3405_v8, %v4293_v40  ;;  %v2375_v40 = vld [vmem:[%s4453_s6 + $0x68] sm:$0xff] }
 0x765   :  { %v3407_v11 = vpop.eup %3406  ;;  %v3222_v57 = vpack.c.bf16 %v2375_v40, %v2374_v15 }
 0x766   :  { %v4344_v2 = vadd.f32 %v2103_v22, %v2102_v63 }
 0x768   :  { %3408 = vtanh.f32 %v4344_v2 }
 0x772   :  { %v3409_v18 = vpop.eup %3408 }
 0x773   :  { %v2106_v39 = vmul.f32 %v3409_v18, %v3407_v11 }
 0x775   :  { %2548 = vst [vmem:[%s4455_s8 + $0x30] sm:$0xff] %v2106_v39  ;;  %2245 = vmatmul.mubr.f32.vlgmr.msra.gmra.mrb[14].mxu0 %v2106_v39  ;;  %2316 = vmatmul.mubr.f32.vlgmr.msra.gmra.mrb[30].mxu1 %v2106_v39 }
 0x776   :  { %3201 = vmatpush3.bf16.msra.mxu0 %v3198_v48  ;;  %2610 = vmatprep.mubr.f32.mxu0 %v2354_v45 }
 0x777   :  { %3203 = vmatprep.subr.bf16.mxu0 %v3202_v31 }
 0x77a   :  { %3205 = vmatpush3.bf16.msra.mxu0 %v3202_v31 }
 0x77b   :  { %3207 = vmatprep.subr.bf16.mxu0 %v3206_v3 }
 0x77e   :  { %3209 = vmatpush3.bf16.msra.mxu0 %v3206_v3 }
 0x77f   :  { %3211 = vmatprep.subr.bf16.mxu0 %v3210_v62 }
 0x782   :  { %3213 = vmatpush3.bf16.msra.mxu0 %v3210_v62 }
 0x783   :  { %3215 = vmatprep.subr.bf16.mxu0 %v3214_v4 }
 0x786   :  { %3217 = vmatpush3.bf16.msra.mxu0 %v3214_v4 }
 0x787   :  { %3219 = vmatprep.subr.bf16.mxu0 %v3218_v38 }
 0x78a   :  { %3221 = vmatpush3.bf16.msra.mxu0 %v3218_v38 }
 0x78b   :  { %3223 = vmatprep.subr.bf16.mxu0 %v3222_v57 }
 0x78e   :  { %3225 = vmatpush3.bf16.msra.mxu0 %v3222_v57 }
 0x78f   :  { %3227 = vmatprep.subr.bf16.mxu0 %v3226_v58 }
 0x792   :  { %3229 = vmatpush3.bf16.msra.mxu0 %v3226_v58 }
 0x795   :  { %2611 = vmatmul.mubr.f32.vlgmr.msra.gmra.mrb[16].mxu0 %v2355_v26 }
 0x796   :  { %2613 = vmatprep.mubr.f32.mxu0 %v2356_v54 }
 0x799   :  { %2614 = vmatmul.mubr.f32.gmra.mrb[18].mxu0 %v2357_v9 }
 0x79a   :  { %2616 = vmatprep.mubr.f32.mxu0 %v4217_v6 }
 0x79d   :  { %2617 = vmatmul.mubr.f32.gmra.mrb[20].mxu0 %v4296_v53 }
 0x79e   :  { %2619 = vmatprep.mubr.f32.mxu0 %v2106_v39 }
 0x848   :  { %v2246_v17 = vpop.f32.mrb[14].mxu0  ;;  %v2317_v21 = vpop.f32.mrb[30].mxu1 }
 0x849   :  { %v2322_v43 = vadd.f32 %v2246_v17, %v3957_v12  ;;  %v2248_v32 = vpop.f32.mrb[15].mxu0  ;;  %v2319_v37 = vpop.f32.mrb[31].mxu1  ;;  %v3276_v49 = vadd.f32 %v2317_v21, %v3961_v27  ;;  %v2553_v27 = vld [vmem:[%s4454_s7] ss:$0 sm:$0xff] }
 0x84a   :  { %v2323_v1 = vadd.f32 %v2248_v32, %v3959_v14  ;;  %v3277_v41 = vadd.f32 %v2319_v37, %v3963_v30 }
 0x84b   :  { %v2549_v48 = vmul.f32 -1.442695, %v2322_v43  ;;  %v2551_v6 = vmul.f32 -1.442695, %v3276_v49 }
 0x84c   :  { %v2550_v51 = vmul.f32 -1.442695, %v2323_v1 }
 0x84d   :  { %3410 = vpow2.f32 %v2549_v48 }
 0x84e   :  { %3412 = vpow2.f32 %v2550_v51 }
 0x84f   :  { %3414 = vtanh.f32 %v3277_v41 }
 0x850   :  { %3416 = vpow2.f32 %v2551_v6 }
 0x857   :  { %v3411_v47 = vpop.eup %3410 }
 0x858   :  { %v2335_v53 = vadd.f32 1.0, %v3411_v47  ;;  %v3413_v13 = vpop.eup %3412 }
 0x859   :  { %v2336_v12 = vadd.f32 1.0, %v3413_v13  ;;  %v3415_v60 = vpop.eup %3414 }
 0x85a   :  { %3418 = vrcp.f32 %v2335_v53  ;;  %v3417_v35 = vpop.eup %3416 }
 0x85b   :  { %3420 = vrcp.f32 %v2336_v12  ;;  %v2337_v56 = vadd.f32 1.0, %v3417_v35 }
 0x85d   :  { %3422 = vrcp.f32 %v2337_v56 }
 0x864   :  { %v3419_v14 = vpop.eup %3418 }
 0x865   :  { %v2346_v50 = vmul.f32 %v3419_v14, %v3415_v60  ;;  %v3421_v23 = vpop.eup %3420 }
 0x866   :  { %v2345_v30 = vmul.f32 %v3421_v23, %v4344_v2 }
 0x867   :  { %v3423_v29 = vpop.eup %3422 }
 0x868   :  { %v2612_v44 = vpop.f32.mrb[16].mxu0  ;;  %v2347_v52 = vadd.f32 %v2346_v50, %v2345_v30 }
 0x869   :  { %v2457_v19 = vadd.f32 %v2612_v44, %v2553_v27  ;;  %v2451_v28 = vpop.f32.mrb[17].mxu0 }
 0x86a   :  { %v2452_v5 = vadd.f32 %v2553_v27, %v2451_v28  ;;  %3424 = vtanh.f32 %v2347_v52  ;;  %2353 = vst [vmem:[%s4457_s10] sm:$0xff] %v2347_v52 }
 0x86b   :  { %2491 = vst [vmem:[%s4458_s11 + $0x8] sm:$0xff] %v2457_v19 }
 0x86c   :  { %2490 = vst [vmem:[%s4458_s11] sm:$0xff] %v2452_v5  ;;  %v2615_v46 = vpop.f32.mrb[18].mxu0 }
 0x86d   :  { %v2467_v55 = vadd.f32 %v2615_v46, %v2553_v27  ;;  %v2461_v10 = vpop.f32.mrb[19].mxu0 }
 0x86e   :  { %v2462_v22 = vadd.f32 %v2553_v27, %v2461_v10 }
 0x86f   :  { %2493 = vst [vmem:[%s4458_s11 + $0x18] sm:$0xff] %v2467_v55 }
 0x870   :  { %2492 = vst [vmem:[%s4458_s11 + $0x10] sm:$0xff] %v2462_v22  ;;  %v2618_v8 = vpop.f32.mrb[20].mxu0 }
 0x871   :  { %v2477_v34 = vadd.f32 %v2618_v8, %v2553_v27  ;;  %v2471_v63 = vpop.f32.mrb[21].mxu0 }
 0x872   :  { %v2472_v2 = vadd.f32 %v2553_v27, %v2471_v63 }
 0x873   :  { %2495 = vst [vmem:[%s4458_s11 + $0x28] sm:$0xff] %v2477_v34 }
 0x874   :  { %2494 = vst [vmem:[%s4458_s11 + $0x20] sm:$0xff] %v2472_v2  ;;  %v3425_v7 = vpop.eup %3424 }
 0x875   :  { %v2349_v11 = vmul.f32 %v3425_v7, %v3423_v29 }
 0x877   :  { %2552 = vst [vmem:[%s4455_s8 + $0x38] sm:$0xff] %v2349_v11  ;;  %2352 = vst [vmem:[%s4456_s9] sm:$0xff] %v2349_v11  ;;  %2620 = vmatmul.mubr.f32.gmra.mrb[22].mxu0 %v2349_v11 }
 0x94a   :  { %v2621_v18 = vpop.f32.mrb[22].mxu0 }
 0x94b   :  { %v2487_v39 = vadd.f32 %v2621_v18, %v2553_v27  ;;  %v2481_v31 = vpop.f32.mrb[23].mxu0 }
 0x94c   :  { %v2482_v33 = vadd.f32 %v2553_v27, %v2481_v31 }
 0x94d   :  { %2497 = vst [vmem:[%s4458_s11 + $0x38] sm:$0xff] %v2487_v39 }
 0x94e   :  { %2496 = vst [vmem:[%s4458_s11 + $0x30] sm:$0xff] %v2482_v33 }
 0x94f   :  { %2514 = vsyncpa [#allocation4], 1 }

</bundles_post_ra>
